<compile_context>
chip_gen: v7x
topology: tpu7x:2x2x1
jax: 0.10.0
libtpu: 0.0.40
codegen_flags: <defaults>
</compile_context>

<pallas_src>
import numpy as np

import jax
import jax.numpy as jnp
from jax.experimental import pallas as pl
from jax.experimental.pallas import tpu as pltpu

OUTPUT_SIZE = 16   # spatial size of the input / reconstructed image
Z_DIM = 32
CHANNELS = 3


# ----------------------------------------------------------------------------
# Single fused Pallas kernel
# ----------------------------------------------------------------------------
def _vae_fused_kernel(
    x_ref, eps_ref,
    w1_ref, b1_ref,          # conv1   (dense map)   C*H*W -> 512
    w2_ref, b2_ref,          # conv2   (dense map)     512 -> 256
    w3_ref, b3_ref,          # enc fc                  256 -> 64
    wml_ref, bml_ref,        # merged [mu|logvar]       64 -> 2*Z
    w4_ref, b4_ref,          # dec fc1                   Z -> 64
    w5_ref, b5_ref,          # dec fc2                  64 -> 256
    w6_ref, b6_ref,          # convT1  (dense map)     256 -> 512
    w7_ref, b7_ref,          # convT2  (dense map)     512 -> C*H*W
    xhat_ref, z_ref, mu_ref, var_ref,
    mlv_ref,                 # VMEM scratch (B, 2*Z) holding [mu | logvar]
):
    def dense(h, w_ref, b_ref):
        return jnp.dot(h, w_ref[...], preferred_element_type=jnp.float32) + b_ref[...]

    def relu(t):
        return jnp.maximum(t, 0.0)

    # ---------------- encoder ----------------
    h = relu(dense(x_ref[...], w1_ref, b1_ref))
    h = relu(dense(h, w2_ref, b2_ref))
    h = relu(dense(h, w3_ref, b3_ref))
    mlv_ref[...] = dense(h, wml_ref, bml_ref)          # one merged projection

    zd = eps_ref.shape[-1]
    mu = mlv_ref[:, :zd]
    logvar = mlv_ref[:, zd:]
    std = jnp.exp(0.5 * logvar)                        # single exp; var = std*std
    z = mu + std * eps_ref[...]
    mu_ref[...] = mu
    var_ref[...] = std * std
    z_ref[...] = z

    # ---------------- decoder ----------------
    d = relu(dense(z, w4_ref, b4_ref))
    d = relu(dense(d, w5_ref, b5_ref))
    d = relu(dense(d, w6_ref, b6_ref))
    logits = dense(d, w7_ref, b7_ref)
    # sigmoid via EUP exp + approximate reciprocal (no VPU divide)
    xhat_ref[...] = pl.reciprocal(1.0 + jnp.exp(-logits), approx=True)


# ----------------------------------------------------------------------------
# Host-side (one-time) folding of conv / conv-transpose layers into dense maps
# over channel-major flattened activations.
# ----------------------------------------------------------------------------
def _conv_dense(w, b, H, W, stride, pad):
    """Conv2d with weight (kH,kW,Cin,Cout) as an exact dense map.
    Flat index convention (both sides): idx = c*(H*W) + y*W + x (channel-major)."""
    w = np.asarray(w, np.float32)
    b = np.asarray(b, np.float32)
    kH, kW, cin, cout = w.shape
    oh = (H + 2 * pad - kH) // stride + 1
    ow = (W + 2 * pad - kW) // stride + 1
    M = np.zeros((cin * H * W, cout * oh * ow), np.float32)
    ci = np.arange(cin) * (H * W)
    co = np.arange(cout) * (oh * ow)
    for oy in range(oh):
        for ox in range(ow):
            for ky in range(kH):
                for kx in range(kW):
                    iy = oy * stride - pad + ky
                    ix = ox * stride - pad + kx
                    if 0 <= iy < H and 0 <= ix < W:
                        M[np.ix_(ci + iy * W + ix, co + oy * ow + ox)] += w[ky, kx]
    bias = np.repeat(b, oh * ow)[None, :]
    return jnp.asarray(M), jnp.asarray(bias), oh, ow


def _convT_dense(w, b, H, W, stride, pad, out_pad):
    """Exact PyTorch ConvTranspose2d as a dense map; weight given as (kH,kW,Cin,Cout)
    (transpose real PyTorch (Cin,Cout,kH,kW) weights to this layout first)."""
    w = np.asarray(w, np.float32)
    b = np.asarray(b, np.float32)
    kH, kW, cin, cout = w.shape
    OH = (H - 1) * stride - 2 * pad + kH + out_pad
    OW = (W - 1) * stride - 2 * pad + kW + out_pad
    M = np.zeros((cin * H * W, cout * OH * OW), np.float32)
    ci = np.arange(cin) * (H * W)
    co = np.arange(cout) * (OH * OW)
    for iy in range(H):
        for ix in range(W):
            for ky in range(kH):
                for kx in range(kW):
                    oy = iy * stride - pad + ky
                    ox = ix * stride - pad + kx
                    if 0 <= oy < OH and 0 <= ox < OW:
                        M[np.ix_(ci + iy * W + ix, co + oy * OW + ox)] += w[ky, kx]
    bias = np.repeat(b, OH * OW)[None, :]
    return jnp.asarray(M), jnp.asarray(bias), OH, OW


# ----------------------------------------------------------------------------
# Parameters (deterministic synthetic init) + one-time preparation
# ----------------------------------------------------------------------------
def init_params(key, channels=CHANNELS, z_dim=Z_DIM, output_size=OUTPUT_SIZE):
    s = output_size // 4          # spatial size at encoder bottleneck
    flat = 16 * s * s
    ks = jax.random.split(key, 9)

    def w(k, shape, fan_in):
        return jax.random.normal(k, shape, jnp.float32) / jnp.sqrt(float(fan_in))

    return {
        # encoder
        "e_conv1_w": w(ks[0], (3, 3, channels, 8), 9 * channels),
        "e_conv1_b": jnp.zeros((8,), jnp.float32),
        "e_conv2_w": w(ks[1], (3, 3, 8, 16), 9 * 8),
        "e_conv2_b": jnp.zeros((16,), jnp.float32),
        "e_fc_w": w(ks[2], (flat, 64), flat),
        "e_fc_b": jnp.zeros((64,), jnp.float32),
        "e_mu_w": w(ks[3], (64, z_dim), 64),
        "e_mu_b": jnp.zeros((z_dim,), jnp.float32),
        "e_lv_w": w(ks[4], (64, z_dim), 64),
        "e_lv_b": jnp.zeros((z_dim,), jnp.float32),
        # decoder
        "d_fc1_w": w(ks[5], (z_dim, 64), z_dim),
        "d_fc1_b": jnp.zeros((64,), jnp.float32),
        "d_fc2_w": w(ks[6], (64, flat), 64),
        "d_fc2_b": jnp.zeros((flat,), jnp.float32),
        "d_dc1_w": w(ks[7], (3, 3, 16, 8), 9 * 16),
        "d_dc1_b": jnp.zeros((8,), jnp.float32),
        "d_dc2_w": w(ks[8], (3, 3, 8, channels), 9 * 8),
        "d_dc2_b": jnp.zeros((channels,), jnp.float32),
    }


def prepare_params(p, output_size=OUTPUT_SIZE):
    """One-time conversion of raw conv/fc weights into the fused kernel's operands."""
    s = output_size // 4
    w1, b1, h1, _ = _conv_dense(p["e_conv1_w"], p["e_conv1_b"], output_size, output_size, 2, 1)
    w2, b2, h2, _ = _conv_dense(p["e_conv2_w"], p["e_conv2_b"], h1, h1, 2, 1)
    assert h2 == s
    w3, b3 = p["e_fc_w"], p["e_fc_b"][None, :]
    wml = jnp.concatenate([p["e_mu_w"], p["e_lv_w"]], axis=1)           # (64, 2*Z)
    bml = jnp.concatenate([p["e_mu_b"], p["e_lv_b"]])[None, :]
    w4, b4 = p["d_fc1_w"], p["d_fc1_b"][None, :]
    w5, b5 = p["d_fc2_w"], p["d_fc2_b"][None, :]
    w6, b6, h6, _ = _convT_dense(p["d_dc1_w"], p["d_dc1_b"], s, s, 2, 1, 1)
    w7, b7, h7, _ = _convT_dense(p["d_dc2_w"], p["d_dc2_b"], h6, h6, 2, 1, 1)
    assert h7 == output_size
    return (w1, b1, w2, b2, w3, b3, wml, bml, w4, b4, w5, b5, w6, b6, w7, b7)


# ----------------------------------------------------------------------------
# VAE forward:  img (NCHW) -> (x_hat, z, mu, var), one fused pallas_call
# ----------------------------------------------------------------------------
def vae_forward(prep, img_nchw, eps):
    B, C, H, W = img_nchw.shape
    z_dim = eps.shape[-1]
    x_flat = img_nchw.reshape(B, C * H * W)    # NCHW flatten == channel-major layout

    # advisory cost / VMEM sizing (static, from shapes)
    param_elems = sum(int(a.size) for a in prep)
    total_bytes = 4 * (param_elems + x_flat.size + eps.size + B * (C * H * W + 3 * z_dim))
    flops = 2 * B * sum(int(a.shape[0] * a.shape[1]) for a in prep[0::2])
    transcendentals = B * (z_dim + 2 * C * H * W)

    out_shape = (
        jax.ShapeDtypeStruct((B, C * H * W), jnp.float32),   # x_hat (flat, lane-dense)
        jax.ShapeDtypeStruct((B, z_dim), jnp.float32),       # z
        jax.ShapeDtypeStruct((B, z_dim), jnp.float32),       # mu
        jax.ShapeDtypeStruct((B, z_dim), jnp.float32),       # var
    )
    xhat_flat, z, mu, var = pl.pallas_call(
        _vae_fused_kernel,
        out_shape=out_shape,
        scratch_shapes=[pltpu.VMEM((B, 2 * z_dim), jnp.float32)],
        compiler_params=pltpu.CompilerParams(
            vmem_limit_bytes=int(2 * total_bytes) + (8 << 20)),
        cost_estimate=pl.CostEstimate(
            flops=int(flops),
            transcendentals=int(transcendentals),
            bytes_accessed=int(total_bytes)),
    )(x_flat, eps, *prep)

    x_hat = xhat_flat.reshape(B, C, H, W)      # channel-major flat -> NCHW (pure reshape)
    return x_hat, z, mu, var


if __name__ == "__main__":
    key = jax.random.PRNGKey(0)
    k_param, k_img, k_eps = jax.random.split(key, 3)

    B = 2
    raw = init_params(k_param)
    prep = prepare_params(raw)                 # one-time weight folding (host side)
    img = jax.random.uniform(k_img, (B, CHANNELS, OUTPUT_SIZE, OUTPUT_SIZE), jnp.float32)
    eps = jax.random.normal(k_eps, (B, Z_DIM), jnp.float32)

    fwd = jax.jit(vae_forward)
    x_hat, z, mu, var = fwd(prep, img, eps)
    jax.block_until_ready((x_hat, z, mu, var))

    assert x_hat.shape == (B, CHANNELS, OUTPUT_SIZE, OUTPUT_SIZE)
    assert z.shape == (B, Z_DIM) and mu.shape == (B, Z_DIM) and var.shape == (B, Z_DIM)
    assert bool(jnp.isfinite(x_hat).all()) and bool(jnp.isfinite(z).all())
    assert bool(jnp.isfinite(mu).all()) and bool(jnp.isfinite(var).all())
    print("KERNEL_OK")
</pallas_src>

<mosaic_0001>
module attributes {stable_mosaic.version = 11 : i64} {
  func.func @_vae_fused_kernel(%arg0: memref<2x768xf32, #tpu.memory_space<vmem>>, %arg1: memref<2x32xf32, #tpu.memory_space<vmem>>, %arg2: memref<768x512xf32, #tpu.memory_space<vmem>>, %arg3: memref<1x512xf32, #tpu.memory_space<vmem>>, %arg4: memref<512x256xf32, #tpu.memory_space<vmem>>, %arg5: memref<1x256xf32, #tpu.memory_space<vmem>>, %arg6: memref<256x64xf32, #tpu.memory_space<vmem>>, %arg7: memref<1x64xf32, #tpu.memory_space<vmem>>, %arg8: memref<64x64xf32, #tpu.memory_space<vmem>>, %arg9: memref<1x64xf32, #tpu.memory_space<vmem>>, %arg10: memref<32x64xf32, #tpu.memory_space<vmem>>, %arg11: memref<1x64xf32, #tpu.memory_space<vmem>>, %arg12: memref<64x256xf32, #tpu.memory_space<vmem>>, %arg13: memref<1x256xf32, #tpu.memory_space<vmem>>, %arg14: memref<256x512xf32, #tpu.memory_space<vmem>>, %arg15: memref<1x512xf32, #tpu.memory_space<vmem>>, %arg16: memref<512x768xf32, #tpu.memory_space<vmem>>, %arg17: memref<1x768xf32, #tpu.memory_space<vmem>>, %arg18: memref<2x768xf32, #tpu.memory_space<vmem>>, %arg19: memref<2x32xf32, #tpu.memory_space<vmem>>, %arg20: memref<2x32xf32, #tpu.memory_space<vmem>>, %arg21: memref<2x32xf32, #tpu.memory_space<vmem>>, %arg22: memref<2x64xf32, #tpu.memory_space<vmem>>) attributes {dimension_semantics = [], scalar_prefetch = 0 : i64, scratch_operands = 1 : i64, tpu.core_type = #tpu.core_type<tc>} {
    %c0 = arith.constant 0 : index
    %c0_0 = arith.constant 0 : index
    %0 = vector.load %arg0[%c0, %c0_0] : memref<2x768xf32, #tpu.memory_space<vmem>>, vector<2x768xf32>
    %c0_1 = arith.constant 0 : index
    %c0_2 = arith.constant 0 : index
    %1 = vector.load %arg2[%c0_1, %c0_2] : memref<768x512xf32, #tpu.memory_space<vmem>>, vector<768x512xf32>
    %cst = arith.constant dense<0.000000e+00> : vector<2x512xf32>
    %2 = tpu.matmul %0, %1, %cst {dimension_numbers = #tpu.dot_dimension_numbers<[1], [0], [0], [1], [0, 0, 1, 1], [], []>} : vector<2x768xf32>, vector<768x512xf32>, vector<2x512xf32> -> vector<2x512xf32>
    %c0_3 = arith.constant 0 : index
    %c0_4 = arith.constant 0 : index
    %3 = vector.load %arg3[%c0_3, %c0_4] : memref<1x512xf32, #tpu.memory_space<vmem>>, vector<1x512xf32>
    %4 = vector.broadcast %3 : vector<1x512xf32> to vector<2x512xf32>
    %5 = arith.addf %2, %4 : vector<2x512xf32>
    %cst_5 = arith.constant 0.000000e+00 : f32
    %6 = vector.broadcast %cst_5 : f32 to vector<2x512xf32>
    %7 = arith.maximumf %5, %6 : vector<2x512xf32>
    %c0_6 = arith.constant 0 : index
    %c0_7 = arith.constant 0 : index
    %8 = vector.load %arg4[%c0_6, %c0_7] : memref<512x256xf32, #tpu.memory_space<vmem>>, vector<512x256xf32>
    %cst_8 = arith.constant dense<0.000000e+00> : vector<2x256xf32>
    %9 = tpu.matmul %7, %8, %cst_8 {dimension_numbers = #tpu.dot_dimension_numbers<[1], [0], [0], [1], [0, 0, 1, 1], [], []>} : vector<2x512xf32>, vector<512x256xf32>, vector<2x256xf32> -> vector<2x256xf32>
    %c0_9 = arith.constant 0 : index
    %c0_10 = arith.constant 0 : index
    %10 = vector.load %arg5[%c0_9, %c0_10] : memref<1x256xf32, #tpu.memory_space<vmem>>, vector<1x256xf32>
    %11 = vector.broadcast %10 : vector<1x256xf32> to vector<2x256xf32>
    %12 = arith.addf %9, %11 : vector<2x256xf32>
    %cst_11 = arith.constant 0.000000e+00 : f32
    %13 = vector.broadcast %cst_11 : f32 to vector<2x256xf32>
    %14 = arith.maximumf %12, %13 : vector<2x256xf32>
    %c0_12 = arith.constant 0 : index
    %c0_13 = arith.constant 0 : index
    %15 = vector.load %arg6[%c0_12, %c0_13] : memref<256x64xf32, #tpu.memory_space<vmem>>, vector<256x64xf32>
    %cst_14 = arith.constant dense<0.000000e+00> : vector<2x64xf32>
    %16 = tpu.matmul %14, %15, %cst_14 {dimension_numbers = #tpu.dot_dimension_numbers<[1], [0], [0], [1], [0, 0, 1, 1], [], []>} : vector<2x256xf32>, vector<256x64xf32>, vector<2x64xf32> -> vector<2x64xf32>
    %c0_15 = arith.constant 0 : index
    %c0_16 = arith.constant 0 : index
    %17 = vector.load %arg7[%c0_15, %c0_16] : memref<1x64xf32, #tpu.memory_space<vmem>>, vector<1x64xf32>
    %18 = vector.broadcast %17 : vector<1x64xf32> to vector<2x64xf32>
    %19 = arith.addf %16, %18 : vector<2x64xf32>
    %cst_17 = arith.constant 0.000000e+00 : f32
    %20 = vector.broadcast %cst_17 : f32 to vector<2x64xf32>
    %21 = arith.maximumf %19, %20 : vector<2x64xf32>
    %c0_18 = arith.constant 0 : index
    %c0_19 = arith.constant 0 : index
    %22 = vector.load %arg8[%c0_18, %c0_19] : memref<64x64xf32, #tpu.memory_space<vmem>>, vector<64x64xf32>
    %cst_20 = arith.constant dense<0.000000e+00> : vector<2x64xf32>
    %23 = tpu.matmul %21, %22, %cst_20 {dimension_numbers = #tpu.dot_dimension_numbers<[1], [0], [0], [1], [0, 0, 1, 1], [], []>} : vector<2x64xf32>, vector<64x64xf32>, vector<2x64xf32> -> vector<2x64xf32>
    %c0_21 = arith.constant 0 : index
    %c0_22 = arith.constant 0 : index
    %24 = vector.load %arg9[%c0_21, %c0_22] : memref<1x64xf32, #tpu.memory_space<vmem>>, vector<1x64xf32>
    %25 = vector.broadcast %24 : vector<1x64xf32> to vector<2x64xf32>
    %26 = arith.addf %23, %25 : vector<2x64xf32>
    %c0_23 = arith.constant 0 : index
    %c0_24 = arith.constant 0 : index
    %27 = vector.load %arg22[%c0_23, %c0_24] : memref<2x64xf32, #tpu.memory_space<vmem>>, vector<2x64xf32>
    tpu.vector_store %arg22[%c0_23, %c0_24], %26 {strides = array<i32>} : memref<2x64xf32, #tpu.memory_space<vmem>>, vector<2x64xf32>,
    %c0_25 = arith.constant 0 : index
    %c0_26 = arith.constant 0 : index
    %28 = vector.load %arg22[%c0_25, %c0_26] : memref<2x64xf32, #tpu.memory_space<vmem>>, vector<2x32xf32>
    %c0_27 = arith.constant 0 : index
    %c32 = arith.constant 32 : index
    %29 = vector.load %arg22[%c0_27, %c32] : memref<2x64xf32, #tpu.memory_space<vmem>>, vector<2x32xf32>
    %cst_28 = arith.constant 5.000000e-01 : f32
    %30 = vector.broadcast %cst_28 : f32 to vector<2x32xf32>
    %31 = arith.mulf %30, %29 : vector<2x32xf32>
    %32 = math.exp %31 : vector<2x32xf32>
    %c0_29 = arith.constant 0 : index
    %c0_30 = arith.constant 0 : index
    %33 = vector.load %arg1[%c0_29, %c0_30] : memref<2x32xf32, #tpu.memory_space<vmem>>, vector<2x32xf32>
    %34 = arith.mulf %32, %33 : vector<2x32xf32>
    %35 = arith.addf %28, %34 : vector<2x32xf32>
    %c0_31 = arith.constant 0 : index
    %c0_32 = arith.constant 0 : index
    %36 = vector.load %arg20[%c0_31, %c0_32] : memref<2x32xf32, #tpu.memory_space<vmem>>, vector<2x32xf32>
    tpu.vector_store %arg20[%c0_31, %c0_32], %28 {strides = array<i32>} : memref<2x32xf32, #tpu.memory_space<vmem>>, vector<2x32xf32>,
    %37 = arith.mulf %32, %32 : vector<2x32xf32>
    %c0_33 = arith.constant 0 : index
    %c0_34 = arith.constant 0 : index
    %38 = vector.load %arg21[%c0_33, %c0_34] : memref<2x32xf32, #tpu.memory_space<vmem>>, vector<2x32xf32>
    tpu.vector_store %arg21[%c0_33, %c0_34], %37 {strides = array<i32>} : memref<2x32xf32, #tpu.memory_space<vmem>>, vector<2x32xf32>,
    %c0_35 = arith.constant 0 : index
    %c0_36 = arith.constant 0 : index
    %39 = vector.load %arg19[%c0_35, %c0_36] : memref<2x32xf32, #tpu.memory_space<vmem>>, vector<2x32xf32>
    tpu.vector_store %arg19[%c0_35, %c0_36], %35 {strides = array<i32>} : memref<2x32xf32, #tpu.memory_space<vmem>>, vector<2x32xf32>,
    %c0_37 = arith.constant 0 : index
    %c0_38 = arith.constant 0 : index
    %40 = vector.load %arg10[%c0_37, %c0_38] : memref<32x64xf32, #tpu.memory_space<vmem>>, vector<32x64xf32>
    %cst_39 = arith.constant dense<0.000000e+00> : vector<2x64xf32>
    %41 = tpu.matmul %35, %40, %cst_39 {dimension_numbers = #tpu.dot_dimension_numbers<[1], [0], [0], [1], [0, 0, 1, 1], [], []>} : vector<2x32xf32>, vector<32x64xf32>, vector<2x64xf32> -> vector<2x64xf32>
    %c0_40 = arith.constant 0 : index
    %c0_41 = arith.constant 0 : index
    %42 = vector.load %arg11[%c0_40, %c0_41] : memref<1x64xf32, #tpu.memory_space<vmem>>, vector<1x64xf32>
    %43 = vector.broadcast %42 : vector<1x64xf32> to vector<2x64xf32>
    %44 = arith.addf %41, %43 : vector<2x64xf32>
    %cst_42 = arith.constant 0.000000e+00 : f32
    %45 = vector.broadcast %cst_42 : f32 to vector<2x64xf32>
    %46 = arith.maximumf %44, %45 : vector<2x64xf32>
    %c0_43 = arith.constant 0 : index
    %c0_44 = arith.constant 0 : index
    %47 = vector.load %arg12[%c0_43, %c0_44] : memref<64x256xf32, #tpu.memory_space<vmem>>, vector<64x256xf32>
    %cst_45 = arith.constant dense<0.000000e+00> : vector<2x256xf32>
    %48 = tpu.matmul %46, %47, %cst_45 {dimension_numbers = #tpu.dot_dimension_numbers<[1], [0], [0], [1], [0, 0, 1, 1], [], []>} : vector<2x64xf32>, vector<64x256xf32>, vector<2x256xf32> -> vector<2x256xf32>
    %c0_46 = arith.constant 0 : index
    %c0_47 = arith.constant 0 : index
    %49 = vector.load %arg13[%c0_46, %c0_47] : memref<1x256xf32, #tpu.memory_space<vmem>>, vector<1x256xf32>
    %50 = vector.broadcast %49 : vector<1x256xf32> to vector<2x256xf32>
    %51 = arith.addf %48, %50 : vector<2x256xf32>
    %cst_48 = arith.constant 0.000000e+00 : f32
    %52 = vector.broadcast %cst_48 : f32 to vector<2x256xf32>
    %53 = arith.maximumf %51, %52 : vector<2x256xf32>
    %c0_49 = arith.constant 0 : index
    %c0_50 = arith.constant 0 : index
    %54 = vector.load %arg14[%c0_49, %c0_50] : memref<256x512xf32, #tpu.memory_space<vmem>>, vector<256x512xf32>
    %cst_51 = arith.constant dense<0.000000e+00> : vector<2x512xf32>
    %55 = tpu.matmul %53, %54, %cst_51 {dimension_numbers = #tpu.dot_dimension_numbers<[1], [0], [0], [1], [0, 0, 1, 1], [], []>} : vector<2x256xf32>, vector<256x512xf32>, vector<2x512xf32> -> vector<2x512xf32>
    %c0_52 = arith.constant 0 : index
    %c0_53 = arith.constant 0 : index
    %56 = vector.load %arg15[%c0_52, %c0_53] : memref<1x512xf32, #tpu.memory_space<vmem>>, vector<1x512xf32>
    %57 = vector.broadcast %56 : vector<1x512xf32> to vector<2x512xf32>
    %58 = arith.addf %55, %57 : vector<2x512xf32>
    %cst_54 = arith.constant 0.000000e+00 : f32
    %59 = vector.broadcast %cst_54 : f32 to vector<2x512xf32>
    %60 = arith.maximumf %58, %59 : vector<2x512xf32>
    %c0_55 = arith.constant 0 : index
    %c0_56 = arith.constant 0 : index
    %61 = vector.load %arg16[%c0_55, %c0_56] : memref<512x768xf32, #tpu.memory_space<vmem>>, vector<512x768xf32>
    %cst_57 = arith.constant dense<0.000000e+00> : vector<2x768xf32>
    %62 = tpu.matmul %60, %61, %cst_57 {dimension_numbers = #tpu.dot_dimension_numbers<[1], [0], [0], [1], [0, 0, 1, 1], [], []>} : vector<2x512xf32>, vector<512x768xf32>, vector<2x768xf32> -> vector<2x768xf32>
    %c0_58 = arith.constant 0 : index
    %c0_59 = arith.constant 0 : index
    %63 = vector.load %arg17[%c0_58, %c0_59] : memref<1x768xf32, #tpu.memory_space<vmem>>, vector<1x768xf32>
    %64 = vector.broadcast %63 : vector<1x768xf32> to vector<2x768xf32>
    %65 = arith.addf %62, %64 : vector<2x768xf32>
    %cst_60 = arith.constant 0.000000e+00 : f32
    %66 = vector.broadcast %cst_60 : f32 to vector<2x768xf32>
    %67 = arith.subf %66, %65 : vector<2x768xf32>
    %68 = math.exp %67 : vector<2x768xf32>
    %cst_61 = arith.constant 1.000000e+00 : f32
    %69 = vector.broadcast %cst_61 : f32 to vector<2x768xf32>
    %70 = arith.addf %69, %68 : vector<2x768xf32>
    %71 = tpu.reciprocal %70 {approx = true} : vector<2x768xf32> -> vector<2x768xf32>
    %c0_62 = arith.constant 0 : index
    %c0_63 = arith.constant 0 : index
    %72 = vector.load %arg18[%c0_62, %c0_63] : memref<2x768xf32, #tpu.memory_space<vmem>>, vector<2x768xf32>
    tpu.vector_store %arg18[%c0_62, %c0_63], %71 {strides = array<i32>} : memref<2x768xf32, #tpu.memory_space<vmem>>, vector<2x768xf32>,
    return
  }
}

</mosaic_0001>

<bundles_post_ra>
// kernel: vae_forward.1
= control target key start
LH: loop header
LB: loop body
LE: loop exit
PB: predicated region body
PF: predicated region fallthrough
CT: control target
= control target key end

     0   :  { %s5402_s0 = inlined_call_operand.vmem [shape: f32[2,768], index: 0, kind: input, shape index: {}]   ;;  %s5403_s1 = inlined_call_operand.hbm [shape: f32[2,32], index: 1, kind: input, shape index: {}]   ;;  %s5404_s2 = inlined_call_operand.hbm [shape: f32[768,512], index: 2, kind: input, shape index: {}]   ;;  %s5405_s3 = inlined_call_operand.hbm [shape: f32[1,512], index: 3, kind: input, shape index: {}]   ;;  %s5406_s4 = inlined_call_operand.hbm [shape: f32[512,256], index: 4, kind: input, shape index: {}]   ;;  %s5407_s5 = inlined_call_operand.hbm [shape: f32[1,256], index: 5, kind: input, shape index: {}]   ;;  %s5408_s6 = inlined_call_operand.vmem [shape: f32[256,64], index: 6, kind: input, shape index: {}]   ;;  %s5409_s7 = inlined_call_operand.hbm [shape: f32[1,64], index: 7, kind: input, shape index: {}]   ;;  %s5410_s8 = inlined_call_operand.hbm [shape: f32[64,64], index: 8, kind: input, shape index: {}]   ;;  %s5411_s9 = inlined_call_operand.hbm [shape: f32[1,64], index: 9, kind: input, shape index: {}]   ;;  %s5412_s10 = inlined_call_operand.hbm [shape: f32[32,64], index: 10, kind: input, shape index: {}]   ;;  %s5413_s11 = inlined_call_operand.hbm [shape: f32[1,64], index: 11, kind: input, shape index: {}]   ;;  %s5414_s12 = inlined_call_operand.hbm [shape: f32[64,256], index: 12, kind: input, shape index: {}]   ;;  %s5415_s13 = inlined_call_operand.hbm [shape: f32[1,256], index: 13, kind: input, shape index: {}]   ;;  %s5416_s14 = inlined_call_operand.hbm [shape: f32[256,512], index: 14, kind: input, shape index: {}]   ;;  %s5417_s15 = inlined_call_operand.hbm [shape: f32[1,512], index: 15, kind: input, shape index: {}]   ;;  %s5418_s16 = inlined_call_operand.hbm [shape: f32[512,768], index: 16, kind: input, shape index: {}]   ;;  %s5419_s17 = inlined_call_operand.hbm [shape: f32[1,768], index: 17, kind: input, shape index: {}]   ;;  %s5420_s18 = inlined_call_operand.vmem [shape: f32[2,768], index: 18, kind: output, shape index: {0}]   ;;  %s5421_s19 = inlined_call_operand.hbm [shape: f32[2,32], index: 19, kind: output, shape index: {1}]   ;;  %s5422_s20 = inlined_call_operand.hbm [shape: f32[2,32], index: 20, kind: output, shape index: {2}]   ;;  %s5423_s21 = inlined_call_operand.hbm [shape: f32[2,32], index: 21, kind: output, shape index: {3}]  }
   0x1   :  { %5435 = sst [smem:[#allocation44_spill]] %s5402_s0 }
   0x2   :  { %5436 = sst [smem:[#allocation45_spill]] %s5403_s1 }
   0x3   :  { %5437 = sst [smem:[#allocation46_spill]] %s5404_s2 }
   0x4   :  { %5438 = sst [smem:[#allocation47_spill]] %s5405_s3 }
   0x5   :  { %5439 = sst [smem:[#allocation48_spill]] %s5406_s4 }
   0x6   :  { %5440 = sst [smem:[#allocation49_spill]] %s5407_s5 }
   0x7   :  { %5441 = sst [smem:[#allocation50_spill]] %s5420_s18 }
   0x8   :  { %5442 = sst [smem:[#allocation51_spill]] %s5423_s21 }
   0x9   :  { %27 = vsyncpa [#allocation4], 0 }
   0xa   :  { %28 = vsyncpa [#allocation7], 0 }
   0xb   :  { %29 = vsyncpa [#allocation10], 0 }
   0xc   :  { %30 = vsyncpa [#allocation13], 0 }
   0xd   :  { %31 = vsyncpa [#allocation16], 0 }
   0xe   :  { %32 = vsyncpa [#allocation19], 0 }
   0xf   :  { %33 = vsyncpa [#allocation22], 0 }
  0x10   :  { %34 = vsyncpa [#allocation25], 0 }
  0x11   :  { %35 = vsyncpa [#allocation28], 0 }
  0x12   :  { %36 = vsyncpa [#allocation5], 0 }
  0x13   :  { %37 = vsyncpa [#allocation31], 0  ;;  %s4795_s2 = smov [#allocation6]   ;;  %s5443_s3 = sld [smem:[#allocation46_spill]] }
  0x14   :  { %s55_s25 = sshll.u32 %s4795_s2, 4  ;;  %s56_s25 = int_to_ptr.vmem [resolvable:$true] %s55_s25 }
  0x19   :  { %s4355_s28 = scalar_lea.hbm %s5443_s3, 49152 }
  0x1a   :  { %p4356_p0 = scmp.ne.s32.totalorder %s5443_s3, %s4355_s28  ;;  %p4359_p1 = scmp.lt.u32.totalorder %s4355_s28, %s5443_s3 }
  0x1c   :  { %p4361_p2 = pnand %p4359_p1, %p4356_p0 }
  0x1e   :  { %4364 = shalt.err (!%p4361_p2)
}
  0x1f   :  { %s4365_s5 = scalar_lea.vmem %s56_s25, 49152  ;;  %p4370_p4 = scmp.lt.s32.totalorder %s56_s25, %s56_s25 }
  0x20   :  { %p4366_p3 = scmp.ne.s32.totalorder %s56_s25, %s4365_s5  ;;  %p4371_p5 = scmp.lt.s32.totalorder %s4365_s5, %s4365_s5 }
  0x22   :  { %p4372_p6 = por %p4371_p5, %p4370_p4 }
  0x24   :  { %p4373_p7 = pnand %p4372_p6, %p4366_p3 }
  0x26   :  { %4376 = shalt.err (!%p4373_p7)
}
  0x27   :  { %s5432_s22 = smov 512   ;;  %s5433_s23 = smov 32  }
  0x28   :  { %61 = dma.hbm_to_vmem [thread:$0]  %s5443_s3, 49152, %s56_s25, [#allocation7], %s5432_s22, %s5432_s22, %s5433_s23  }
  0x29   :  { %s4798_s2 = smov [#allocation9]   ;;  %s5444_s29 = sld [smem:[#allocation48_spill]] }
  0x2a   :  { %s77_s26 = sshll.u32 %s4798_s2, 4  ;;  %s78_s26 = int_to_ptr.vmem [resolvable:$true] %s77_s26 }
  0x2f   :  { %s4377_s0 = scalar_lea.hbm %s5444_s29, 16384 }
  0x30   :  { %p4378_p8 = scmp.ne.s32.totalorder %s5444_s29, %s4377_s0  ;;  %p4381_p9 = scmp.lt.u32.totalorder %s4377_s0, %s5444_s29 }
  0x32   :  { %p4383_p10 = pnand %p4381_p9, %p4378_p8 }
  0x34   :  { %4386 = shalt.err (!%p4383_p10)
}
  0x35   :  { %s4387_s18 = scalar_lea.vmem %s78_s26, 16384  ;;  %p4392_p12 = scmp.lt.s32.totalorder %s78_s26, %s78_s26 }
  0x36   :  { %p4388_p11 = scmp.ne.s32.totalorder %s78_s26, %s4387_s18  ;;  %p4393_p13 = scmp.lt.s32.totalorder %s4387_s18, %s4387_s18 }
  0x38   :  { %p4394_p0 = por %p4393_p13, %p4392_p12 }
  0x3a   :  { %p4395_p1 = pnand %p4394_p0, %p4388_p11 }
  0x3c   :  { %4398 = shalt.err (!%p4395_p1)
}
  0x3d   :  { %s4799_s25 = smov 256   ;;  %s4800_s3 = smov 16  }
  0x3e   :  { %83 = dma.hbm_to_vmem [thread:$0]  %s5444_s29, 16384, %s78_s26, [#allocation10], %s4799_s25, %s4799_s25, %s4800_s3  }
  0x3f   :  { %s4801_s21 = smov [#allocation12]   ;;  %s4802_s27 = smov [#allocation15]  }
  0x40   :  { %s102_s2 = sshll.u32 %s4801_s21, 4  ;;  %s124_s28 = sshll.u32 %s4802_s27, 4  ;;  %s103_s2 = int_to_ptr.vmem [resolvable:$true] %s102_s2  ;;  %s125_s28 = int_to_ptr.vmem [resolvable:$true] %s124_s28 }
  0x41   :  { %s4399_s4 = scalar_lea.hbm %s5409_s7, 16 }
  0x42   :  { %p4400_p2 = scmp.ne.s32.totalorder %s5409_s7, %s4399_s4  ;;  %p4403_p3 = scmp.lt.u32.totalorder %s4399_s4, %s5409_s7 }
  0x44   :  { %p4405_p4 = pnand %p4403_p3, %p4400_p2 }
  0x46   :  { %4408 = shalt.err (!%p4405_p4)
}
  0x47   :  { %s4409_s26 = scalar_lea.vmem %s103_s2, 16  ;;  %s4413_s29 = scalar_lea.vmem %s103_s2, 32 }
  0x48   :  { %p4410_p5 = scmp.ne.s32.totalorder %s103_s2, %s4409_s26  ;;  %p4414_p6 = scmp.lt.s32.totalorder %s103_s2, %s103_s2 }
  0x49   :  { %p4415_p7 = scmp.lt.s32.totalorder %s4413_s29, %s4409_s26 }
  0x4b   :  { %p4416_p8 = por %p4415_p7, %p4414_p6 }
  0x4d   :  { %p4417_p9 = pnand %p4416_p8, %p4410_p5 }
  0x4f   :  { %4420 = shalt.err (!%p4417_p9)
}
  0x50   :  { %105 = dma.hbm_to_vmem [thread:$0]  %s5409_s7, 16, %s103_s2, [#allocation13]  }
  0x51   :  { %s4421_s0 = scalar_lea.hbm %s5411_s9, 16 }
  0x52   :  { %p4422_p10 = scmp.ne.s32.totalorder %s5411_s9, %s4421_s0  ;;  %p4425_p11 = scmp.lt.u32.totalorder %s4421_s0, %s5411_s9 }
  0x54   :  { %p4427_p12 = pnand %p4425_p11, %p4422_p10 }
  0x56   :  { %4430 = shalt.err (!%p4427_p12)
}
  0x57   :  { %s4431_s30 = scalar_lea.vmem %s125_s28, 16  ;;  %s4435_s5 = scalar_lea.vmem %s125_s28, 32 }
  0x58   :  { %p4432_p13 = scmp.ne.s32.totalorder %s125_s28, %s4431_s30  ;;  %p4436_p0 = scmp.lt.s32.totalorder %s125_s28, %s125_s28 }
  0x59   :  { %p4437_p1 = scmp.lt.s32.totalorder %s4435_s5, %s4431_s30 }
  0x5b   :  { %p4438_p2 = por %p4437_p1, %p4436_p0 }
  0x5d   :  { %p4439_p3 = pnand %p4438_p2, %p4432_p13 }
  0x5f   :  { %4442 = shalt.err (!%p4439_p3)
}
  0x60   :  { %127 = dma.hbm_to_vmem [thread:$0]  %s5411_s9, 16, %s125_s28, [#allocation16]  }
  0x61   :  { %s4803_s26 = smov [#allocation18]   ;;  %s4804_s1 = smov [#allocation21]  }
  0x62   :  { %s146_s29 = sshll.u32 %s4803_s26, 4  ;;  %s168_s24 = sshll.u32 %s4804_s1, 4  ;;  %s147_s29 = int_to_ptr.vmem [resolvable:$true] %s146_s29  ;;  %s169_s24 = int_to_ptr.vmem [resolvable:$true] %s168_s24 }
  0x63   :  { %s4443_s0 = scalar_lea.hbm %s5413_s11, 16 }
  0x64   :  { %p4444_p4 = scmp.ne.s32.totalorder %s5413_s11, %s4443_s0  ;;  %p4447_p5 = scmp.lt.u32.totalorder %s4443_s0, %s5413_s11 }
  0x66   :  { %p4449_p6 = pnand %p4447_p5, %p4444_p4 }
  0x68   :  { %4452 = shalt.err (!%p4449_p6)
}
  0x69   :  { %s4453_s9 = scalar_lea.vmem %s147_s29, 16  ;;  %s4457_s28 = scalar_lea.vmem %s147_s29, 32 }
  0x6a   :  { %p4454_p7 = scmp.ne.s32.totalorder %s147_s29, %s4453_s9  ;;  %p4458_p8 = scmp.lt.s32.totalorder %s147_s29, %s147_s29 }
  0x6b   :  { %p4459_p9 = scmp.lt.s32.totalorder %s4457_s28, %s4453_s9 }
  0x6d   :  { %p4460_p10 = por %p4459_p9, %p4458_p8 }
  0x6f   :  { %p4461_p11 = pnand %p4460_p10, %p4454_p7 }
  0x71   :  { %4464 = shalt.err (!%p4461_p11)
}
  0x72   :  { %149 = dma.hbm_to_vmem [thread:$0]  %s5413_s11, 16, %s147_s29, [#allocation19]  }
  0x73   :  { %s4465_s26 = scalar_lea.hbm %s5415_s13, 32 }
  0x74   :  { %p4466_p12 = scmp.ne.s32.totalorder %s5415_s13, %s4465_s26  ;;  %p4469_p13 = scmp.lt.u32.totalorder %s4465_s26, %s5415_s13 }
  0x76   :  { %p4471_p0 = pnand %p4469_p13, %p4466_p12 }
  0x78   :  { %4474 = shalt.err (!%p4471_p0)
}
  0x79   :  { %s4475_s22 = scalar_lea.vmem %s169_s24, 32  ;;  %p4480_p2 = scmp.lt.s32.totalorder %s169_s24, %s169_s24 }
  0x7a   :  { %p4476_p1 = scmp.ne.s32.totalorder %s169_s24, %s4475_s22  ;;  %p4481_p3 = scmp.lt.s32.totalorder %s4475_s22, %s4475_s22 }
  0x7c   :  { %p4482_p4 = por %p4481_p3, %p4480_p2 }
  0x7e   :  { %p4483_p5 = pnand %p4482_p4, %p4476_p1 }
  0x80   :  { %4486 = shalt.err (!%p4483_p5)
}
  0x81   :  { %171 = dma.hbm_to_vmem [thread:$0]  %s5415_s13, 32, %s169_s24, [#allocation22]  }
  0x82   :  { %s4805_s23 = smov [#allocation24]   ;;  %s4806_s4 = smov [#allocation3]  }
  0x83   :  { %s190_s18 = sshll.u32 %s4805_s23, 4  ;;  %s46_s9 = sshll.u32 %s4806_s4, 4  ;;  %s191_s18 = int_to_ptr.vmem [resolvable:$true] %s190_s18  ;;  %s47_s9 = int_to_ptr.vmem [resolvable:$true] %s46_s9 }
  0x84   :  { %s4487_s5 = scalar_lea.hbm %s5417_s15, 64 }
  0x85   :  { %p4488_p6 = scmp.ne.s32.totalorder %s5417_s15, %s4487_s5  ;;  %p4491_p7 = scmp.lt.u32.totalorder %s4487_s5, %s5417_s15 }
  0x87   :  { %p4493_p8 = pnand %p4491_p7, %p4488_p6 }
  0x89   :  { %4496 = shalt.err (!%p4493_p8)
}
  0x8a   :  { %s4497_s13 = scalar_lea.vmem %s191_s18, 64  ;;  %p4502_p10 = scmp.lt.s32.totalorder %s191_s18, %s191_s18 }
  0x8b   :  { %p4498_p9 = scmp.ne.s32.totalorder %s191_s18, %s4497_s13  ;;  %p4503_p11 = scmp.lt.s32.totalorder %s4497_s13, %s4497_s13 }
  0x8d   :  { %p4504_p12 = por %p4503_p11, %p4502_p10 }
  0x8f   :  { %p4505_p13 = pnand %p4504_p12, %p4498_p9 }
  0x91   :  { %4508 = shalt.err (!%p4505_p13)
}
  0x92   :  { %193 = dma.hbm_to_vmem [thread:$0]  %s5417_s15, 64, %s191_s18, [#allocation25]  }
  0x93   :  { %s5445_s22 = sld [smem:[#allocation45_spill]] }
  0x99   :  { %s4509_s11 = scalar_lea.hbm %s5445_s22, 32 }
  0x9a   :  { %p4510_p0 = scmp.ne.s32.totalorder %s5445_s22, %s4509_s11  ;;  %p4513_p1 = scmp.lt.u32.totalorder %s4509_s11, %s5445_s22 }
  0x9c   :  { %p4515_p2 = pnand %p4513_p1, %p4510_p0 }
  0x9e   :  { %4518 = shalt.err (!%p4515_p2)
}
  0x9f   :  { %s4519_s30 = scalar_lea.vmem %s47_s9, 32  ;;  %p4524_p4 = scmp.lt.s32.totalorder %s47_s9, %s47_s9 }
  0xa0   :  { %p4520_p3 = scmp.ne.s32.totalorder %s47_s9, %s4519_s30  ;;  %p4525_p5 = scmp.lt.s32.totalorder %s4519_s30, %s4519_s30 }
  0xa2   :  { %p4526_p6 = por %p4525_p5, %p4524_p4 }
  0xa4   :  { %p4527_p7 = pnand %p4526_p6, %p4520_p3 }
  0xa6   :  { %4530 = shalt.err (!%p4527_p7)
}
  0xa7   :  { %49 = dma.hbm_to_vmem [thread:$0]  %s5445_s22, 32, %s47_s9, [#allocation4]  }
  0xa8   :  { %s4807_s5 = smov [#allocation8]   ;;  %s4808_s2 = smov [#allocation11]  }
  0xa9   :  { %s68_s7 = sshll.u32 %s4807_s5, 4  ;;  %s90_s26 = sshll.u32 %s4808_s2, 4  ;;  %s69_s7 = int_to_ptr.vmem [resolvable:$true] %s68_s7  ;;  %s91_s26 = int_to_ptr.vmem [resolvable:$true] %s90_s26 }
  0xaa   :  { %s5446_s24 = sld [smem:[#allocation47_spill]] }
  0xb0   :  { %s4531_s21 = scalar_lea.hbm %s5446_s24, 64 }
  0xb1   :  { %p4532_p8 = scmp.ne.s32.totalorder %s5446_s24, %s4531_s21  ;;  %p4535_p9 = scmp.lt.u32.totalorder %s4531_s21, %s5446_s24 }
  0xb3   :  { %p4537_p10 = pnand %p4535_p9, %p4532_p8 }
  0xb5   :  { %4540 = shalt.err (!%p4537_p10)
}
  0xb6   :  { %s4541_s9 = scalar_lea.vmem %s69_s7, 64  ;;  %p4546_p12 = scmp.lt.s32.totalorder %s69_s7, %s69_s7 }
  0xb7   :  { %p4542_p11 = scmp.ne.s32.totalorder %s69_s7, %s4541_s9  ;;  %p4547_p13 = scmp.lt.s32.totalorder %s4541_s9, %s4541_s9 }
  0xb9   :  { %p4548_p0 = por %p4547_p13, %p4546_p12 }
  0xbb   :  { %p4549_p1 = pnand %p4548_p0, %p4542_p11 }
  0xbd   :  { %4552 = shalt.err (!%p4549_p1)
}
  0xbe   :  { %71 = dma.hbm_to_vmem [thread:$0]  %s5446_s24, 64, %s69_s7, [#allocation7]  }
  0xbf   :  { %s5447_s30 = sld [smem:[#allocation49_spill]] }
  0xc5   :  { %s4553_s15 = scalar_lea.hbm %s5447_s30, 32 }
  0xc6   :  { %p4554_p2 = scmp.ne.s32.totalorder %s5447_s30, %s4553_s15  ;;  %p4557_p3 = scmp.lt.u32.totalorder %s4553_s15, %s5447_s30 }
  0xc8   :  { %p4559_p4 = pnand %p4557_p3, %p4554_p2 }
  0xca   :  { %4562 = shalt.err (!%p4559_p4)
}
  0xcb   :  { %s4563_s13 = scalar_lea.vmem %s91_s26, 32  ;;  %p4568_p6 = scmp.lt.s32.totalorder %s91_s26, %s91_s26 }
  0xcc   :  { %p4564_p5 = scmp.ne.s32.totalorder %s91_s26, %s4563_s13  ;;  %p4569_p7 = scmp.lt.s32.totalorder %s4563_s13, %s4563_s13 }
  0xce   :  { %p4570_p8 = por %p4569_p7, %p4568_p6 }
  0xd0   :  { %p4571_p9 = pnand %p4570_p8, %p4564_p5 }
  0xd2   :  { %4574 = shalt.err (!%p4571_p9)
}
  0xd3   :  { %93 = dma.hbm_to_vmem [thread:$0]  %s5447_s30, 32, %s91_s26, [#allocation10]  }
  0xd4   :  { %s4809_s21 = smov [#allocation14]   ;;  %s4575_s29 = scalar_lea.hbm %s5410_s8, 1024 }
  0xd5   :  { %s111_s27 = sshll.u32 %s4809_s21, 4  ;;  %p4576_p10 = scmp.ne.s32.totalorder %s5410_s8, %s4575_s29  ;;  %s112_s27 = int_to_ptr.vmem [resolvable:$true] %s111_s27 }
  0xd6   :  { %p4579_p11 = scmp.lt.u32.totalorder %s4575_s29, %s5410_s8 }
  0xd8   :  { %p4581_p12 = pnand %p4579_p11, %p4576_p10 }
  0xda   :  { %4584 = shalt.err (!%p4581_p12)
}
  0xdb   :  { %s4585_s28 = scalar_lea.vmem %s112_s27, 1024  ;;  %p4590_p0 = scmp.lt.s32.totalorder %s112_s27, %s112_s27 }
  0xdc   :  { %p4586_p13 = scmp.ne.s32.totalorder %s112_s27, %s4585_s28  ;;  %p4591_p1 = scmp.lt.s32.totalorder %s4585_s28, %s4585_s28 }
  0xde   :  { %p4592_p2 = por %p4591_p1, %p4590_p0 }
  0xe0   :  { %p4593_p3 = pnand %p4592_p2, %p4586_p13 }
  0xe2   :  { %4596 = shalt.err (!%p4593_p3)
}
  0xe3   :  { %s4810_s26 = smov 128   ;;  %s4811_s30 = smov 8  }
  0xe4   :  { %117 = dma.hbm_to_vmem [thread:$0]  %s5410_s8, 1024, %s112_s27, [#allocation13], %s4810_s26, %s4810_s26, %s4811_s30  }
  0xe5   :  { %s4812_s5 = smov [#allocation17]   ;;  %s4813_s1 = smov [#allocation20]  }
  0xe6   :  { %s133_s2 = sshll.u32 %s4812_s5, 4  ;;  %s155_s13 = sshll.u32 %s4813_s1, 4  ;;  %s134_s2 = int_to_ptr.vmem [resolvable:$true] %s133_s2  ;;  %s156_s13 = int_to_ptr.vmem [resolvable:$true] %s155_s13 }
  0xe7   :  { %s4597_s21 = scalar_lea.hbm %s5412_s10, 512 }
  0xe8   :  { %p4598_p4 = scmp.ne.s32.totalorder %s5412_s10, %s4597_s21  ;;  %p4601_p5 = scmp.lt.u32.totalorder %s4597_s21, %s5412_s10 }
  0xea   :  { %p4603_p6 = pnand %p4601_p5, %p4598_p4 }
  0xec   :  { %4606 = shalt.err (!%p4603_p6)
}
  0xed   :  { %s4607_s8 = scalar_lea.vmem %s134_s2, 512  ;;  %p4612_p8 = scmp.lt.s32.totalorder %s134_s2, %s134_s2 }
  0xee   :  { %p4608_p7 = scmp.ne.s32.totalorder %s134_s2, %s4607_s8  ;;  %p4613_p9 = scmp.lt.s32.totalorder %s4607_s8, %s4607_s8 }
  0xf0   :  { %p4614_p10 = por %p4613_p9, %p4612_p8 }
  0xf2   :  { %p4615_p11 = pnand %p4614_p10, %p4608_p7 }
  0xf4   :  { %4618 = shalt.err (!%p4615_p11)
}
  0xf5   :  { %139 = dma.hbm_to_vmem [thread:$0]  %s5412_s10, 512, %s134_s2, [#allocation16], %s4810_s26, %s4810_s26, %s4811_s30  }
  0xf6   :  { %s4619_s28 = scalar_lea.hbm %s5414_s12, 2048 }
  0xf7   :  { %p4620_p12 = scmp.ne.s32.totalorder %s5414_s12, %s4619_s28  ;;  %p4623_p13 = scmp.lt.u32.totalorder %s4619_s28, %s5414_s12 }
  0xf9   :  { %p4625_p0 = pnand %p4623_p13, %p4620_p12 }
  0xfb   :  { %4628 = shalt.err (!%p4625_p0)
}
  0xfc   :  { %s4629_s7 = scalar_lea.vmem %s156_s13, 2048  ;;  %p4634_p2 = scmp.lt.s32.totalorder %s156_s13, %s156_s13 }
  0xfd   :  { %p4630_p1 = scmp.ne.s32.totalorder %s156_s13, %s4629_s7  ;;  %p4635_p3 = scmp.lt.s32.totalorder %s4629_s7, %s4629_s7 }
  0xff   :  { %p4636_p4 = por %p4635_p3, %p4634_p2 }
 0x101   :  { %p4637_p5 = pnand %p4636_p4, %p4630_p1 }
 0x103   :  { %4640 = shalt.err (!%p4637_p5)
}
 0x104   :  { %161 = dma.hbm_to_vmem [thread:$0]  %s5414_s12, 2048, %s156_s13, [#allocation19], %s4799_s25, %s4799_s25, %s4800_s3  }
 0x105   :  { %s4814_s30 = smov [#allocation23]   ;;  %s4815_s24 = smov [#allocation26]  }
 0x106   :  { %s177_s2 = sshll.u32 %s4814_s30, 4  ;;  %s199_s21 = sshll.u32 %s4815_s24, 4  ;;  %s178_s2 = int_to_ptr.vmem [resolvable:$true] %s177_s2  ;;  %s200_s21 = int_to_ptr.vmem [resolvable:$true] %s199_s21 }
 0x107   :  { %s4641_s29 = scalar_lea.hbm %s5416_s14, 16384 }
 0x108   :  { %p4642_p6 = scmp.ne.s32.totalorder %s5416_s14, %s4641_s29  ;;  %p4645_p7 = scmp.lt.u32.totalorder %s4641_s29, %s5416_s14 }
 0x10a   :  { %p4647_p8 = pnand %p4645_p7, %p4642_p6 }
 0x10c   :  { %4650 = shalt.err (!%p4647_p8)
}
 0x10d   :  { %s4651_s12 = scalar_lea.vmem %s178_s2, 16384  ;;  %p4656_p10 = scmp.lt.s32.totalorder %s178_s2, %s178_s2 }
 0x10e   :  { %p4652_p9 = scmp.ne.s32.totalorder %s178_s2, %s4651_s12  ;;  %p4657_p11 = scmp.lt.s32.totalorder %s4651_s12, %s4651_s12 }
 0x110   :  { %p4658_p12 = por %p4657_p11, %p4656_p10 }
 0x112   :  { %p4659_p13 = pnand %p4658_p12, %p4652_p9 }
 0x114   :  { %4662 = shalt.err (!%p4659_p13)
}
 0x115   :  { %s5448_s25 = smov 32   ;;  %s5449_s3 = smov 512  }
 0x116   :  { %183 = dma.hbm_to_vmem [thread:$0]  %s5416_s14, 16384, %s178_s2, [#allocation22], %s5449_s3, %s5449_s3, %s5448_s25  }
 0x117   :  { %s4663_s15 = scalar_lea.hbm %s5418_s16, 49152 }
 0x118   :  { %p4664_p0 = scmp.ne.s32.totalorder %s5418_s16, %s4663_s15  ;;  %p4667_p1 = scmp.lt.u32.totalorder %s4663_s15, %s5418_s16 }
 0x11a   :  { %p4669_p2 = pnand %p4667_p1, %p4664_p0 }
 0x11c   :  { %4672 = shalt.err (!%p4669_p2)
}
 0x11d   :  { %s4673_s10 = scalar_lea.vmem %s200_s21, 49152  ;;  %p4678_p4 = scmp.lt.s32.totalorder %s200_s21, %s200_s21 }
 0x11e   :  { %p4674_p3 = scmp.ne.s32.totalorder %s200_s21, %s4673_s10  ;;  %p4679_p5 = scmp.lt.s32.totalorder %s4673_s10, %s4673_s10 }
 0x120   :  { %p4680_p6 = por %p4679_p5, %p4678_p4 }
 0x122   :  { %p4681_p7 = pnand %p4680_p6, %p4674_p3 }
 0x124   :  { %4684 = shalt.err (!%p4681_p7)
}
 0x125   :  { %s4816_s14 = smov 768   ;;  %s4817_s26 = smov 48  }
 0x126   :  { %205 = dma.hbm_to_vmem [thread:$0]  %s5418_s16, 49152, %s200_s21, [#allocation25], %s4816_s14, %s4816_s14, %s4817_s26  }
 0x127   :  { %s4818_s24 = smov [#allocation27]   ;;  %s4685_s9 = scalar_lea.hbm %s5419_s17, 96 }
 0x128   :  { %s212_s0 = sshll.u32 %s4818_s24, 4  ;;  %p4686_p8 = scmp.ne.s32.totalorder %s5419_s17, %s4685_s9  ;;  %s213_s0 = int_to_ptr.vmem [resolvable:$true] %s212_s0 }
 0x129   :  { %p4689_p9 = scmp.lt.u32.totalorder %s4685_s9, %s5419_s17 }
 0x12b   :  { %p4691_p10 = pnand %p4689_p9, %p4686_p8 }
 0x12d   :  { %4694 = shalt.err (!%p4691_p10)
}
 0x12e   :  { %s4695_s3 = scalar_lea.vmem %s213_s0, 96  ;;  %p4700_p12 = scmp.lt.s32.totalorder %s213_s0, %s213_s0 }
 0x12f   :  { %p4696_p11 = scmp.ne.s32.totalorder %s213_s0, %s4695_s3  ;;  %p4701_p13 = scmp.lt.s32.totalorder %s4695_s3, %s4695_s3 }
 0x131   :  { %p4702_p0 = por %p4701_p13, %p4700_p12 }
 0x133   :  { %p4703_p1 = pnand %p4702_p0, %p4696_p11 }
 0x135   :  { %4706 = shalt.err (!%p4703_p1)
}
 0x136   :  { %215 = dma.hbm_to_vmem [thread:$0]  %s5419_s17, 96, %s213_s0, [#allocation28]  }
 0x137   :  { %4773 = dma.done.wait [#allocation4], 32  }
 0x138   :  { %4774 = vsyncadd [#allocation4], 4294967264 }
 0x139   :  { %4775 = dma.done.wait [#allocation7], 49216  }
 0x13a   :  { %4776 = vsyncadd [#allocation7], 4294918080 }
 0x13b   :  { %4777 = dma.done.wait [#allocation10], 16416  }
 0x13c   :  { %4778 = vsyncadd [#allocation10], 4294950880 }
 0x13d   :  { %4779 = dma.done.wait [#allocation13], 1040  }
 0x13e   :  { %4780 = vsyncadd [#allocation13], 4294966256 }
 0x13f   :  { %4781 = dma.done.wait [#allocation16], 528  }
 0x140   :  { %4782 = vsyncadd [#allocation16], 4294966768 }
 0x141   :  { %4783 = dma.done.wait [#allocation19], 2064  }
 0x142   :  { %4784 = vsyncadd [#allocation19], 4294965232 }
 0x143   :  { %4785 = dma.done.wait [#allocation22], 16416  }
 0x144   :  { %4786 = vsyncadd [#allocation22], 4294950880 }
 0x145   :  { %4787 = dma.done.wait [#allocation25], 49216  }
 0x146   :  { %4788 = vsyncadd [#allocation25], 4294918080 }
 0x147   :  { %4789 = dma.done.wait [#allocation28], 96  }
 0x148   :  { %4790 = vsyncadd [#allocation28], 4294967200  ;;  %v267_v0 = vld [vmem:[#allocation6 + $0x8] sm:$0xff]  ;;  %v269_v2 = vld [vmem:[#allocation6 + $0x18] sm:$0xff]  ;;  %s5450_s23 = sld [smem:[#allocation44_spill]]  ;;  %vm4821_vm0 = vmmov 0  }
 0x149   :  { %v271_v1 = vld [vmem:[#allocation6 + $0x28] sm:$0xff]  ;;  %v273_v4 = vld [vmem:[#allocation6 + $0x38] sm:$0xff]  ;;  %v266_v5 = vld [vmem:[#allocation6] sm:$0xff]  ;;  %vm1544_vm1 = vcmask 523264   ;;  %vm1618_vm2 = vcmask 517120   ;;  %vm1635_vm3 = vcmask 254976  }
 0x14a   :  { %v3178_v3 = vpack.c.bf16 %v271_v1, %v267_v0  ;;  %v270_v6 = vld [vmem:[#allocation6 + $0x20] sm:$0xff]  ;;  %v3370_v7 = vpack.c.bf16 %v273_v4, %v269_v2  ;;  %v268_v9 = vld [vmem:[#allocation6 + $0x10] sm:$0xff]  ;;  %v275_v11 = vld [vmem:[#allocation6 + $0x48] sm:$0xff]  ;;  %vm1655_vm4 = vcmask 261120   ;;  %s4825_s0 = smov [#allocation29]  }
 0x14b   :  { %v3180_v8 = vpack.c.bf16 %v270_v6, %v266_v5  ;;  %v272_v10 = vld [vmem:[#allocation6 + $0x30] sm:$0xff]  ;;  %v279_v13 = vld [vmem:[#allocation6 + $0x68] sm:$0xff]  ;;  %v277_v14 = vld [vmem:[#allocation6 + $0x58] sm:$0xff]  ;;  %s3045_s11 = sshll.u32 %s4825_s0, 4  ;;  %s3046_s11 = int_to_ptr.vmem [resolvable:$true] %s3045_s11 }
 0x14c   :  { %3179 = vmatprep.subr.bf16.mxu0 %v3178_v3  ;;  %v3372_v12 = vpack.c.bf16 %v272_v10, %v268_v9  ;;  %v281_v15 = vld [vmem:[#allocation6 + $0x78] sm:$0xff]  ;;  %3371 = vmatprep.subr.bf16.mxu1 %v3370_v7  ;;  %v3182_v16 = vpack.c.bf16 %v279_v13, %v275_v11  ;;  %v274_v18 = vld [vmem:[#allocation6 + $0x40] sm:$0xff]  ;;  %v276_v20 = vld [vmem:[#allocation6 + $0x50] sm:$0xff] }
 0x14d   :  { %3181 = vmatpush1.bf16.msra.mxu0 %v3180_v8  ;;  %v3374_v17 = vpack.c.bf16 %v281_v15, %v277_v14  ;;  %v278_v19 = vld [vmem:[#allocation6 + $0x60] sm:$0xff]  ;;  %v280_v22 = vld [vmem:[#allocation6 + $0x70] sm:$0xff]  ;;  %v283_v23 = vld [vmem:[#allocation6 + $0x88] sm:$0xff] }
 0x14e   :  { %3373 = vmatpush1.bf16.msra.mxu1 %v3372_v12  ;;  %v3184_v21 = vpack.c.bf16 %v278_v19, %v274_v18  ;;  %v287_v24 = vld [vmem:[#allocation6 + $0xa8] sm:$0xff]  ;;  %3183 = vmatprep.subr.bf16.mxu0 %v3182_v16  ;;  %v3376_v25 = vpack.c.bf16 %v280_v22, %v276_v20  ;;  %v285_v27 = vld [vmem:[#allocation6 + $0x98] sm:$0xff]  ;;  %v282_v29 = vld [vmem:[#allocation6 + $0x80] sm:$0xff] }
 0x14f   :  { %3375 = vmatprep.subr.bf16.mxu1 %v3374_v17  ;;  %v3186_v26 = vpack.c.bf16 %v287_v24, %v283_v23  ;;  %v289_v28 = vld [vmem:[#allocation6 + $0xb8] sm:$0xff]  ;;  %v286_v31 = vld [vmem:[#allocation6 + $0xa0] sm:$0xff]  ;;  %v284_v32 = vld [vmem:[#allocation6 + $0x90] sm:$0xff] }
 0x150   :  { %v3378_v30 = vpack.c.bf16 %v289_v28, %v285_v27  ;;  %v288_v33 = vld [vmem:[#allocation6 + $0xb0] sm:$0xff]  ;;  %v3188_v34 = vpack.c.bf16 %v286_v31, %v282_v29  ;;  %v291_v35 = vld [vmem:[#allocation6 + $0xc8] sm:$0xff]  ;;  %v293_v37 = vld [vmem:[#allocation6 + $0xd8] sm:$0xff] }
 0x151   :  { %3185 = vmatpush1.bf16.msra.mxu0 %v3184_v21  ;;  %v295_v36 = vld [vmem:[#allocation6 + $0xe8] sm:$0xff]  ;;  %v3380_v38 = vpack.c.bf16 %v288_v33, %v284_v32  ;;  %v297_v40 = vld [vmem:[#allocation6 + $0xf8] sm:$0xff]  ;;  %v290_v41 = vld [vmem:[#allocation6 + $0xc0] sm:$0xff] }
 0x152   :  { %3377 = vmatpush1.bf16.msra.mxu1 %v3376_v25  ;;  %3187 = vmatprep.subr.bf16.mxu0 %v3186_v26  ;;  %v3190_v39 = vpack.c.bf16 %v295_v36, %v291_v35  ;;  %v294_v42 = vld [vmem:[#allocation6 + $0xe0] sm:$0xff]  ;;  %v3382_v43 = vpack.c.bf16 %v297_v40, %v293_v37  ;;  %v292_v44 = vld [vmem:[#allocation6 + $0xd0] sm:$0xff]  ;;  %v299_v46 = vld [vmem:[#allocation6 + $0x108] sm:$0xff] }
 0x153   :  { %3379 = vmatprep.subr.bf16.mxu1 %v3378_v30  ;;  %v296_v45 = vld [vmem:[#allocation6 + $0xf0] sm:$0xff]  ;;  %v303_v47 = vld [vmem:[#allocation6 + $0x128] sm:$0xff]  ;;  %v301_v48 = vld [vmem:[#allocation6 + $0x118] sm:$0xff]  ;;  %v3192_v50 = vpack.c.bf16 %v294_v42, %v290_v41 }
 0x154   :  { %v305_v49 = vld [vmem:[#allocation6 + $0x138] sm:$0xff]  ;;  %v3384_v51 = vpack.c.bf16 %v296_v45, %v292_v44  ;;  %v3194_v52 = vpack.c.bf16 %v303_v47, %v299_v46  ;;  %v298_v53 = vld [vmem:[#allocation6 + $0x100] sm:$0xff]  ;;  %v300_v55 = vld [vmem:[#allocation6 + $0x110] sm:$0xff]  ;;  %v652_v46 = vlaneseq  ;;  %v4819_v47 = vmov 1983009808  }
 0x155   :  { %3189 = vmatpush1.bf16.msra.mxu0 %v3188_v34  ;;  %v302_v54 = vld [vmem:[#allocation6 + $0x120] sm:$0xff]  ;;  %v3386_v56 = vpack.c.bf16 %v305_v49, %v301_v48  ;;  %v304_v57 = vld [vmem:[#allocation6 + $0x130] sm:$0xff]  ;;  %v307_v58 = vld [vmem:[#allocation6 + $0x148] sm:$0xff]  ;;  %v676_v48 = vunpack.c.l.s4 %v4819_v47 }
 0x156   :  { %3381 = vmatpush1.bf16.msra.mxu1 %v3380_v38  ;;  %3191 = vmatprep.subr.bf16.mxu0 %v3190_v39  ;;  %v311_v59 = vld [vmem:[#allocation6 + $0x168] sm:$0xff]  ;;  %v309_v60 = vld [vmem:[#allocation6 + $0x158] sm:$0xff]  ;;  %v3196_v62 = vpack.c.bf16 %v302_v54, %v298_v53  ;;  %v3388_v63 = vpack.c.bf16 %v304_v57, %v300_v55  ;;  %v306_v1 = vld [vmem:[#allocation6 + $0x140] sm:$0xff] }
 0x157   :  { %3383 = vmatprep.subr.bf16.mxu1 %v3382_v43  ;;  %v313_v61 = vld [vmem:[#allocation6 + $0x178] sm:$0xff]  ;;  %v3198_v0 = vpack.c.bf16 %v311_v59, %v307_v58  ;;  %v310_v2 = vld [vmem:[#allocation6 + $0x160] sm:$0xff]  ;;  %v308_v3 = vld [vmem:[#allocation6 + $0x150] sm:$0xff] }
 0x158   :  { %v3390_v4 = vpack.c.bf16 %v313_v61, %v309_v60  ;;  %v312_v5 = vld [vmem:[#allocation6 + $0x170] sm:$0xff]  ;;  %v315_v6 = vld [vmem:[#allocation6 + $0x188] sm:$0xff]  ;;  %v317_v8 = vld [vmem:[#allocation6 + $0x198] sm:$0xff]  ;;  %v3200_v10 = vpack.c.bf16 %v310_v2, %v306_v1  ;;  %v5141_v61 = vshrl.u32 %v652_v46, 7 }
 0x159   :  { %3193 = vmatpush1.bf16.msra.mxu0 %v3192_v50  ;;  %v319_v7 = vld [vmem:[#allocation6 + $0x1a8] sm:$0xff]  ;;  %v321_v9 = vld [vmem:[#allocation6 + $0x1b8] sm:$0xff]  ;;  %v3392_v11 = vpack.c.bf16 %v312_v5, %v308_v3  ;;  %v314_v13 = vld [vmem:[#allocation6 + $0x180] sm:$0xff] }
 0x15a   :  { %3385 = vmatpush1.bf16.msra.mxu1 %v3384_v51  ;;  %3195 = vmatprep.subr.bf16.mxu0 %v3194_v52  ;;  %v3202_v12 = vpack.c.bf16 %v319_v7, %v315_v6  ;;  %v318_v14 = vld [vmem:[#allocation6 + $0x1a0] sm:$0xff]  ;;  %v316_v15 = vld [vmem:[#allocation6 + $0x190] sm:$0xff]  ;;  %v3394_v16 = vpack.c.bf16 %v321_v9, %v317_v8  ;;  %v323_v18 = vld [vmem:[#allocation6 + $0x1c8] sm:$0xff] }
 0x15b   :  { %3387 = vmatprep.subr.bf16.mxu1 %v3386_v56  ;;  %v320_v17 = vld [vmem:[#allocation6 + $0x1b0] sm:$0xff]  ;;  %v327_v19 = vld [vmem:[#allocation6 + $0x1e8] sm:$0xff]  ;;  %v325_v20 = vld [vmem:[#allocation6 + $0x1d8] sm:$0xff]  ;;  %v3204_v22 = vpack.c.bf16 %v318_v14, %v314_v13 }
 0x15c   :  { %v329_v21 = vld [vmem:[#allocation6 + $0x1f8] sm:$0xff]  ;;  %v3396_v23 = vpack.c.bf16 %v320_v17, %v316_v15  ;;  %v3206_v24 = vpack.c.bf16 %v327_v19, %v323_v18  ;;  %v322_v25 = vld [vmem:[#allocation6 + $0x1c0] sm:$0xff]  ;;  %v324_v27 = vld [vmem:[#allocation6 + $0x1d0] sm:$0xff] }
 0x15d   :  { %3197 = vmatpush1.bf16.msra.mxu0 %v3196_v62  ;;  %v326_v26 = vld [vmem:[#allocation6 + $0x1e0] sm:$0xff]  ;;  %v3398_v28 = vpack.c.bf16 %v329_v21, %v325_v20  ;;  %v328_v29 = vld [vmem:[#allocation6 + $0x1f0] sm:$0xff]  ;;  %v331_v30 = vld [vmem:[#allocation6 + $0x208] sm:$0xff]  ;;  %v677_v62 = vunpack.c.0.s8 %v676_v48 }
 0x15e   :  { %3389 = vmatpush1.bf16.msra.mxu1 %v3388_v63  ;;  %3199 = vmatprep.subr.bf16.mxu0 %v3198_v0  ;;  %v335_v31 = vld [vmem:[#allocation6 + $0x228] sm:$0xff]  ;;  %v333_v32 = vld [vmem:[#allocation6 + $0x218] sm:$0xff]  ;;  %v3208_v34 = vpack.c.bf16 %v326_v26, %v322_v25  ;;  %v3400_v35 = vpack.c.bf16 %v328_v29, %v324_v27  ;;  %v330_v37 = vld [vmem:[#allocation6 + $0x200] sm:$0xff] }
 0x15f   :  { %3391 = vmatprep.subr.bf16.mxu1 %v3390_v4  ;;  %v337_v33 = vld [vmem:[#allocation6 + $0x238] sm:$0xff]  ;;  %v3210_v36 = vpack.c.bf16 %v335_v31, %v331_v30  ;;  %v334_v38 = vld [vmem:[#allocation6 + $0x220] sm:$0xff]  ;;  %v332_v39 = vld [vmem:[#allocation6 + $0x210] sm:$0xff] }
 0x160   :  { %v3402_v40 = vpack.c.bf16 %v337_v33, %v333_v32  ;;  %v336_v41 = vld [vmem:[#allocation6 + $0x230] sm:$0xff]  ;;  %v339_v42 = vld [vmem:[#allocation6 + $0x248] sm:$0xff]  ;;  %v341_v44 = vld [vmem:[#allocation6 + $0x258] sm:$0xff]  ;;  %v3212_v49 = vpack.c.bf16 %v334_v38, %v330_v37 }
 0x161   :  { %3201 = vmatpush1.bf16.msra.mxu0 %v3200_v10  ;;  %v343_v43 = vld [vmem:[#allocation6 + $0x268] sm:$0xff]  ;;  %v345_v45 = vld [vmem:[#allocation6 + $0x278] sm:$0xff]  ;;  %v3404_v50 = vpack.c.bf16 %v336_v41, %v332_v39  ;;  %v338_v52 = vld [vmem:[#allocation6 + $0x240] sm:$0xff] }
 0x162   :  { %3393 = vmatpush1.bf16.msra.mxu1 %v3392_v11  ;;  %3203 = vmatprep.subr.bf16.mxu0 %v3202_v12  ;;  %v3214_v51 = vpack.c.bf16 %v343_v43, %v339_v42  ;;  %v342_v53 = vld [vmem:[#allocation6 + $0x260] sm:$0xff]  ;;  %v340_v54 = vld [vmem:[#allocation6 + $0x250] sm:$0xff]  ;;  %v3406_v55 = vpack.c.bf16 %v345_v45, %v341_v44  ;;  %v347_v57 = vld [vmem:[#allocation6 + $0x288] sm:$0xff]  ;;  %v5144_v11 = vsub.s32 %v677_v62, %v5141_v61 }
 0x163   :  { %3395 = vmatprep.subr.bf16.mxu1 %v3394_v16  ;;  %v344_v56 = vld [vmem:[#allocation6 + $0x270] sm:$0xff]  ;;  %v351_v58 = vld [vmem:[#allocation6 + $0x2a8] sm:$0xff]  ;;  %v349_v59 = vld [vmem:[#allocation6 + $0x298] sm:$0xff]  ;;  %v3216_v63 = vpack.c.bf16 %v342_v53, %v338_v52 }
 0x164   :  { %v353_v60 = vld [vmem:[#allocation6 + $0x2b8] sm:$0xff]  ;;  %v3408_v0 = vpack.c.bf16 %v344_v56, %v340_v54  ;;  %v3218_v1 = vpack.c.bf16 %v351_v58, %v347_v57  ;;  %v346_v2 = vld [vmem:[#allocation6 + $0x280] sm:$0xff]  ;;  %v348_v4 = vld [vmem:[#allocation6 + $0x290] sm:$0xff] }
 0x165   :  { %3205 = vmatpush1.bf16.msra.mxu0 %v3204_v22  ;;  %v350_v3 = vld [vmem:[#allocation6 + $0x2a0] sm:$0xff]  ;;  %v3410_v5 = vpack.c.bf16 %v353_v60, %v349_v59  ;;  %v352_v6 = vld [vmem:[#allocation6 + $0x2b0] sm:$0xff]  ;;  %v355_v7 = vld [vmem:[#allocation6 + $0x2c8] sm:$0xff] }
 0x166   :  { %3397 = vmatpush1.bf16.msra.mxu1 %v3396_v23  ;;  %3207 = vmatprep.subr.bf16.mxu0 %v3206_v24  ;;  %v359_v8 = vld [vmem:[#allocation6 + $0x2e8] sm:$0xff]  ;;  %v357_v9 = vld [vmem:[#allocation6 + $0x2d8] sm:$0xff]  ;;  %v3220_v12 = vpack.c.bf16 %v350_v3, %v346_v2  ;;  %v354_v13 = vld [vmem:[#allocation6 + $0x2c0] sm:$0xff]  ;;  %v3412_v14 = vpack.c.bf16 %v352_v6, %v348_v4 }
 0x167   :  { %3399 = vmatprep.subr.bf16.mxu1 %v3398_v28  ;;  %v361_v10 = vld [vmem:[#allocation6 + $0x2f8] sm:$0xff]  ;;  %v3222_v15 = vpack.c.bf16 %v359_v8, %v355_v7  ;;  %v358_v16 = vld [vmem:[#allocation6 + $0x2e0] sm:$0xff]  ;;  %v356_v17 = vld [vmem:[#allocation6 + $0x2d0] sm:$0xff] }
 0x168   :  { %v360_v18 = vld [vmem:[#allocation6 + $0x2f0] sm:$0xff]  ;;  %v3414_v19 = vpack.c.bf16 %v361_v10, %v357_v9  ;;  %v363_v20 = vld [vmem:[#allocation6 + $0x308] sm:$0xff]  ;;  %v5149_v22 = vld [vmem:[%s5450_s23] sm:$0xff]  ;;  %v3224_v26 = vpack.c.bf16 %v358_v16, %v354_v13 }
 0x169   :  { %3209 = vmatpush1.bf16.msra.mxu0 %v3208_v34  ;;  %v367_v21 = vld [vmem:[#allocation6 + $0x328] sm:$0xff]  ;;  %v365_v23 = vld [vmem:[#allocation6 + $0x318] sm:$0xff]  ;;  %v5153_v25 = vrot.slane %v5149_v22, %v5144_v11  ;;  %v3416_v27 = vpack.c.bf16 %v360_v18, %v356_v17  ;;  %v362_v29 = vld [vmem:[#allocation6 + $0x300] sm:$0xff]  ;;  %v674_v8 = vcombine.high %v5149_v22, %v5149_v22 }
 0x16a   :  { %3401 = vmatpush1.bf16.msra.mxu1 %v3400_v35  ;;  %3211 = vmatprep.subr.bf16.mxu0 %v3210_v36  ;;  %v369_v24 = vld [vmem:[#allocation6 + $0x338] sm:$0xff]  ;;  %v3226_v28 = vpack.c.bf16 %v367_v21, %v363_v20  ;;  %v366_v30 = vld [vmem:[#allocation6 + $0x320] sm:$0xff]  ;;  %v364_v31 = vld [vmem:[#allocation6 + $0x310] sm:$0xff] }
 0x16b   :  { %3403 = vmatprep.subr.bf16.mxu1 %v3402_v40  ;;  %v689_v32 = vcombine.high %v5153_v25, %v5153_v25  ;;  %v3418_v33 = vpack.c.bf16 %v369_v24, %v365_v23  ;;  %v368_v34 = vld [vmem:[#allocation6 + $0x330] sm:$0xff]  ;;  %v371_v35 = vld [vmem:[#allocation6 + $0x348] sm:$0xff]  ;;  %v373_v37 = vld [vmem:[#allocation6 + $0x358] sm:$0xff]  ;;  %v3228_v39 = vpack.c.bf16 %v366_v30, %v362_v29  ;;  %v5160_v22 = vrot.slane %v674_v8, %v5144_v11 }
 0x16c   :  { %v375_v36 = vld [vmem:[#allocation6 + $0x368] sm:$0xff]  ;;  %v377_v38 = vld [vmem:[#allocation6 + $0x378] sm:$0xff]  ;;  %v3420_v40 = vpack.c.bf16 %v368_v34, %v364_v31  ;;  %v370_v42 = vld [vmem:[#allocation6 + $0x340] sm:$0xff] }
 0x16d   :  { %3213 = vmatpush1.bf16.msra.mxu0 %v3212_v49  ;;  %769 = vmatprep.mubr.f32.mxu0 %v689_v32  ;;  %v3230_v41 = vpack.c.bf16 %v375_v36, %v371_v35  ;;  %v374_v43 = vld [vmem:[#allocation6 + $0x360] sm:$0xff]  ;;  %v372_v44 = vld [vmem:[#allocation6 + $0x350] sm:$0xff]  ;;  %v3422_v45 = vpack.c.bf16 %v377_v38, %v373_v37  ;;  %v379_v47 = vld [vmem:[#allocation6 + $0x388] sm:$0xff]  ;;  %v690_v38 = vcombine.high %v5160_v22, %v5160_v22 }
 0x16e   :  { %3405 = vmatpush1.bf16.msra.mxu1 %v3404_v50  ;;  %3215 = vmatprep.subr.bf16.mxu0 %v3214_v51  ;;  %v376_v46 = vld [vmem:[#allocation6 + $0x370] sm:$0xff]  ;;  %v383_v48 = vld [vmem:[#allocation6 + $0x3a8] sm:$0xff]  ;;  %v381_v49 = vld [vmem:[#allocation6 + $0x398] sm:$0xff]  ;;  %v3232_v51 = vpack.c.bf16 %v374_v43, %v370_v42 }
 0x16f   :  { %3407 = vmatprep.subr.bf16.mxu1 %v3406_v55  ;;  %982 = vmatprep.mubr.f32.mxu1 %v689_v32  ;;  %v385_v50 = vld [vmem:[#allocation6 + $0x3b8] sm:$0xff]  ;;  %v3424_v52 = vpack.c.bf16 %v376_v46, %v372_v44  ;;  %v3234_v53 = vpack.c.bf16 %v383_v48, %v379_v47  ;;  %v378_v54 = vld [vmem:[#allocation6 + $0x380] sm:$0xff]  ;;  %v380_v56 = vld [vmem:[#allocation6 + $0x390] sm:$0xff] }
 0x170   :  { %v382_v55 = vld [vmem:[#allocation6 + $0x3a0] sm:$0xff]  ;;  %v3426_v57 = vpack.c.bf16 %v385_v50, %v381_v49  ;;  %v384_v58 = vld [vmem:[#allocation6 + $0x3b0] sm:$0xff]  ;;  %v387_v59 = vld [vmem:[#allocation6 + $0x3c8] sm:$0xff] }
 0x171   :  { %3217 = vmatpush1.bf16.msra.mxu0 %v3216_v63  ;;  %v391_v60 = vld [vmem:[#allocation6 + $0x3e8] sm:$0xff]  ;;  %v389_v62 = vld [vmem:[#allocation6 + $0x3d8] sm:$0xff]  ;;  %v386_v3 = vld [vmem:[#allocation6 + $0x3c0] sm:$0xff] }
 0x172   :  { %3409 = vmatpush1.bf16.msra.mxu1 %v3408_v0  ;;  %3219 = vmatprep.subr.bf16.mxu0 %v3218_v1  ;;  %v393_v63 = vld [vmem:[#allocation6 + $0x3f8] sm:$0xff]  ;;  %v3236_v0 = vpack.c.bf16 %v382_v55, %v378_v54  ;;  %v3428_v1 = vpack.c.bf16 %v384_v58, %v380_v56  ;;  %v3238_v2 = vpack.c.bf16 %v391_v60, %v387_v59  ;;  %v390_v4 = vld [vmem:[#allocation6 + $0x3e0] sm:$0xff]  ;;  %v392_v7 = vld [vmem:[#allocation6 + $0x3f0] sm:$0xff] }
 0x173   :  { %3411 = vmatprep.subr.bf16.mxu1 %v3410_v5  ;;  %v388_v5 = vld [vmem:[#allocation6 + $0x3d0] sm:$0xff]  ;;  %v3430_v6 = vpack.c.bf16 %v393_v63, %v389_v62  ;;  %v395_v9 = vld [vmem:[#allocation6 + $0x408] sm:$0xff]  ;;  %v401_v13 = vld [vmem:[#allocation6 + $0x438] sm:$0xff] }
 0x174   :  { %v399_v10 = vld [vmem:[#allocation6 + $0x428] sm:$0xff]  ;;  %v394_v17 = vld [vmem:[#allocation6 + $0x400] sm:$0xff]  ;;  %v400_v21 = vld [vmem:[#allocation6 + $0x430] sm:$0xff] }
 0x175   :  { %3221 = vmatpush1.bf16.msra.mxu0 %v3220_v12  ;;  %v397_v12 = vld [vmem:[#allocation6 + $0x418] sm:$0xff]  ;;  %v3242_v16 = vpack.c.bf16 %v399_v10, %v395_v9  ;;  %v398_v18 = vld [vmem:[#allocation6 + $0x420] sm:$0xff]  ;;  %v403_v23 = vld [vmem:[#allocation6 + $0x448] sm:$0xff] }
 0x176   :  { %3413 = vmatpush1.bf16.msra.mxu1 %v3412_v14  ;;  %3223 = vmatprep.subr.bf16.mxu0 %v3222_v15  ;;  %v3240_v14 = vpack.c.bf16 %v390_v4, %v386_v3  ;;  %v3432_v15 = vpack.c.bf16 %v392_v7, %v388_v5  ;;  %v3434_v20 = vpack.c.bf16 %v401_v13, %v397_v12  ;;  %v407_v24 = vld [vmem:[#allocation6 + $0x468] sm:$0xff]  ;;  %v402_v31 = vld [vmem:[#allocation6 + $0x440] sm:$0xff]  ;;  %v408_v35 = vld [vmem:[#allocation6 + $0x470] sm:$0xff] }
 0x177   :  { %3415 = vmatprep.subr.bf16.mxu1 %v3414_v19  ;;  %v396_v19 = vld [vmem:[#allocation6 + $0x410] sm:$0xff]  ;;  %v3246_v30 = vpack.c.bf16 %v407_v24, %v403_v23  ;;  %v406_v32 = vld [vmem:[#allocation6 + $0x460] sm:$0xff]  ;;  %v411_v36 = vld [vmem:[#allocation6 + $0x488] sm:$0xff] }
 0x178   :  { %v3436_v29 = vpack.c.bf16 %v400_v21, %v396_v19  ;;  %v415_v37 = vld [vmem:[#allocation6 + $0x4a8] sm:$0xff]  ;;  %v410_v44 = vld [vmem:[#allocation6 + $0x480] sm:$0xff]  ;;  %v412_v46 = vld [vmem:[#allocation6 + $0x490] sm:$0xff] }
 0x179   :  { %3225 = vmatpush1.bf16.msra.mxu0 %v3224_v26  ;;  %v405_v26 = vld [vmem:[#allocation6 + $0x458] sm:$0xff]  ;;  %v3250_v43 = vpack.c.bf16 %v415_v37, %v411_v36  ;;  %v416_v48 = vld [vmem:[#allocation6 + $0x4b0] sm:$0xff]  ;;  %v419_v49 = vld [vmem:[#allocation6 + $0x4c8] sm:$0xff] }
 0x17a   :  { %3417 = vmatpush1.bf16.msra.mxu1 %v3416_v27  ;;  %3227 = vmatprep.subr.bf16.mxu0 %v3226_v28  ;;  %v409_v27 = vld [vmem:[#allocation6 + $0x478] sm:$0xff]  ;;  %v3244_v28 = vpack.c.bf16 %v398_v18, %v394_v17  ;;  %v423_v50 = vld [vmem:[#allocation6 + $0x4e8] sm:$0xff]  ;;  %v418_v55 = vld [vmem:[#allocation6 + $0x4c0] sm:$0xff] }
 0x17b   :  { %3419 = vmatprep.subr.bf16.mxu1 %v3418_v33  ;;  %v404_v33 = vld [vmem:[#allocation6 + $0x450] sm:$0xff]  ;;  %v3438_v34 = vpack.c.bf16 %v409_v27, %v405_v26  ;;  %v3254_v54 = vpack.c.bf16 %v423_v50, %v419_v49  ;;  %v422_v56 = vld [vmem:[#allocation6 + $0x4e0] sm:$0xff]  ;;  %v427_v60 = vld [vmem:[#allocation6 + $0x508] sm:$0xff] }
 0x17c   :  { %v3440_v42 = vpack.c.bf16 %v408_v35, %v404_v33  ;;  %v424_v59 = vld [vmem:[#allocation6 + $0x4f0] sm:$0xff]  ;;  %v431_v62 = vld [vmem:[#allocation6 + $0x528] sm:$0xff]  ;;  %v429_v63 = vld [vmem:[#allocation6 + $0x518] sm:$0xff] }
 0x17d   :  { %3229 = vmatpush1.bf16.msra.mxu0 %v3228_v39  ;;  %v413_v39 = vld [vmem:[#allocation6 + $0x498] sm:$0xff]  ;;  %v3258_v3 = vpack.c.bf16 %v431_v62, %v427_v60  ;;  %v426_v4 = vld [vmem:[#allocation6 + $0x500] sm:$0xff]  ;;  %v432_v8 = vld [vmem:[#allocation6 + $0x530] sm:$0xff] }
 0x17e   :  { %3421 = vmatpush1.bf16.msra.mxu1 %v3420_v40  ;;  %3231 = vmatprep.subr.bf16.mxu0 %v3230_v41  ;;  %v417_v40 = vld [vmem:[#allocation6 + $0x4b8] sm:$0xff]  ;;  %v3248_v41 = vpack.c.bf16 %v406_v32, %v402_v31  ;;  %v430_v5 = vld [vmem:[#allocation6 + $0x520] sm:$0xff]  ;;  %v435_v9 = vld [vmem:[#allocation6 + $0x548] sm:$0xff] }
 0x17f   :  { %3423 = vmatprep.subr.bf16.mxu1 %v3422_v45  ;;  %v414_v45 = vld [vmem:[#allocation6 + $0x4a0] sm:$0xff]  ;;  %v3442_v47 = vpack.c.bf16 %v417_v40, %v413_v39  ;;  %v439_v10 = vld [vmem:[#allocation6 + $0x568] sm:$0xff]  ;;  %v437_v12 = vld [vmem:[#allocation6 + $0x558] sm:$0xff] }
 0x180   :  { %v441_v13 = vld [vmem:[#allocation6 + $0x578] sm:$0xff]  ;;  %v434_v17 = vld [vmem:[#allocation6 + $0x540] sm:$0xff]  ;;  %v436_v19 = vld [vmem:[#allocation6 + $0x550] sm:$0xff] }
 0x181   :  { %3233 = vmatpush1.bf16.msra.mxu0 %v3232_v51  ;;  %v421_v51 = vld [vmem:[#allocation6 + $0x4d8] sm:$0xff]  ;;  %v438_v18 = vld [vmem:[#allocation6 + $0x560] sm:$0xff]  ;;  %v440_v21 = vld [vmem:[#allocation6 + $0x570] sm:$0xff] }
 0x182   :  { %3425 = vmatpush1.bf16.msra.mxu1 %v3424_v52  ;;  %3235 = vmatprep.subr.bf16.mxu0 %v3234_v53  ;;  %v425_v52 = vld [vmem:[#allocation6 + $0x4f8] sm:$0xff]  ;;  %v3252_v53 = vpack.c.bf16 %v414_v45, %v410_v44  ;;  %v443_v23 = vld [vmem:[#allocation6 + $0x588] sm:$0xff]  ;;  %v442_v31 = vld [vmem:[#allocation6 + $0x580] sm:$0xff] }
 0x183   :  { %3427 = vmatprep.subr.bf16.mxu1 %v3426_v57  ;;  %v420_v57 = vld [vmem:[#allocation6 + $0x4d0] sm:$0xff]  ;;  %v3446_v58 = vpack.c.bf16 %v425_v52, %v421_v51  ;;  %v447_v24 = vld [vmem:[#allocation6 + $0x5a8] sm:$0xff]  ;;  %v445_v26 = vld [vmem:[#allocation6 + $0x598] sm:$0xff] }
 0x184   :  { %v449_v27 = vld [vmem:[#allocation6 + $0x5b8] sm:$0xff]  ;;  %v446_v32 = vld [vmem:[#allocation6 + $0x5a0] sm:$0xff]  ;;  %v444_v33 = vld [vmem:[#allocation6 + $0x590] sm:$0xff] }
 0x185   :  { %3237 = vmatpush1.bf16.msra.mxu0 %v3236_v0  ;;  %v433_v0 = vld [vmem:[#allocation6 + $0x538] sm:$0xff]  ;;  %v448_v35 = vld [vmem:[#allocation6 + $0x5b0] sm:$0xff]  ;;  %v451_v36 = vld [vmem:[#allocation6 + $0x5c8] sm:$0xff]  ;;  %v3268_v40 = vpack.c.bf16 %v446_v32, %v442_v31 }
 0x186   :  { %3429 = vmatpush1.bf16.msra.mxu1 %v3428_v1  ;;  %3239 = vmatprep.subr.bf16.mxu0 %v3238_v2  ;;  %v3256_v1 = vpack.c.bf16 %v422_v56, %v418_v55  ;;  %v3448_v2 = vpack.c.bf16 %v424_v59, %v420_v57  ;;  %v3450_v7 = vpack.c.bf16 %v433_v0, %v429_v63  ;;  %v455_v37 = vld [vmem:[#allocation6 + $0x5e8] sm:$0xff]  ;;  %v457_v39 = vld [vmem:[#allocation6 + $0x5f8] sm:$0xff]  ;;  %v454_v44 = vld [vmem:[#allocation6 + $0x5e0] sm:$0xff] }
 0x187   :  { %3431 = vmatprep.subr.bf16.mxu1 %v3430_v6  ;;  %v428_v6 = vld [vmem:[#allocation6 + $0x510] sm:$0xff]  ;;  %v463_v49 = vld [vmem:[#allocation6 + $0x628] sm:$0xff]  ;;  %v461_v50 = vld [vmem:[#allocation6 + $0x618] sm:$0xff] }
 0x188   :  { %v452_v45 = vld [vmem:[#allocation6 + $0x5d0] sm:$0xff]  ;;  %v465_v51 = vld [vmem:[#allocation6 + $0x638] sm:$0xff]  ;;  %v462_v55 = vld [vmem:[#allocation6 + $0x620] sm:$0xff] }
 0x189   :  { %3241 = vmatpush1.bf16.msra.mxu0 %v3240_v14  ;;  %v3260_v14 = vpack.c.bf16 %v430_v5, %v426_v4  ;;  %v460_v56 = vld [vmem:[#allocation6 + $0x610] sm:$0xff]  ;;  %v3466_v57 = vpack.c.bf16 %v465_v51, %v461_v50  ;;  %v467_v59 = vld [vmem:[#allocation6 + $0x648] sm:$0xff]  ;;  %v469_v62 = vld [vmem:[#allocation6 + $0x658] sm:$0xff] }
 0x18a   :  { %3433 = vmatpush1.bf16.msra.mxu1 %v3432_v15  ;;  %3243 = vmatprep.subr.bf16.mxu0 %v3242_v16  ;;  %v3452_v15 = vpack.c.bf16 %v432_v8, %v428_v6  ;;  %v3262_v16 = vpack.c.bf16 %v439_v10, %v435_v9  ;;  %v471_v60 = vld [vmem:[#allocation6 + $0x668] sm:$0xff]  ;;  %v473_v63 = vld [vmem:[#allocation6 + $0x678] sm:$0xff]  ;;  %v470_v4 = vld [vmem:[#allocation6 + $0x660] sm:$0xff] }
 0x18b   :  { %3435 = vmatprep.subr.bf16.mxu1 %v3434_v20  ;;  %v3454_v20 = vpack.c.bf16 %v441_v13, %v437_v12  ;;  %v468_v5 = vld [vmem:[#allocation6 + $0x650] sm:$0xff]  ;;  %v3470_v6 = vpack.c.bf16 %v473_v63, %v469_v62  ;;  %v475_v8 = vld [vmem:[#allocation6 + $0x688] sm:$0xff]  ;;  %v477_v10 = vld [vmem:[#allocation6 + $0x698] sm:$0xff] }
 0x18c   :  { %770 = vmatmul.mubr.f32.vlgmr.msra.gmra.mrb[0].mxu0 %v5153_v25  ;;  %v479_v9 = vld [vmem:[#allocation6 + $0x6a8] sm:$0xff]  ;;  %v481_v12 = vld [vmem:[#allocation6 + $0x6b8] sm:$0xff]  ;;  %v486_v31 = vld [vmem:[#allocation6 + $0x6e0] sm:$0xff] }
 0x18d   :  { %3245 = vmatpush1.bf16.msra.mxu0 %v3244_v28  ;;  %983 = vmatmul.mubr.f32.vlgmr.msra.gmra.mrb[0].mxu1 %v5153_v25  ;;  %v3444_v25 = vpack.c.bf16 %v416_v48, %v412_v46  ;;  %v3264_v28 = vpack.c.bf16 %v438_v18, %v434_v17  ;;  %v459_v48 = vld [vmem:[#allocation6 + $0x608] sm:$0xff]  ;;  %v478_v17 = vld [vmem:[#allocation6 + $0x6a0] sm:$0xff]  ;;  %v476_v18 = vld [vmem:[#allocation6 + $0x690] sm:$0xff] }
 0x18e   :  { %3437 = vmatpush1.bf16.msra.mxu1 %v3436_v29  ;;  %3247 = vmatprep.subr.bf16.mxu0 %v3246_v30  ;;  %v3456_v29 = vpack.c.bf16 %v440_v21, %v436_v19  ;;  %v3266_v30 = vpack.c.bf16 %v447_v24, %v443_v23  ;;  %v3474_v19 = vpack.c.bf16 %v481_v12, %v477_v10  ;;  %v483_v21 = vld [vmem:[#allocation6 + $0x6c8] sm:$0xff]  ;;  %v485_v24 = vld [vmem:[#allocation6 + $0x6d8] sm:$0xff]  ;;  %v484_v32 = vld [vmem:[#allocation6 + $0x6d0] sm:$0xff] }
 0x18f   :  { %3439 = vmatprep.subr.bf16.mxu1 %v3438_v34  ;;  %840 = vmatprep.mubr.f32.mxu0 %v690_v38  ;;  %v3458_v34 = vpack.c.bf16 %v449_v27, %v445_v26  ;;  %v487_v23 = vld [vmem:[#allocation6 + $0x6e8] sm:$0xff]  ;;  %v489_v26 = vld [vmem:[#allocation6 + $0x6f8] sm:$0xff] }
 0x190   :  { %1053 = vmatprep.mubr.f32.mxu1 %v690_v38  ;;  %v453_v38 = vld [vmem:[#allocation6 + $0x5d8] sm:$0xff] }
 0x191   :  { %3249 = vmatpush1.bf16.msra.mxu0 %v3248_v41  ;;  %v3460_v41 = vpack.c.bf16 %v448_v35, %v444_v33  ;;  %v3462_v46 = vpack.c.bf16 %v457_v39, %v453_v38  ;;  %v3478_v33 = vpack.c.bf16 %v489_v26, %v485_v24  ;;  %v491_v35 = vld [vmem:[#allocation6 + $0x708] sm:$0xff]  ;;  %v497_v38 = vld [vmem:[#allocation6 + $0x738] sm:$0xff] }
 0x192   :  { %3441 = vmatpush1.bf16.msra.mxu1 %v3440_v42  ;;  %3251 = vmatprep.subr.bf16.mxu0 %v3250_v43  ;;  %v3270_v42 = vpack.c.bf16 %v455_v37, %v451_v36  ;;  %v450_v43 = vld [vmem:[#allocation6 + $0x5c0] sm:$0xff]  ;;  %v495_v36 = vld [vmem:[#allocation6 + $0x728] sm:$0xff]  ;;  %v493_v37 = vld [vmem:[#allocation6 + $0x718] sm:$0xff] }
 0x193   :  { %3443 = vmatprep.subr.bf16.mxu1 %v3442_v47  ;;  %v456_v47 = vld [vmem:[#allocation6 + $0x5f0] sm:$0xff]  ;;  %v3272_v52 = vpack.c.bf16 %v454_v44, %v450_v43  ;;  %v494_v43 = vld [vmem:[#allocation6 + $0x720] sm:$0xff]  ;;  %v505_v50 = vld [vmem:[#allocation6 + $0x778] sm:$0xff] }
 0x194   :  { %v492_v44 = vld [vmem:[#allocation6 + $0x710] sm:$0xff]  ;;  %v513_v62 = vld [vmem:[#allocation6 + $0x7b8] sm:$0xff] }
 0x195   :  { %3253 = vmatpush1.bf16.msra.mxu0 %v3252_v53  ;;  %v3464_v53 = vpack.c.bf16 %v456_v47, %v452_v45  ;;  %v3482_v45 = vpack.c.bf16 %v497_v38, %v493_v37  ;;  %v499_v47 = vld [vmem:[#allocation6 + $0x748] sm:$0xff]  ;;  %v521_v10 = vld [vmem:[#allocation6 + $0x7f8] sm:$0xff] }
 0x196   :  { %3445 = vmatpush1.bf16.msra.mxu1 %v3444_v25  ;;  %3255 = vmatprep.subr.bf16.mxu0 %v3254_v54  ;;  %v3274_v25 = vpack.c.bf16 %v463_v49, %v459_v48  ;;  %v458_v54 = vld [vmem:[#allocation6 + $0x600] sm:$0xff]  ;;  %v503_v48 = vld [vmem:[#allocation6 + $0x768] sm:$0xff]  ;;  %v501_v49 = vld [vmem:[#allocation6 + $0x758] sm:$0xff] }
 0x197   :  { %3447 = vmatprep.subr.bf16.mxu1 %v3446_v58  ;;  %v464_v58 = vld [vmem:[#allocation6 + $0x630] sm:$0xff]  ;;  %v3276_v0 = vpack.c.bf16 %v462_v55, %v458_v54  ;;  %v502_v54 = vld [vmem:[#allocation6 + $0x760] sm:$0xff]  ;;  %v529_v24 = vld [vmem:[#allocation6 + $0x838] sm:$0xff] }
 0x198   :  { %v500_v55 = vld [vmem:[#allocation6 + $0x750] sm:$0xff]  ;;  %v537_v37 = vld [vmem:[#allocation6 + $0x878] sm:$0xff] }
 0x199   :  { %3257 = vmatpush1.bf16.msra.mxu0 %v3256_v1  ;;  %v3468_v1 = vpack.c.bf16 %v464_v58, %v460_v56  ;;  %v3486_v56 = vpack.c.bf16 %v505_v50, %v501_v49  ;;  %v507_v58 = vld [vmem:[#allocation6 + $0x788] sm:$0xff]  ;;  %v541_v50 = vld [vmem:[#allocation6 + $0x898] sm:$0xff] }
 0x19a   :  { %3449 = vmatpush1.bf16.msra.mxu1 %v3448_v2  ;;  %3259 = vmatprep.subr.bf16.mxu0 %v3258_v3  ;;  %v3278_v2 = vpack.c.bf16 %v471_v60, %v467_v59  ;;  %v466_v3 = vld [vmem:[#allocation6 + $0x640] sm:$0xff]  ;;  %v511_v59 = vld [vmem:[#allocation6 + $0x7a8] sm:$0xff]  ;;  %v509_v60 = vld [vmem:[#allocation6 + $0x798] sm:$0xff] }
 0x19b   :  { %3451 = vmatprep.subr.bf16.mxu1 %v3450_v7  ;;  %v472_v7 = vld [vmem:[#allocation6 + $0x670] sm:$0xff]  ;;  %v3280_v13 = vpack.c.bf16 %v470_v4, %v466_v3  ;;  %v510_v3 = vld [vmem:[#allocation6 + $0x7a0] sm:$0xff] }
 0x19c   :  { %v508_v4 = vld [vmem:[#allocation6 + $0x790] sm:$0xff] }
 0x19d   :  { %3261 = vmatpush1.bf16.msra.mxu0 %v3260_v14  ;;  %v3472_v14 = vpack.c.bf16 %v472_v7, %v468_v5  ;;  %v3490_v5 = vpack.c.bf16 %v513_v62, %v509_v60  ;;  %v515_v7 = vld [vmem:[#allocation6 + $0x7c8] sm:$0xff]  ;;  %v549_v62 = vld [vmem:[#allocation6 + $0x8d8] sm:$0xff] }
 0x19e   :  { %3453 = vmatpush1.bf16.msra.mxu1 %v3452_v15  ;;  %3263 = vmatprep.subr.bf16.mxu0 %v3262_v16  ;;  %v3282_v15 = vpack.c.bf16 %v479_v9, %v475_v8  ;;  %v474_v16 = vld [vmem:[#allocation6 + $0x680] sm:$0xff]  ;;  %v519_v8 = vld [vmem:[#allocation6 + $0x7e8] sm:$0xff]  ;;  %v517_v9 = vld [vmem:[#allocation6 + $0x7d8] sm:$0xff] }
 0x19f   :  { %3455 = vmatprep.subr.bf16.mxu1 %v3454_v20  ;;  %v480_v20 = vld [vmem:[#allocation6 + $0x6b0] sm:$0xff]  ;;  %v3284_v27 = vpack.c.bf16 %v478_v17, %v474_v16  ;;  %v518_v16 = vld [vmem:[#allocation6 + $0x7e0] sm:$0xff]  ;;  %v551_v60 = vld [vmem:[#allocation6 + $0x8e8] sm:$0xff] }
 0x1a0   :  { %v516_v17 = vld [vmem:[#allocation6 + $0x7d0] sm:$0xff] }
 0x1a1   :  { %3265 = vmatpush1.bf16.msra.mxu0 %v3264_v28  ;;  %v3476_v28 = vpack.c.bf16 %v480_v20, %v476_v18  ;;  %v3494_v18 = vpack.c.bf16 %v521_v10, %v517_v9  ;;  %v523_v20 = vld [vmem:[#allocation6 + $0x808] sm:$0xff]  ;;  %v557_v9 = vld [vmem:[#allocation6 + $0x918] sm:$0xff] }
 0x1a2   :  { %3457 = vmatpush1.bf16.msra.mxu1 %v3456_v29  ;;  %3267 = vmatprep.subr.bf16.mxu0 %v3266_v30  ;;  %v3286_v29 = vpack.c.bf16 %v487_v23, %v483_v21  ;;  %v482_v30 = vld [vmem:[#allocation6 + $0x6c0] sm:$0xff]  ;;  %v527_v21 = vld [vmem:[#allocation6 + $0x828] sm:$0xff]  ;;  %v525_v23 = vld [vmem:[#allocation6 + $0x818] sm:$0xff] }
 0x1a3   :  { %3459 = vmatprep.subr.bf16.mxu1 %v3458_v34  ;;  %v488_v34 = vld [vmem:[#allocation6 + $0x6f0] sm:$0xff]  ;;  %v3288_v39 = vpack.c.bf16 %v486_v31, %v482_v30  ;;  %v526_v30 = vld [vmem:[#allocation6 + $0x820] sm:$0xff]  ;;  %v561_v10 = vld [vmem:[#allocation6 + $0x938] sm:$0xff] }
 0x1a4   :  { %v524_v31 = vld [vmem:[#allocation6 + $0x810] sm:$0xff] }
 0x1a5   :  { %3269 = vmatpush1.bf16.msra.mxu0 %v3268_v40  ;;  %v3480_v40 = vpack.c.bf16 %v488_v34, %v484_v32  ;;  %v3498_v32 = vpack.c.bf16 %v529_v24, %v525_v23  ;;  %v531_v34 = vld [vmem:[#allocation6 + $0x848] sm:$0xff]  ;;  %v565_v23 = vld [vmem:[#allocation6 + $0x958] sm:$0xff] }
 0x1a6   :  { %3461 = vmatpush1.bf16.msra.mxu1 %v3460_v41  ;;  %3271 = vmatprep.subr.bf16.mxu0 %v3270_v42  ;;  %v3290_v41 = vpack.c.bf16 %v495_v36, %v491_v35  ;;  %v490_v42 = vld [vmem:[#allocation6 + $0x700] sm:$0xff]  ;;  %v535_v35 = vld [vmem:[#allocation6 + $0x868] sm:$0xff]  ;;  %v533_v36 = vld [vmem:[#allocation6 + $0x858] sm:$0xff] }
 0x1a7   :  { %3463 = vmatprep.subr.bf16.mxu1 %v3462_v46  ;;  %v496_v46 = vld [vmem:[#allocation6 + $0x730] sm:$0xff]  ;;  %v3292_v51 = vpack.c.bf16 %v494_v43, %v490_v42  ;;  %v530_v42 = vld [vmem:[#allocation6 + $0x840] sm:$0xff]  ;;  %v569_v24 = vld [vmem:[#allocation6 + $0x978] sm:$0xff] }
 0x1a8   :  { %v534_v43 = vld [vmem:[#allocation6 + $0x860] sm:$0xff] }
 0x1a9   :  { %3273 = vmatpush1.bf16.msra.mxu0 %v3272_v52  ;;  %v3484_v52 = vpack.c.bf16 %v496_v46, %v492_v44  ;;  %v532_v44 = vld [vmem:[#allocation6 + $0x850] sm:$0xff] }
 0x1aa   :  { %3465 = vmatpush1.bf16.msra.mxu1 %v3464_v53  ;;  %3275 = vmatprep.subr.bf16.mxu0 %v3274_v25  ;;  %v3294_v53 = vpack.c.bf16 %v503_v48, %v499_v47  ;;  %v498_v25 = vld [vmem:[#allocation6 + $0x740] sm:$0xff]  ;;  %v536_v46 = vld [vmem:[#allocation6 + $0x870] sm:$0xff]  ;;  %v539_v47 = vld [vmem:[#allocation6 + $0x888] sm:$0xff] }
 0x1ab   :  { %3467 = vmatprep.subr.bf16.mxu1 %v3466_v57  ;;  %v504_v57 = vld [vmem:[#allocation6 + $0x770] sm:$0xff]  ;;  %v3296_v63 = vpack.c.bf16 %v502_v54, %v498_v25  ;;  %v543_v48 = vld [vmem:[#allocation6 + $0x8a8] sm:$0xff]  ;;  %v538_v54 = vld [vmem:[#allocation6 + $0x880] sm:$0xff] }
 0x1ac   :  { %v3314_v25 = vpack.c.bf16 %v543_v48, %v539_v47  ;;  %v579_v47 = vld [vmem:[#allocation6 + $0x9c8] sm:$0xff] }
 0x1ad   :  { %3277 = vmatpush1.bf16.msra.mxu0 %v3276_v0  ;;  %v3488_v0 = vpack.c.bf16 %v504_v57, %v500_v55  ;;  %v542_v55 = vld [vmem:[#allocation6 + $0x8a0] sm:$0xff]  ;;  %v583_v48 = vld [vmem:[#allocation6 + $0x9e8] sm:$0xff] }
 0x1ae   :  { %3469 = vmatpush1.bf16.msra.mxu1 %v3468_v1  ;;  %3279 = vmatprep.subr.bf16.mxu0 %v3278_v2  ;;  %v3298_v1 = vpack.c.bf16 %v511_v59, %v507_v58  ;;  %v506_v2 = vld [vmem:[#allocation6 + $0x780] sm:$0xff]  ;;  %v544_v58 = vld [vmem:[#allocation6 + $0x8b0] sm:$0xff]  ;;  %v547_v59 = vld [vmem:[#allocation6 + $0x8c8] sm:$0xff] }
 0x1af   :  { %3471 = vmatprep.subr.bf16.mxu1 %v3470_v6  ;;  %v512_v6 = vld [vmem:[#allocation6 + $0x7b0] sm:$0xff]  ;;  %v3300_v12 = vpack.c.bf16 %v510_v3, %v506_v2  ;;  %v546_v2 = vld [vmem:[#allocation6 + $0x8c0] sm:$0xff] }
 0x1b0   :  { %v550_v3 = vld [vmem:[#allocation6 + $0x8e0] sm:$0xff] }
 0x1b1   :  { %3281 = vmatpush1.bf16.msra.mxu0 %v3280_v13  ;;  %v3492_v13 = vpack.c.bf16 %v512_v6, %v508_v4  ;;  %v548_v4 = vld [vmem:[#allocation6 + $0x8d0] sm:$0xff] }
 0x1b2   :  { %3473 = vmatpush1.bf16.msra.mxu1 %v3472_v14  ;;  %3283 = vmatprep.subr.bf16.mxu0 %v3282_v15  ;;  %v3302_v14 = vpack.c.bf16 %v519_v8, %v515_v7  ;;  %v514_v15 = vld [vmem:[#allocation6 + $0x7c0] sm:$0xff]  ;;  %v552_v6 = vld [vmem:[#allocation6 + $0x8f0] sm:$0xff]  ;;  %v555_v7 = vld [vmem:[#allocation6 + $0x908] sm:$0xff] }
 0x1b3   :  { %3475 = vmatprep.subr.bf16.mxu1 %v3474_v19  ;;  %v520_v19 = vld [vmem:[#allocation6 + $0x7f0] sm:$0xff]  ;;  %v3304_v26 = vpack.c.bf16 %v518_v16, %v514_v15  ;;  %v559_v8 = vld [vmem:[#allocation6 + $0x928] sm:$0xff]  ;;  %v554_v15 = vld [vmem:[#allocation6 + $0x900] sm:$0xff] }
 0x1b4   :  { %v558_v16 = vld [vmem:[#allocation6 + $0x920] sm:$0xff] }
 0x1b5   :  { %3285 = vmatpush1.bf16.msra.mxu0 %v3284_v27  ;;  %v3496_v27 = vpack.c.bf16 %v520_v19, %v516_v17  ;;  %v556_v17 = vld [vmem:[#allocation6 + $0x910] sm:$0xff] }
 0x1b6   :  { %3477 = vmatpush1.bf16.msra.mxu1 %v3476_v28  ;;  %3287 = vmatprep.subr.bf16.mxu0 %v3286_v29  ;;  %v3306_v28 = vpack.c.bf16 %v527_v21, %v523_v20  ;;  %v522_v29 = vld [vmem:[#allocation6 + $0x800] sm:$0xff]  ;;  %v560_v19 = vld [vmem:[#allocation6 + $0x930] sm:$0xff]  ;;  %v563_v20 = vld [vmem:[#allocation6 + $0x948] sm:$0xff] }
 0x1b7   :  { %3479 = vmatprep.subr.bf16.mxu1 %v3478_v33  ;;  %v528_v33 = vld [vmem:[#allocation6 + $0x830] sm:$0xff]  ;;  %v3308_v38 = vpack.c.bf16 %v526_v30, %v522_v29  ;;  %v567_v21 = vld [vmem:[#allocation6 + $0x968] sm:$0xff]  ;;  %v562_v29 = vld [vmem:[#allocation6 + $0x940] sm:$0xff] }
 0x1b8   :  { %v566_v30 = vld [vmem:[#allocation6 + $0x960] sm:$0xff] }
 0x1b9   :  { %3289 = vmatpush1.bf16.msra.mxu0 %v3288_v39  ;;  %v5169_v39 = vld.sshfl [vmem:[%s5450_s23 + $0x8] sm:$0x33 pattern:$0x76325410] }
 0x1ba   :  { %3481 = vmatpush1.bf16.msra.mxu1 %v3480_v40  ;;  %3291 = vmatprep.subr.bf16.mxu0 %v3290_v41  ;;  %v3500_v40 = vpack.c.bf16 %v528_v33, %v524_v31  ;;  %v3310_v41 = vpack.c.bf16 %v535_v35, %v531_v34  ;;  %v698_v49 = vcombine.high %v5169_v39, %v5169_v39  ;;  %v564_v31 = vld [vmem:[#allocation6 + $0x950] sm:$0xff]  ;;  %v571_v34 = vld [vmem:[#allocation6 + $0x988] sm:$0xff] }
 0x1bb   :  { %3483 = vmatprep.subr.bf16.mxu1 %v3482_v45  ;;  %v3502_v45 = vpack.c.bf16 %v537_v37, %v533_v36  ;;  %v568_v33 = vld [vmem:[#allocation6 + $0x970] sm:$0xff]  ;;  %v575_v35 = vld [vmem:[#allocation6 + $0x9a8] sm:$0xff]  ;;  %v573_v36 = vld [vmem:[#allocation6 + $0x998] sm:$0xff] }
 0x1bc   :  { %v577_v37 = vld [vmem:[#allocation6 + $0x9b8] sm:$0xff] }
 0x1bd   :  { %3293 = vmatpush1.bf16.msra.mxu0 %v3292_v51  ;;  %v545_v51 = vld [vmem:[#allocation6 + $0x8b8] sm:$0xff] }
 0x1be   :  { %3485 = vmatpush1.bf16.msra.mxu1 %v3484_v52  ;;  %3295 = vmatprep.subr.bf16.mxu0 %v3294_v53  ;;  %v3312_v52 = vpack.c.bf16 %v534_v43, %v530_v42  ;;  %v3504_v53 = vpack.c.bf16 %v536_v46, %v532_v44  ;;  %v3506_v57 = vpack.c.bf16 %v545_v51, %v541_v50  ;;  %v570_v42 = vld [vmem:[#allocation6 + $0x980] sm:$0xff]  ;;  %v572_v44 = vld [vmem:[#allocation6 + $0x990] sm:$0xff]  ;;  %v585_v50 = vld [vmem:[#allocation6 + $0x9f8] sm:$0xff] }
 0x1bf   :  { %3487 = vmatprep.subr.bf16.mxu1 %v3486_v56  ;;  %v540_v56 = vld [vmem:[#allocation6 + $0x890] sm:$0xff]  ;;  %v574_v43 = vld [vmem:[#allocation6 + $0x9a0] sm:$0xff] }
 0x1c0   :  { %v576_v46 = vld [vmem:[#allocation6 + $0x9b0] sm:$0xff]  ;;  %v3332_v51 = vpack.c.bf16 %v574_v43, %v570_v42  ;;  %v614_v42 = vld [vmem:[#allocation6 + $0xae0] sm:$0xff] }
 0x1c1   :  { %3297 = vmatpush1.bf16.msra.mxu0 %v3296_v63  ;;  %v553_v63 = vld [vmem:[#allocation6 + $0x8f8] sm:$0xff]  ;;  %v612_v43 = vld [vmem:[#allocation6 + $0xad0] sm:$0xff] }
 0x1c2   :  { %3489 = vmatpush1.bf16.msra.mxu1 %v3488_v0  ;;  %3299 = vmatprep.subr.bf16.mxu0 %v3298_v1  ;;  %v3316_v0 = vpack.c.bf16 %v542_v55, %v538_v54  ;;  %v3318_v1 = vpack.c.bf16 %v551_v60, %v547_v59  ;;  %v582_v54 = vld [vmem:[#allocation6 + $0x9e0] sm:$0xff]  ;;  %v580_v55 = vld [vmem:[#allocation6 + $0x9d0] sm:$0xff]  ;;  %v591_v59 = vld [vmem:[#allocation6 + $0xa28] sm:$0xff] }
 0x1c3   :  { %3491 = vmatprep.subr.bf16.mxu1 %v3490_v5  ;;  %v3510_v5 = vpack.c.bf16 %v553_v63, %v549_v62  ;;  %v589_v60 = vld [vmem:[#allocation6 + $0xa18] sm:$0xff] }
 0x1c4   :  { %v593_v62 = vld [vmem:[#allocation6 + $0xa38] sm:$0xff] }
 0x1c5   :  { %3301 = vmatpush1.bf16.msra.mxu0 %v3300_v12  ;;  %v3320_v12 = vpack.c.bf16 %v550_v3, %v546_v2  ;;  %v590_v2 = vld [vmem:[#allocation6 + $0xa20] sm:$0xff]  ;;  %v588_v3 = vld [vmem:[#allocation6 + $0xa10] sm:$0xff] }
 0x1c6   :  { %3493 = vmatpush1.bf16.msra.mxu1 %v3492_v13  ;;  %3303 = vmatprep.subr.bf16.mxu0 %v3302_v14  ;;  %v3512_v13 = vpack.c.bf16 %v552_v6, %v548_v4  ;;  %v3322_v14 = vpack.c.bf16 %v559_v8, %v555_v7  ;;  %v3530_v4 = vpack.c.bf16 %v593_v62, %v589_v60  ;;  %v595_v6 = vld [vmem:[#allocation6 + $0xa48] sm:$0xff]  ;;  %v597_v8 = vld [vmem:[#allocation6 + $0xa58] sm:$0xff] }
 0x1c7   :  { %3495 = vmatprep.subr.bf16.mxu1 %v3494_v18  ;;  %v3514_v18 = vpack.c.bf16 %v561_v10, %v557_v9  ;;  %v599_v7 = vld [vmem:[#allocation6 + $0xa68] sm:$0xff]  ;;  %v601_v9 = vld [vmem:[#allocation6 + $0xa78] sm:$0xff] }
 0x1c8   :  { %v633_v60 = vld [vmem:[#allocation6 + $0xb78] sm:$0xff] }
 0x1c9   :  { %3305 = vmatpush1.bf16.msra.mxu0 %v3304_v26  ;;  %v3324_v26 = vpack.c.bf16 %v558_v16, %v554_v15  ;;  %v598_v15 = vld [vmem:[#allocation6 + $0xa60] sm:$0xff]  ;;  %v596_v16 = vld [vmem:[#allocation6 + $0xa50] sm:$0xff] }
 0x1ca   :  { %3497 = vmatpush1.bf16.msra.mxu1 %v3496_v27  ;;  %3307 = vmatprep.subr.bf16.mxu0 %v3306_v28  ;;  %v3516_v27 = vpack.c.bf16 %v560_v19, %v556_v17  ;;  %v3326_v28 = vpack.c.bf16 %v567_v21, %v563_v20  ;;  %v3534_v17 = vpack.c.bf16 %v601_v9, %v597_v8  ;;  %v603_v19 = vld [vmem:[#allocation6 + $0xa88] sm:$0xff]  ;;  %v605_v21 = vld [vmem:[#allocation6 + $0xa98] sm:$0xff] }
 0x1cb   :  { %3499 = vmatprep.subr.bf16.mxu1 %v3498_v32  ;;  %v3518_v32 = vpack.c.bf16 %v569_v24, %v565_v23  ;;  %v607_v20 = vld [vmem:[#allocation6 + $0xaa8] sm:$0xff]  ;;  %v609_v23 = vld [vmem:[#allocation6 + $0xab8] sm:$0xff] }
 0x1cc   :  { %841 = vmatmul.mubr.f32.vlgmr.msra.gmra.mrb[0].mxu0 %v5160_v22  ;;  %v641_v8 = vld [vmem:[#allocation6 + $0xbb8] sm:$0xff] }
 0x1cd   :  { %3309 = vmatpush1.bf16.msra.mxu0 %v3308_v38  ;;  %1054 = vmatmul.mubr.f32.vlgmr.msra.gmra.mrb[0].mxu1 %v5160_v22  ;;  %v3508_v22 = vpack.c.bf16 %v544_v58, %v540_v56  ;;  %v3328_v38 = vpack.c.bf16 %v566_v30, %v562_v29  ;;  %v587_v58 = vld [vmem:[#allocation6 + $0xa08] sm:$0xff]  ;;  %v606_v29 = vld [vmem:[#allocation6 + $0xaa0] sm:$0xff]  ;;  %v604_v30 = vld [vmem:[#allocation6 + $0xa90] sm:$0xff] }
 0x1ce   :  { %3501 = vmatpush1.bf16.msra.mxu1 %v3500_v40  ;;  %3311 = vmatprep.subr.bf16.mxu0 %v3310_v41  ;;  %v3520_v40 = vpack.c.bf16 %v568_v33, %v564_v31  ;;  %v3330_v41 = vpack.c.bf16 %v575_v35, %v571_v34  ;;  %v3538_v31 = vpack.c.bf16 %v609_v23, %v605_v21  ;;  %v611_v33 = vld [vmem:[#allocation6 + $0xac8] sm:$0xff]  ;;  %v613_v35 = vld [vmem:[#allocation6 + $0xad8] sm:$0xff] }
 0x1cf   :  { %3503 = vmatprep.subr.bf16.mxu1 %v3502_v45  ;;  %911 = vmatprep.mubr.f32.mxu0 %v698_v49  ;;  %v3522_v45 = vpack.c.bf16 %v577_v37, %v573_v36  ;;  %v615_v34 = vld [vmem:[#allocation6 + $0xae8] sm:$0xff]  ;;  %v617_v36 = vld [vmem:[#allocation6 + $0xaf8] sm:$0xff] }
 0x1d0   :  { %1124 = vmatprep.mubr.f32.mxu1 %v698_v49  ;;  %v581_v49 = vld [vmem:[#allocation6 + $0x9d8] sm:$0xff] }
 0x1d1   :  { %3313 = vmatpush1.bf16.msra.mxu0 %v3312_v52  ;;  %v3524_v52 = vpack.c.bf16 %v576_v46, %v572_v44  ;;  %v3526_v56 = vpack.c.bf16 %v585_v50, %v581_v49  ;;  %v3542_v44 = vpack.c.bf16 %v617_v36, %v613_v35  ;;  %v619_v46 = vld [vmem:[#allocation6 + $0xb08] sm:$0xff]  ;;  %v625_v49 = vld [vmem:[#allocation6 + $0xb38] sm:$0xff] }
 0x1d2   :  { %3505 = vmatpush1.bf16.msra.mxu1 %v3504_v53  ;;  %3315 = vmatprep.subr.bf16.mxu0 %v3314_v25  ;;  %v3334_v53 = vpack.c.bf16 %v583_v48, %v579_v47  ;;  %v578_v25 = vld [vmem:[#allocation6 + $0x9c0] sm:$0xff]  ;;  %v623_v47 = vld [vmem:[#allocation6 + $0xb28] sm:$0xff]  ;;  %v621_v48 = vld [vmem:[#allocation6 + $0xb18] sm:$0xff] }
 0x1d3   :  { %3507 = vmatprep.subr.bf16.mxu1 %v3506_v57  ;;  %v584_v57 = vld [vmem:[#allocation6 + $0x9f0] sm:$0xff]  ;;  %v3336_v63 = vpack.c.bf16 %v582_v54, %v578_v25  ;;  %v622_v25 = vld [vmem:[#allocation6 + $0xb20] sm:$0xff]  ;;  %v649_v21 = vld [vmem:[#allocation6 + $0xbf8] sm:$0xff] }
 0x1d4   :  { %v620_v54 = vld [vmem:[#allocation6 + $0xb10] sm:$0xff] }
 0x1d5   :  { %3317 = vmatpush1.bf16.msra.mxu0 %v3316_v0  ;;  %v3528_v0 = vpack.c.bf16 %v584_v57, %v580_v55  ;;  %v3546_v55 = vpack.c.bf16 %v625_v49, %v621_v48  ;;  %v627_v57 = vld [vmem:[#allocation6 + $0xb48] sm:$0xff] }
 0x1d6   :  { %3509 = vmatpush1.bf16.msra.mxu1 %v3508_v22  ;;  %3319 = vmatprep.subr.bf16.mxu0 %v3318_v1  ;;  %v3338_v22 = vpack.c.bf16 %v591_v59, %v587_v58  ;;  %v586_v1 = vld [vmem:[#allocation6 + $0xa00] sm:$0xff]  ;;  %v631_v58 = vld [vmem:[#allocation6 + $0xb68] sm:$0xff]  ;;  %v629_v59 = vld [vmem:[#allocation6 + $0xb58] sm:$0xff] }
 0x1d7   :  { %3511 = vmatprep.subr.bf16.mxu1 %v3510_v5  ;;  %v592_v5 = vld [vmem:[#allocation6 + $0xa30] sm:$0xff]  ;;  %v3340_v10 = vpack.c.bf16 %v590_v2, %v586_v1  ;;  %v630_v1 = vld [vmem:[#allocation6 + $0xb60] sm:$0xff] }
 0x1d8   :  { %v628_v2 = vld [vmem:[#allocation6 + $0xb50] sm:$0xff] }
 0x1d9   :  { %3321 = vmatpush1.bf16.msra.mxu0 %v3320_v12  ;;  %v3532_v12 = vpack.c.bf16 %v592_v5, %v588_v3  ;;  %v3550_v3 = vpack.c.bf16 %v633_v60, %v629_v59  ;;  %v635_v5 = vld [vmem:[#allocation6 + $0xb88] sm:$0xff] }
 0x1da   :  { %3513 = vmatpush1.bf16.msra.mxu1 %v3512_v13  ;;  %3323 = vmatprep.subr.bf16.mxu0 %v3322_v14  ;;  %v3342_v13 = vpack.c.bf16 %v599_v7, %v595_v6  ;;  %v594_v14 = vld [vmem:[#allocation6 + $0xa40] sm:$0xff]  ;;  %v639_v6 = vld [vmem:[#allocation6 + $0xba8] sm:$0xff]  ;;  %v637_v7 = vld [vmem:[#allocation6 + $0xb98] sm:$0xff] }
 0x1db   :  { %3515 = vmatprep.subr.bf16.mxu1 %v3514_v18  ;;  %v600_v18 = vld [vmem:[#allocation6 + $0xa70] sm:$0xff]  ;;  %v3344_v24 = vpack.c.bf16 %v598_v15, %v594_v14  ;;  %v638_v14 = vld [vmem:[#allocation6 + $0xba0] sm:$0xff] }
 0x1dc   :  { %v636_v15 = vld [vmem:[#allocation6 + $0xb90] sm:$0xff]  ;;  %v1151_v60 = vld [vmem:[#allocation9 + $0x80] sm:$0xff] }
 0x1dd   :  { %3325 = vmatpush1.bf16.msra.mxu0 %v3324_v26  ;;  %v3536_v26 = vpack.c.bf16 %v600_v18, %v596_v16  ;;  %v3554_v16 = vpack.c.bf16 %v641_v8, %v637_v7  ;;  %v643_v18 = vld [vmem:[#allocation6 + $0xbc8] sm:$0xff] }
 0x1de   :  { %3517 = vmatpush1.bf16.msra.mxu1 %v3516_v27  ;;  %3327 = vmatprep.subr.bf16.mxu0 %v3326_v28  ;;  %v3346_v27 = vpack.c.bf16 %v607_v20, %v603_v19  ;;  %v602_v28 = vld [vmem:[#allocation6 + $0xa80] sm:$0xff]  ;;  %v647_v19 = vld [vmem:[#allocation6 + $0xbe8] sm:$0xff]  ;;  %v645_v20 = vld [vmem:[#allocation6 + $0xbd8] sm:$0xff] }
 0x1df   :  { %3519 = vmatprep.subr.bf16.mxu1 %v3518_v32  ;;  %v608_v32 = vld [vmem:[#allocation6 + $0xab0] sm:$0xff]  ;;  %v3348_v37 = vpack.c.bf16 %v606_v29, %v602_v28  ;;  %v646_v28 = vld [vmem:[#allocation6 + $0xbe0] sm:$0xff] }
 0x1e0   :  { %v644_v29 = vld [vmem:[#allocation6 + $0xbd0] sm:$0xff]  ;;  %v1159_v8 = vld [vmem:[#allocation9 + $0xc0] sm:$0xff] }
 0x1e1   :  { %3329 = vmatpush1.bf16.msra.mxu0 %v3328_v38  ;;  %v3540_v38 = vpack.c.bf16 %v608_v32, %v604_v30  ;;  %v3558_v30 = vpack.c.bf16 %v649_v21, %v645_v20  ;;  %v1136_v32 = vld [vmem:[#allocation9 + $0x8] sm:$0xff]  ;;  %v1167_v21 = vld [vmem:[#allocation9 + $0x100] sm:$0xff] }
 0x1e2   :  { %3521 = vmatpush1.bf16.msra.mxu1 %v3520_v40  ;;  %3331 = vmatprep.subr.bf16.mxu0 %v3330_v41  ;;  %v3350_v40 = vpack.c.bf16 %v615_v34, %v611_v33  ;;  %v610_v41 = vld [vmem:[#allocation6 + $0xac0] sm:$0xff] }
 0x1e3   :  { %3523 = vmatprep.subr.bf16.mxu1 %v3522_v45  ;;  %v616_v45 = vld [vmem:[#allocation6 + $0xaf0] sm:$0xff]  ;;  %v3352_v50 = vpack.c.bf16 %v614_v42, %v610_v41  ;;  %v1138_v33 = vld [vmem:[#allocation9 + $0x18] sm:$0xff] }
 0x1e4   :  { %v3562_v36 = vpack.c.bf16 %v1138_v33, %v1136_v32  ;;  %v1142_v41 = vld [vmem:[#allocation9 + $0x38] sm:$0xff] }
 0x1e5   :  { %3333 = vmatpush1.bf16.msra.mxu0 %v3332_v51  ;;  %v3544_v51 = vpack.c.bf16 %v616_v45, %v612_v43  ;;  %v1141_v45 = vld [vmem:[#allocation9 + $0x30] sm:$0xff]  ;;  %v1178_v32 = vld [vmem:[#allocation9 + $0x158] sm:$0xff] }
 0x1e6   :  { %3525 = vmatpush1.bf16.msra.mxu1 %v3524_v52  ;;  %3335 = vmatprep.subr.bf16.mxu0 %v3334_v53  ;;  %v3354_v52 = vpack.c.bf16 %v623_v47, %v619_v46  ;;  %v618_v53 = vld [vmem:[#allocation6 + $0xb00] sm:$0xff]  ;;  %v1144_v46 = vld [vmem:[#allocation9 + $0x48] sm:$0xff] }
 0x1e7   :  { %3527 = vmatprep.subr.bf16.mxu1 %v3526_v56  ;;  %v624_v56 = vld [vmem:[#allocation6 + $0xb30] sm:$0xff]  ;;  %v3356_v62 = vpack.c.bf16 %v622_v25, %v618_v53  ;;  %v1146_v47 = vld [vmem:[#allocation9 + $0x58] sm:$0xff] }
 0x1e8   :  { %v3570_v49 = vpack.c.bf16 %v1146_v47, %v1144_v46  ;;  %v1150_v53 = vld [vmem:[#allocation9 + $0x78] sm:$0xff] }
 0x1e9   :  { %3337 = vmatpush1.bf16.msra.mxu0 %v3336_v63  ;;  %v3548_v63 = vpack.c.bf16 %v624_v56, %v620_v54  ;;  %v1149_v56 = vld [vmem:[#allocation9 + $0x70] sm:$0xff] }
 0x1ea   :  { %3529 = vmatpush1.bf16.msra.mxu1 %v3528_v0  ;;  %3339 = vmatprep.subr.bf16.mxu0 %v3338_v22  ;;  %v3358_v0 = vpack.c.bf16 %v631_v58, %v627_v57  ;;  %v626_v22 = vld [vmem:[#allocation6 + $0xb40] sm:$0xff]  ;;  %v1152_v57 = vld [vmem:[#allocation9 + $0x88] sm:$0xff] }
 0x1eb   :  { %3531 = vmatprep.subr.bf16.mxu1 %v3530_v4  ;;  %v632_v4 = vld [vmem:[#allocation6 + $0xb70] sm:$0xff]  ;;  %v3360_v9 = vpack.c.bf16 %v630_v1, %v626_v22  ;;  %v1154_v58 = vld [vmem:[#allocation9 + $0x98] sm:$0xff] }
 0x1ed   :  { %3341 = vmatpush1.bf16.msra.mxu0 %v3340_v10  ;;  %v3552_v10 = vpack.c.bf16 %v632_v4, %v628_v2  ;;  %v1155_v2 = vld [vmem:[#allocation9 + $0xa0] sm:$0xff]  ;;  %v1160_v4 = vld [vmem:[#allocation9 + $0xc8] sm:$0xff] }
 0x1ee   :  { %3533 = vmatpush1.bf16.msra.mxu1 %v3532_v12  ;;  %3343 = vmatprep.subr.bf16.mxu0 %v3342_v13  ;;  %v3362_v12 = vpack.c.bf16 %v639_v6, %v635_v5  ;;  %v634_v13 = vld [vmem:[#allocation6 + $0xb80] sm:$0xff] }
 0x1ef   :  { %3535 = vmatprep.subr.bf16.mxu1 %v3534_v17  ;;  %v640_v17 = vld [vmem:[#allocation6 + $0xbb0] sm:$0xff]  ;;  %v3364_v23 = vpack.c.bf16 %v638_v14, %v634_v13  ;;  %v1162_v5 = vld [vmem:[#allocation9 + $0xd8] sm:$0xff] }
 0x1f0   :  { %v3586_v7 = vpack.c.bf16 %v1162_v5, %v1160_v4  ;;  %v1202_v4 = vld [vmem:[#allocation9 + $0x218] sm:$0xff] }
 0x1f1   :  { %3345 = vmatpush1.bf16.msra.mxu0 %v3344_v24  ;;  %v3556_v24 = vpack.c.bf16 %v640_v17, %v636_v15  ;;  %v1163_v15 = vld [vmem:[#allocation9 + $0xe0] sm:$0xff]  ;;  %v1168_v17 = vld [vmem:[#allocation9 + $0x108] sm:$0xff] }
 0x1f2   :  { %3537 = vmatpush1.bf16.msra.mxu1 %v3536_v26  ;;  %3347 = vmatprep.subr.bf16.mxu0 %v3346_v27  ;;  %v3366_v26 = vpack.c.bf16 %v647_v19, %v643_v18  ;;  %v642_v27 = vld [vmem:[#allocation6 + $0xbc0] sm:$0xff] }
 0x1f3   :  { %3539 = vmatprep.subr.bf16.mxu1 %v3538_v31  ;;  %v648_v31 = vld [vmem:[#allocation6 + $0xbf0] sm:$0xff]  ;;  %v3368_v34 = vpack.c.bf16 %v646_v28, %v642_v27  ;;  %v1170_v18 = vld [vmem:[#allocation9 + $0x118] sm:$0xff] }
 0x1f4   :  { %v3560_v35 = vpack.c.bf16 %v648_v31, %v644_v29  ;;  %v3594_v20 = vpack.c.bf16 %v1170_v18, %v1168_v17  ;;  %v1171_v29 = vld [vmem:[#allocation9 + $0x120] sm:$0xff]  ;;  %v1176_v31 = vld [vmem:[#allocation9 + $0x148] sm:$0xff] }
 0x1f5   :  { %3349 = vmatpush1.bf16.msra.mxu0 %v3348_v37  ;;  %v1135_v37 = vld [vmem:[#allocation9] sm:$0xff] }
 0x1f6   :  { %3541 = vmatpush1.bf16.msra.mxu1 %v3540_v38  ;;  %3351 = vmatprep.subr.bf16.mxu0 %v3350_v40  ;;  %v1137_v38 = vld [vmem:[#allocation9 + $0x10] sm:$0xff]  ;;  %v1140_v40 = vld [vmem:[#allocation9 + $0x28] sm:$0xff]  ;;  %v1199_v18 = vld [vmem:[#allocation9 + $0x200] sm:$0xff] }
 0x1f7   :  { %3543 = vmatprep.subr.bf16.mxu1 %v3542_v44  ;;  %v3564_v42 = vpack.c.bf16 %v1137_v38, %v1135_v37  ;;  %v3566_v43 = vpack.c.bf16 %v1142_v41, %v1140_v40  ;;  %v1139_v44 = vld [vmem:[#allocation9 + $0x20] sm:$0xff]  ;;  %v1180_v37 = vld [vmem:[#allocation9 + $0x168] sm:$0xff]  ;;  %v1182_v38 = vld [vmem:[#allocation9 + $0x178] sm:$0xff] }
 0x1f8   :  { %v3568_v48 = vpack.c.bf16 %v1141_v45, %v1139_v44  ;;  %v3606_v41 = vpack.c.bf16 %v1182_v38, %v1180_v37  ;;  %v1184_v44 = vld [vmem:[#allocation9 + $0x188] sm:$0xff]  ;;  %v1186_v45 = vld [vmem:[#allocation9 + $0x198] sm:$0xff]  ;;  %v1207_v38 = vld [vmem:[#allocation9 + $0x240] sm:$0xff] }
 0x1f9   :  { %3353 = vmatpush1.bf16.msra.mxu0 %v3352_v50  ;;  %v1143_v50 = vld [vmem:[#allocation9 + $0x40] sm:$0xff]  ;;  %v3610_v47 = vpack.c.bf16 %v1186_v45, %v1184_v44 }
 0x1fa   :  { %3545 = vmatpush1.bf16.msra.mxu1 %v3544_v51  ;;  %3355 = vmatprep.subr.bf16.mxu0 %v3354_v52  ;;  %v1145_v51 = vld [vmem:[#allocation9 + $0x50] sm:$0xff]  ;;  %v1148_v52 = vld [vmem:[#allocation9 + $0x68] sm:$0xff]  ;;  %v1211_v45 = vld [vmem:[#allocation9 + $0x260] sm:$0xff] }
 0x1fb   :  { %3547 = vmatprep.subr.bf16.mxu1 %v3546_v55  ;;  %v3572_v25 = vpack.c.bf16 %v1145_v51, %v1143_v50  ;;  %v3574_v54 = vpack.c.bf16 %v1150_v53, %v1148_v52  ;;  %v1147_v55 = vld [vmem:[#allocation9 + $0x60] sm:$0xff]  ;;  %v1188_v50 = vld [vmem:[#allocation9 + $0x1a8] sm:$0xff]  ;;  %v1190_v51 = vld [vmem:[#allocation9 + $0x1b8] sm:$0xff] }
 0x1fc   :  { %v3576_v59 = vpack.c.bf16 %v1149_v56, %v1147_v55  ;;  %v3614_v53 = vpack.c.bf16 %v1190_v51, %v1188_v50  ;;  %v1192_v55 = vld [vmem:[#allocation9 + $0x1c8] sm:$0xff]  ;;  %v1194_v56 = vld [vmem:[#allocation9 + $0x1d8] sm:$0xff]  ;;  %v1215_v51 = vld [vmem:[#allocation9 + $0x280] sm:$0xff] }
 0x1fd   :  { %3357 = vmatpush1.bf16.msra.mxu0 %v3356_v62  ;;  %v1153_v62 = vld [vmem:[#allocation9 + $0x90] sm:$0xff] }
 0x1fe   :  { %3549 = vmatpush1.bf16.msra.mxu1 %v3548_v63  ;;  %3359 = vmatprep.subr.bf16.mxu0 %v3358_v0  ;;  %v1156_v63 = vld [vmem:[#allocation9 + $0xa8] sm:$0xff]  ;;  %v1158_v0 = vld [vmem:[#allocation9 + $0xb8] sm:$0xff]  ;;  %v3580_v22 = vpack.c.bf16 %v1153_v62, %v1151_v60 }
 0x1ff   :  { %3551 = vmatprep.subr.bf16.mxu1 %v3550_v3  ;;  %v3582_v1 = vpack.c.bf16 %v1158_v0, %v1156_v63  ;;  %v1157_v3 = vld [vmem:[#allocation9 + $0xb0] sm:$0xff]  ;;  %v1196_v62 = vld [vmem:[#allocation9 + $0x1e8] sm:$0xff]  ;;  %v1198_v63 = vld [vmem:[#allocation9 + $0x1f8] sm:$0xff] }
 0x200   :  { %v3584_v6 = vpack.c.bf16 %v1157_v3, %v1155_v2  ;;  %v3622_v0 = vpack.c.bf16 %v1198_v63, %v1196_v62  ;;  %v1200_v3 = vld [vmem:[#allocation9 + $0x208] sm:$0xff]  ;;  %v1223_v62 = vld [vmem:[#allocation9 + $0x2c0] sm:$0xff]  ;;  %v1225_v63 = vld [vmem:[#allocation9 + $0x2d0] sm:$0xff] }
 0x201   :  { %3361 = vmatpush1.bf16.msra.mxu0 %v3360_v9  ;;  %v1161_v9 = vld [vmem:[#allocation9 + $0xd0] sm:$0xff]  ;;  %v3626_v5 = vpack.c.bf16 %v1202_v4, %v1200_v3  ;;  %v1227_v3 = vld [vmem:[#allocation9 + $0x2e0] sm:$0xff] }
 0x202   :  { %3553 = vmatpush1.bf16.msra.mxu1 %v3552_v10  ;;  %3363 = vmatprep.subr.bf16.mxu0 %v3362_v12  ;;  %v1164_v10 = vld [vmem:[#allocation9 + $0xe8] sm:$0xff]  ;;  %v1166_v12 = vld [vmem:[#allocation9 + $0xf8] sm:$0xff]  ;;  %v3588_v13 = vpack.c.bf16 %v1161_v9, %v1159_v8  ;;  %v5183_v8 = vsub.s32 1, %v5141_v61  ;;  %v5186_v9 = vsub.s32 3, %v5141_v61  ;;  %v1229_v4 = vld [vmem:[#allocation9 + $0x2f0] sm:$0xff] }
 0x203   :  { %3555 = vmatprep.subr.bf16.mxu1 %v3554_v16  ;;  %v3590_v14 = vpack.c.bf16 %v1166_v12, %v1164_v10  ;;  %v1165_v16 = vld [vmem:[#allocation9 + $0xf0] sm:$0xff] }
 0x204   :  { %v3592_v19 = vpack.c.bf16 %v1165_v16, %v1163_v15 }
 0x205   :  { %3365 = vmatpush1.bf16.msra.mxu0 %v3364_v23  ;;  %v1169_v23 = vld [vmem:[#allocation9 + $0x110] sm:$0xff] }
 0x206   :  { %3557 = vmatpush1.bf16.msra.mxu1 %v3556_v24  ;;  %3367 = vmatprep.subr.bf16.mxu0 %v3366_v26  ;;  %v1172_v24 = vld [vmem:[#allocation9 + $0x128] sm:$0xff]  ;;  %v1174_v26 = vld [vmem:[#allocation9 + $0x138] sm:$0xff]  ;;  %v3596_v27 = vpack.c.bf16 %v1169_v23, %v1167_v21 }
 0x207   :  { %3559 = vmatprep.subr.bf16.mxu1 %v3558_v30  ;;  %v3598_v28 = vpack.c.bf16 %v1174_v26, %v1172_v24  ;;  %v1173_v30 = vld [vmem:[#allocation9 + $0x130] sm:$0xff]  ;;  %v1204_v23 = vld [vmem:[#allocation9 + $0x228] sm:$0xff]  ;;  %v1206_v24 = vld [vmem:[#allocation9 + $0x238] sm:$0xff] }
 0x208   :  { %v3600_v33 = vpack.c.bf16 %v1173_v30, %v1171_v29  ;;  %v3630_v30 = vpack.c.bf16 %v1206_v24, %v1204_v23  ;;  %v1237_v23 = vld [vmem:[#allocation9 + $0x330] sm:$0xff]  ;;  %v1240_v24 = vld [vmem:[#allocation9 + $0x348] sm:$0xff] }
 0x209   :  { %3369 = vmatpush1.bf16.msra.mxu0 %v3368_v34  ;;  %v3602_v34 = vpack.c.bf16 %v1178_v32, %v1176_v31  ;;  %v1203_v31 = vld [vmem:[#allocation9 + $0x220] sm:$0xff]  ;;  %v1205_v32 = vld [vmem:[#allocation9 + $0x230] sm:$0xff] }
 0x20a   :  { %3561 = vmatpush1.bf16.msra.mxu1 %v3560_v35  ;;  %3563 = vmatprep.subr.bf16.mxu0 %v3562_v36  ;;  %v1175_v35 = vld [vmem:[#allocation9 + $0x140] sm:$0xff]  ;;  %v1177_v36 = vld [vmem:[#allocation9 + $0x150] sm:$0xff] }
 0x20b   :  { %v3604_v40 = vpack.c.bf16 %v1177_v36, %v1175_v35  ;;  %v1210_v35 = vld [vmem:[#allocation9 + $0x258] sm:$0xff]  ;;  %v3632_v36 = vpack.c.bf16 %v1205_v32, %v1203_v31  ;;  %v1244_v31 = vld [vmem:[#allocation9 + $0x368] sm:$0xff] }
 0x20c   :  { %912 = vmatmul.mubr.f32.vlgmr.msra.gmra.mrb[0].mxu0 %v5169_v39  ;;  %v1246_v32 = vld [vmem:[#allocation9 + $0x378] sm:$0xff] }
 0x20d   :  { %1125 = vmatmul.mubr.f32.vlgmr.msra.gmra.mrb[0].mxu1 %v5169_v39  ;;  %3565 = vmatpush1.bf16.msra.mxu0 %v3564_v42  ;;  %v3578_v39 = vpack.c.bf16 %v1154_v58, %v1152_v57  ;;  %v1179_v42 = vld [vmem:[#allocation9 + $0x160] sm:$0xff]  ;;  %v3618_v58 = vpack.c.bf16 %v1194_v56, %v1192_v55 }
 0x20e   :  { %3567 = vmatprep.subr.bf16.mxu0 %v3566_v43  ;;  %v1181_v43 = vld [vmem:[#allocation9 + $0x170] sm:$0xff]  ;;  %v1219_v56 = vld [vmem:[#allocation9 + $0x2a0] sm:$0xff] }
 0x20f   :  { %v3608_v46 = vpack.c.bf16 %v1181_v43, %v1179_v42  ;;  %v1214_v42 = vld [vmem:[#allocation9 + $0x278] sm:$0xff] }
 0x211   :  { %3569 = vmatpush1.bf16.msra.mxu0 %v3568_v48  ;;  %v1183_v48 = vld [vmem:[#allocation9 + $0x180] sm:$0xff] }
 0x212   :  { %3571 = vmatprep.subr.bf16.mxu0 %v3570_v49  ;;  %v1185_v49 = vld [vmem:[#allocation9 + $0x190] sm:$0xff] }
 0x213   :  { %v3612_v52 = vpack.c.bf16 %v1185_v49, %v1183_v48  ;;  %v1218_v48 = vld [vmem:[#allocation9 + $0x298] sm:$0xff] }
 0x215   :  { %3573 = vmatpush1.bf16.msra.mxu0 %v3572_v25  ;;  %v1187_v25 = vld [vmem:[#allocation9 + $0x1a0] sm:$0xff] }
 0x216   :  { %3575 = vmatprep.subr.bf16.mxu0 %v3574_v54  ;;  %v1189_v54 = vld [vmem:[#allocation9 + $0x1b0] sm:$0xff] }
 0x217   :  { %v3616_v57 = vpack.c.bf16 %v1189_v54, %v1187_v25  ;;  %v1222_v25 = vld [vmem:[#allocation9 + $0x2b8] sm:$0xff] }
 0x219   :  { %3577 = vmatpush1.bf16.msra.mxu0 %v3576_v59  ;;  %v1191_v59 = vld [vmem:[#allocation9 + $0x1c0] sm:$0xff] }
 0x21a   :  { %3579 = vmatprep.subr.bf16.mxu0 %v3578_v39  ;;  %v1193_v39 = vld [vmem:[#allocation9 + $0x1d0] sm:$0xff] }
 0x21b   :  { %v3620_v60 = vpack.c.bf16 %v1193_v39, %v1191_v59  ;;  %v1226_v59 = vld [vmem:[#allocation9 + $0x2d8] sm:$0xff] }
 0x21d   :  { %3581 = vmatpush1.bf16.msra.mxu0 %v3580_v22  ;;  %v1195_v22 = vld [vmem:[#allocation9 + $0x1e0] sm:$0xff] }
 0x21e   :  { %3583 = vmatprep.subr.bf16.mxu0 %v3582_v1  ;;  %v1197_v1 = vld [vmem:[#allocation9 + $0x1f0] sm:$0xff] }
 0x21f   :  { %v3624_v2 = vpack.c.bf16 %v1197_v1, %v1195_v22  ;;  %v1230_v22 = vld [vmem:[#allocation9 + $0x2f8] sm:$0xff]  ;;  %v3652_v1 = vpack.c.bf16 %v1225_v63, %v1223_v62  ;;  %v1261_v62 = vld [vmem:[#allocation9 + $0x3f0] sm:$0xff] }
 0x220   :  { %v1435_v63 = vld [vmem:[%s5408_s6 + $0x80] sm:$0xff] }
 0x221   :  { %3585 = vmatpush1.bf16.msra.mxu0 %v3584_v6  ;;  %v5178_v6 = vsub.s32 0, %v5141_v61 }
 0x222   :  { %3587 = vmatprep.subr.bf16.mxu0 %v3586_v7  ;;  %v5180_v7 = vld [vmem:[#allocation8] sm:$0xf] }
 0x223   :  { %v655_v10 = vrot.slane %v5180_v7, %v5178_v6  ;;  %v659_v12 = vrot.slane %v5180_v7, %v5183_v8 }
 0x225   :  { %3589 = vmatpush1.bf16.msra.mxu0 %v3588_v13  ;;  %v667_v13 = vrot.slane %v5180_v7, %v5186_v9 }
 0x226   :  { %3591 = vmatprep.subr.bf16.mxu0 %v3590_v14 }
 0x229   :  { %3593 = vmatpush1.bf16.msra.mxu0 %v3592_v19  ;;  %v1201_v19 = vld [vmem:[#allocation9 + $0x210] sm:$0xff] }
 0x22a   :  { %3595 = vmatprep.subr.bf16.mxu0 %v3594_v20 }
 0x22d   :  { %3597 = vmatpush1.bf16.msra.mxu0 %v3596_v27 }
 0x22e   :  { %3599 = vmatprep.subr.bf16.mxu0 %v3598_v28  ;;  %v3628_v28 = vpack.c.bf16 %v1201_v19, %v1199_v18  ;;  %v1238_v18 = vld [vmem:[#allocation9 + $0x338] sm:$0xff] }
 0x231   :  { %3601 = vmatpush1.bf16.msra.mxu0 %v3600_v33 }
 0x232   :  { %3603 = vmatprep.subr.bf16.mxu0 %v3602_v34  ;;  %v1208_v34 = vld [vmem:[#allocation9 + $0x248] sm:$0xff] }
 0x233   :  { %v3634_v37 = vpack.c.bf16 %v1210_v35, %v1208_v34  ;;  %v3670_v34 = vpack.c.bf16 %v1246_v32, %v1244_v31  ;;  %v1243_v35 = vld [vmem:[#allocation9 + $0x360] sm:$0xff] }
 0x234   :  { %v1444_v31 = vld [vmem:[%s5408_s6 + $0xc8] sm:$0xff] }
 0x235   :  { %3605 = vmatpush1.bf16.msra.mxu0 %v3604_v40  ;;  %v1209_v40 = vld [vmem:[#allocation9 + $0x250] sm:$0xff] }
 0x236   :  { %3607 = vmatprep.subr.bf16.mxu0 %v3606_v41  ;;  %v1212_v41 = vld [vmem:[#allocation9 + $0x268] sm:$0xff]  ;;  %v3636_v43 = vpack.c.bf16 %v1209_v40, %v1207_v38  ;;  %v1250_v38 = vld [vmem:[#allocation9 + $0x398] sm:$0xff] }
 0x237   :  { %v3638_v44 = vpack.c.bf16 %v1214_v42, %v1212_v41  ;;  %v1247_v42 = vld [vmem:[#allocation9 + $0x380] sm:$0xff] }
 0x239   :  { %3609 = vmatpush1.bf16.msra.mxu0 %v3608_v46  ;;  %v1213_v46 = vld [vmem:[#allocation9 + $0x270] sm:$0xff] }
 0x23a   :  { %3611 = vmatprep.subr.bf16.mxu0 %v3610_v47  ;;  %v1216_v47 = vld [vmem:[#allocation9 + $0x288] sm:$0xff]  ;;  %v3640_v49 = vpack.c.bf16 %v1213_v46, %v1211_v45  ;;  %v1254_v45 = vld [vmem:[#allocation9 + $0x3b8] sm:$0xff] }
 0x23b   :  { %v3642_v50 = vpack.c.bf16 %v1218_v48, %v1216_v47  ;;  %v1251_v48 = vld [vmem:[#allocation9 + $0x3a0] sm:$0xff] }
 0x23d   :  { %3613 = vmatpush1.bf16.msra.mxu0 %v3612_v52  ;;  %v1217_v52 = vld [vmem:[#allocation9 + $0x290] sm:$0xff] }
 0x23e   :  { %3615 = vmatprep.subr.bf16.mxu0 %v3614_v53  ;;  %v1220_v53 = vld [vmem:[#allocation9 + $0x2a8] sm:$0xff]  ;;  %v3644_v54 = vpack.c.bf16 %v1217_v52, %v1215_v51  ;;  %v1258_v51 = vld [vmem:[#allocation9 + $0x3d8] sm:$0xff] }
 0x23f   :  { %v3646_v55 = vpack.c.bf16 %v1222_v25, %v1220_v53  ;;  %v5197_v53 = vsub.s32 2, %v5141_v61 }
 0x241   :  { %3617 = vmatpush1.bf16.msra.mxu0 %v3616_v57  ;;  %v1221_v57 = vld [vmem:[#allocation9 + $0x2b0] sm:$0xff] }
 0x242   :  { %3619 = vmatprep.subr.bf16.mxu0 %v3618_v58  ;;  %v1224_v58 = vld [vmem:[#allocation9 + $0x2c8] sm:$0xff]  ;;  %v3648_v39 = vpack.c.bf16 %v1221_v57, %v1219_v56  ;;  %v1262_v57 = vld [vmem:[#allocation9 + $0x3f8] sm:$0xff] }
 0x243   :  { %v1260_v56 = vld [vmem:[#allocation9 + $0x3e8] sm:$0xff] }
 0x245   :  { %3621 = vmatpush1.bf16.msra.mxu0 %v3620_v60  ;;  %v3650_v60 = vpack.c.bf16 %v1226_v59, %v1224_v58  ;;  %v663_v59 = vrot.slane %v5180_v7, %v5197_v53  ;;  %v1419_v7 = vld [vmem:[%s5408_s6] sm:$0xff] }
 0x246   :  { %3623 = vmatprep.subr.bf16.mxu0 %v3622_v0  ;;  %v1228_v0 = vld [vmem:[#allocation9 + $0x2e8] sm:$0xff] }
 0x249   :  { %3625 = vmatpush1.bf16.msra.mxu0 %v3624_v2  ;;  %v3654_v2 = vpack.c.bf16 %v1230_v22, %v1228_v0  ;;  %v1436_v0 = vld [vmem:[%s5408_s6 + $0x88] sm:$0xff] }
 0x24a   :  { %3627 = vmatprep.subr.bf16.mxu0 %v3626_v5  ;;  %v1232_v5 = vld [vmem:[#allocation9 + $0x308] sm:$0xff] }
 0x2df   :  { %v913_v14 = vpop.f32.mrb[0].mxu0 }
 0x2e0   :  { %v4268_v15 = vadd.f32 %v913_v14, %v655_v10  ;;  %v5194_v16 = vpop.f32.mrb[0].mxu1  ;;  %v915_v17 = vpop.f32.mrb[1].mxu0  ;;  %v1234_v10 = vld [vmem:[#allocation9 + $0x318] sm:$0xff]  ;;  %v1231_v14 = vld [vmem:[#allocation9 + $0x300] sm:$0xff] }
 0x2e1   :  { %v4269_v20 = vadd.f32 %v915_v17, %v659_v12  ;;  %v1128_v21 = vpop.f32.mrb[1].mxu1  ;;  %v3656_v12 = vpack.c.bf16 %v1229_v4, %v1227_v3  ;;  %v1236_v17 = vld [vmem:[#allocation9 + $0x328] sm:$0xff]  ;;  %v1420_v3 = vld [vmem:[%s5408_s6 + $0x8] sm:$0xff] }
 0x2e2   :  { %v4271_v26 = vadd.f32 %v1128_v21, %v667_v13  ;;  %v1131_v29 = vmax.f32 %v4268_v15, 0.0  ;;  %v3658_v13 = vpack.c.bf16 %v1234_v10, %v1232_v5  ;;  %v1233_v15 = vld [vmem:[#allocation9 + $0x310] sm:$0xff]  ;;  %v1235_v21 = vld [vmem:[#allocation9 + $0x320] sm:$0xff]  ;;  %v1437_v4 = vld [vmem:[%s5408_s6 + $0x90] sm:$0xff] }
 0x2e3   :  { %v1132_v27 = vmax.f32 %v4269_v20, 0.0  ;;  %v3660_v19 = vpack.c.bf16 %v1233_v15, %v1231_v14  ;;  %v3662_v20 = vpack.c.bf16 %v1238_v18, %v1236_v17  ;;  %v1438_v5 = vld [vmem:[%s5408_s6 + $0x98] sm:$0xff]  ;;  %v1439_v15 = vld [vmem:[%s5408_s6 + $0xa0] sm:$0xff]  ;;  %v1440_v17 = vld [vmem:[%s5408_s6 + $0xa8] sm:$0xff] }
 0x2e4   :  { %v1134_v33 = vmax.f32 %v4271_v26, 0.0  ;;  %v1242_v26 = vld [vmem:[#allocation9 + $0x358] sm:$0xff]  ;;  %v1422_v14 = vld [vmem:[%s5408_s6 + $0x18] sm:$0xff] }
 0x2e5   :  { %1339 = vmatprep.mubr.f32.mxu0 %v1132_v27  ;;  %v3664_v27 = vpack.c.bf16 %v1237_v23, %v1235_v21  ;;  %v1424_v21 = vld [vmem:[%s5408_s6 + $0x28] sm:$0xff]  ;;  %v1441_v23 = vld [vmem:[%s5408_s6 + $0xb0] sm:$0xff] }
 0x2e6   :  { %1340 = vmatmul.mubr.f32.vlgmr.msra.gmra.mrb[2].mxu0 %v1131_v29  ;;  %v1239_v29 = vld [vmem:[#allocation9 + $0x340] sm:$0xff] }
 0x2e7   :  { %3629 = vmatpush1.bf16.msra.mxu0 %v3628_v28  ;;  %1410 = vmatprep.mubr.f32.mxu0 %v1134_v33  ;;  %v3666_v28 = vpack.c.bf16 %v1242_v26, %v1240_v24  ;;  %v1442_v24 = vld [vmem:[%s5408_s6 + $0xb8] sm:$0xff] }
 0x2e8   :  { %3631 = vmatprep.subr.bf16.mxu0 %v3630_v30  ;;  %v1241_v30 = vld [vmem:[#allocation9 + $0x350] sm:$0xff] }
 0x2e9   :  { %v3668_v33 = vpack.c.bf16 %v1241_v30, %v1239_v29  ;;  %v1426_v29 = vld [vmem:[%s5408_s6 + $0x38] sm:$0xff]  ;;  %v1443_v30 = vld [vmem:[%s5408_s6 + $0xc0] sm:$0xff] }
 0x2eb   :  { %3633 = vmatpush1.bf16.msra.mxu0 %v3632_v36  ;;  %v1245_v36 = vld [vmem:[#allocation9 + $0x370] sm:$0xff] }
 0x2ec   :  { %3635 = vmatprep.subr.bf16.mxu0 %v3634_v37  ;;  %v1248_v37 = vld [vmem:[#allocation9 + $0x388] sm:$0xff]  ;;  %v3672_v40 = vpack.c.bf16 %v1245_v36, %v1243_v35  ;;  %v1428_v35 = vld [vmem:[%s5408_s6 + $0x48] sm:$0xff] }
 0x2ed   :  { %v3674_v41 = vpack.c.bf16 %v1250_v38, %v1248_v37  ;;  %v1445_v36 = vld [vmem:[%s5408_s6 + $0xd0] sm:$0xff]  ;;  %v1446_v37 = vld [vmem:[%s5408_s6 + $0xd8] sm:$0xff] }
 0x2ef   :  { %3637 = vmatpush1.bf16.msra.mxu0 %v3636_v43  ;;  %v1249_v43 = vld [vmem:[#allocation9 + $0x390] sm:$0xff] }
 0x2f0   :  { %3639 = vmatprep.subr.bf16.mxu0 %v3638_v44  ;;  %v1252_v44 = vld [vmem:[#allocation9 + $0x3a8] sm:$0xff]  ;;  %v3676_v46 = vpack.c.bf16 %v1249_v43, %v1247_v42  ;;  %v1430_v42 = vld [vmem:[%s5408_s6 + $0x58] sm:$0xff]  ;;  %v1447_v43 = vld [vmem:[%s5408_s6 + $0xe0] sm:$0xff] }
 0x2f1   :  { %v3678_v47 = vpack.c.bf16 %v1254_v45, %v1252_v44  ;;  %v1448_v44 = vld [vmem:[%s5408_s6 + $0xe8] sm:$0xff] }
 0x2f3   :  { %3641 = vmatpush1.bf16.msra.mxu0 %v3640_v49  ;;  %v1253_v49 = vld [vmem:[#allocation9 + $0x3b0] sm:$0xff] }
 0x2f4   :  { %3643 = vmatprep.subr.bf16.mxu0 %v3642_v50  ;;  %v1256_v50 = vld [vmem:[#allocation9 + $0x3c8] sm:$0xff]  ;;  %v3680_v52 = vpack.c.bf16 %v1253_v49, %v1251_v48  ;;  %v1432_v48 = vld [vmem:[%s5408_s6 + $0x68] sm:$0xff] }
 0x2f5   :  { %v3682_v25 = vpack.c.bf16 %v1258_v51, %v1256_v50  ;;  %v1449_v50 = vld [vmem:[%s5408_s6 + $0xf0] sm:$0xff]  ;;  %v1450_v51 = vld [vmem:[%s5408_s6 + $0xf8] sm:$0xff] }
 0x2f7   :  { %3645 = vmatpush1.bf16.msra.mxu0 %v3644_v54  ;;  %v1255_v54 = vld [vmem:[#allocation9 + $0x3c0] sm:$0xff] }
 0x2f8   :  { %3647 = vmatprep.subr.bf16.mxu0 %v3646_v55  ;;  %v1257_v55 = vld [vmem:[#allocation9 + $0x3d0] sm:$0xff] }
 0x2f9   :  { %v3684_v58 = vpack.c.bf16 %v1257_v55, %v1255_v54  ;;  %v1434_v54 = vld [vmem:[%s5408_s6 + $0x78] sm:$0xff] }
 0x2fb   :  { %3649 = vmatpush1.bf16.msra.mxu0 %v3648_v39  ;;  %v3686_v39 = vpack.c.bf16 %v1262_v57, %v1260_v56  ;;  %v1529_v56 = vld [vmem:[#allocation14] sm:$0xff]  ;;  %v1530_v57 = vld [vmem:[#allocation14 + $0x8] sm:$0xff] }
 0x2fc   :  { %3651 = vmatprep.subr.bf16.mxu0 %v3650_v60  ;;  %v1259_v60 = vld [vmem:[#allocation9 + $0x3e0] sm:$0xff] }
 0x2fd   :  { %v3688_v22 = vpack.c.bf16 %v1261_v62, %v1259_v60  ;;  %v1532_v60 = vld [vmem:[#allocation14 + $0x18] sm:$0xff] }
 0x2ff   :  { %3653 = vmatpush1.bf16.msra.mxu0 %v3652_v1  ;;  %v4270_v1 = vadd.f32 %v5194_v16, %v663_v59  ;;  %v3692_v16 = vpack.c.bf16 %v1420_v3, %v1419_v7  ;;  %v4820_v59 = vmov 0.0|0.0  }
 0x300   :  { %3655 = vmatprep.subr.bf16.mxu0 %v3654_v2  ;;  %v3690_v2 = vpack.c.bf16 %v1436_v0, %v1435_v63  ;;  %3722 = vmatprep.subr.bf16.mxu1 %v4820_v59  ;;  %v1263_v63 = vld [vmem:[#allocation11] sm:$0x3] }
 0x301   :  { %v1133_v10 = vmax.f32 %v4270_v1, 0.0  ;;  %v1268_v0 = vrot.slane %v1263_v63, %v5178_v6 }
 0x303   :  { %3657 = vmatpush1.bf16.msra.mxu0 %v3656_v12  ;;  %v3694_v12 = vpack.c.bf16 %v1438_v5, %v1437_v4 }
 0x304   :  { %3659 = vmatprep.subr.bf16.mxu0 %v3658_v13  ;;  %v1421_v13 = vld [vmem:[%s5408_s6 + $0x10] sm:$0xff] }
 0x305   :  { %v3696_v18 = vpack.c.bf16 %v1422_v14, %v1421_v13  ;;  %v1535_v13 = vld [vmem:[#allocation14 + $0x30] sm:$0xff]  ;;  %v1536_v14 = vld [vmem:[#allocation14 + $0x38] sm:$0xff] }
 0x307   :  { %3661 = vmatpush1.bf16.msra.mxu0 %v3660_v19  ;;  %v3698_v19 = vpack.c.bf16 %v1440_v17, %v1439_v15  ;;  %v3732_v15 = vpack.c.bf16 %v1536_v14, %v1535_v13  ;;  %v4822_v17 = vmov 0.0   ;;  %v1841_v14 = vld [vmem:[#allocation23 + $0x38] sm:$0xff] }
 0x308   :  { %3663 = vmatprep.subr.bf16.mxu0 %v3662_v20  ;;  %v1423_v20 = vld [vmem:[%s5408_s6 + $0x20] sm:$0xff]  ;;  %3164 = vmatprep.mubr.msk.f32.mxu1 %vm4821_vm0, %v4822_v17 }
 0x309   :  { %v3700_v26 = vpack.c.bf16 %v1424_v21, %v1423_v20  ;;  %v3092_v20 = vld [vmem:[#allocation12] ss:$0 sm:$0xff] }
 0x30b   :  { %3665 = vmatpush1.bf16.msra.mxu0 %v3664_v27  ;;  %v3702_v27 = vpack.c.bf16 %v1442_v24, %v1441_v23 }
 0x30c   :  { %3667 = vmatprep.subr.bf16.mxu0 %v3666_v28  ;;  %v1425_v28 = vld [vmem:[%s5408_s6 + $0x30] sm:$0xff] }
 0x30d   :  { %v3704_v32 = vpack.c.bf16 %v1426_v29, %v1425_v28  ;;  %v1645_v28 = vld [vmem:[#allocation17 + $0x8] sm:$0xff]  ;;  %v1646_v29 = vld [vmem:[#allocation17 + $0x10] sm:$0xff] }
 0x30f   :  { %3669 = vmatpush1.bf16.msra.mxu0 %v3668_v33  ;;  %v3706_v33 = vpack.c.bf16 %v1444_v31, %v1443_v30  ;;  %v1647_v31 = vld [vmem:[#allocation17 + $0x18] sm:$0xff] }
 0x310   :  { %3671 = vmatprep.subr.bf16.mxu0 %v3670_v34  ;;  %v1427_v34 = vld [vmem:[%s5408_s6 + $0x40] sm:$0xff] }
 0x311   :  { %v3708_v38 = vpack.c.bf16 %v1428_v35, %v1427_v34 }
 0x313   :  { %3673 = vmatpush1.bf16.msra.mxu0 %v3672_v40  ;;  %v3710_v40 = vpack.c.bf16 %v1446_v37, %v1445_v36 }
 0x314   :  { %3675 = vmatprep.subr.bf16.mxu0 %v3674_v41  ;;  %v1429_v41 = vld [vmem:[%s5408_s6 + $0x50] sm:$0xff] }
 0x315   :  { %v3712_v45 = vpack.c.bf16 %v1430_v42, %v1429_v41  ;;  %v1731_v41 = vld [vmem:[#allocation20 + $0x8] sm:$0xff]  ;;  %v1733_v42 = vld [vmem:[#allocation20 + $0x18] sm:$0xff] }
 0x317   :  { %3677 = vmatpush1.bf16.msra.mxu0 %v3676_v46  ;;  %v3714_v46 = vpack.c.bf16 %v1448_v44, %v1447_v43  ;;  %v3740_v43 = vpack.c.bf16 %v1733_v42, %v1731_v41  ;;  %v1869_v41 = vld [vmem:[#allocation23 + $0x118] sm:$0xff] }
 0x318   :  { %3679 = vmatprep.subr.bf16.mxu0 %v3678_v47  ;;  %v1431_v47 = vld [vmem:[%s5408_s6 + $0x60] sm:$0xff]  ;;  %v1873_v42 = vld [vmem:[#allocation23 + $0x138] sm:$0xff] }
 0x319   :  { %v3716_v49 = vpack.c.bf16 %v1432_v48, %v1431_v47  ;;  %v1730_v48 = vld [vmem:[#allocation20] sm:$0xff] }
 0x31b   :  { %3681 = vmatpush1.bf16.msra.mxu0 %v3680_v52  ;;  %v3718_v52 = vpack.c.bf16 %v1450_v51, %v1449_v50  ;;  %v1735_v50 = vld [vmem:[#allocation20 + $0x28] sm:$0xff]  ;;  %v1737_v51 = vld [vmem:[#allocation20 + $0x38] sm:$0xff] }
 0x31c   :  { %3683 = vmatprep.subr.bf16.mxu0 %v3682_v25  ;;  %v1433_v25 = vld [vmem:[%s5408_s6 + $0x70] sm:$0xff]  ;;  %s4823_s6 = smov 96  }
 0x31d   :  { %v3720_v55 = vpack.c.bf16 %v1434_v54, %v1433_v25 }
 0x31f   :  { %3685 = vmatpush1.bf16.msra.mxu0 %v3684_v58  ;;  %v1531_v58 = vld [vmem:[#allocation14 + $0x10] sm:$0xff] }
 0x320   :  { %3687 = vmatprep.subr.bf16.mxu0 %v3686_v39  ;;  %v3723_v39 = vpack.c.bf16 %v1530_v57, %v1529_v56  ;;  %v3726_v62 = vpack.c.bf16 %v1532_v60, %v1531_v58  ;;  %v3744_v56 = vpack.c.bf16 %v1737_v51, %v1735_v50  ;;  %v1734_v57 = vld [vmem:[#allocation20 + $0x20] sm:$0xff]  ;;  %v1736_v58 = vld [vmem:[#allocation20 + $0x30] sm:$0xff] }
 0x321   :  { %v3746_v60 = vpack.c.bf16 %v1736_v58, %v1734_v57  ;;  %v1876_v50 = vld [vmem:[#allocation23 + $0x150] sm:$0xff] }
 0x322   :  { %3724 = vmatpush3.bf16.msra.mxu1 %v3723_v39  ;;  %v1741_v39 = vld [vmem:[#allocation20 + $0x58] sm:$0xff] }
 0x323   :  { %3689 = vmatpush1.bf16.msra.mxu0 %v3688_v22  ;;  %3725 = vmatprep.subr.bf16.mxu1 %v4820_v59  ;;  %v1272_v22 = vrot.slane %v1263_v63, %v5183_v8  ;;  %v1738_v63 = vld [vmem:[#allocation20 + $0x40] sm:$0xff]  ;;  %v1880_v51 = vld [vmem:[#allocation23 + $0x170] sm:$0xff] }
 0x324   :  { %3691 = vmatprep.subr.bf16.mxu0 %v3690_v2  ;;  %v1888_v57 = vld [vmem:[#allocation23 + $0x1b0] sm:$0xff] }
 0x326   :  { %1411 = vmatmul.mubr.f32.vlgmr.msra.gmra.mrb[2].mxu0 %v1133_v10  ;;  %3727 = vmatpush3.bf16.msra.mxu1 %v3726_v62  ;;  %v1534_v10 = vld [vmem:[#allocation14 + $0x28] sm:$0xff] }
 0x327   :  { %3693 = vmatpush3.bf16.msra.mxu0 %v3692_v16  ;;  %3728 = vmatprep.subr.bf16.mxu1 %v4820_v59  ;;  %v1533_v16 = vld [vmem:[#allocation14 + $0x20] sm:$0xff] }
 0x328   :  { %3695 = vmatprep.subr.bf16.mxu0 %v3694_v12  ;;  %v3729_v12 = vpack.c.bf16 %v1534_v10, %v1533_v16  ;;  %v1835_v16 = vld [vmem:[#allocation23 + $0x8] sm:$0xff] }
 0x329   :  { %v1839_v10 = vld [vmem:[#allocation23 + $0x28] sm:$0xff] }
 0x32a   :  { %3730 = vmatpush3.bf16.msra.mxu1 %v3729_v12  ;;  %v1837_v12 = vld [vmem:[#allocation23 + $0x18] sm:$0xff]  ;;  %v3756_v13 = vpack.c.bf16 %v1839_v10, %v1835_v16 }
 0x32b   :  { %3697 = vmatpush3.bf16.msra.mxu0 %v3696_v18  ;;  %3731 = vmatprep.subr.bf16.mxu1 %v4820_v59  ;;  %v1624_v18 = vld [vmem:[#allocation3] sm:$0x3]  ;;  %v1913_v16 = vld [vmem:[#allocation23 + $0x278] sm:$0xff] }
 0x32c   :  { %3699 = vmatprep.subr.bf16.mxu0 %v3698_v19  ;;  %1626 = vrot.lane.b32.xlu0 %v1624_v18, %s5448_s25  ;;  %v1840_v18 = vld [vmem:[#allocation23 + $0x30] sm:$0xff]  ;;  %s4824_s25 = smov [#allocation30]  }
 0x32d   :  { %s3055_s24 = sshll.u32 %s4824_s25, 4  ;;  %s3056_s24 = int_to_ptr.vmem [resolvable:$true] %s3055_s24 }
 0x32e   :  { %3733 = vmatpush3.bf16.msra.mxu1 %v3732_v15  ;;  %v3820_v15 = vpack.c.bf16 %v1841_v14, %v1837_v12  ;;  %v1908_v12 = vld [vmem:[#allocation23 + $0x250] sm:$0xff]  ;;  %s4707_s29 = scalar_lea.vmem %s3056_s24, 32  ;;  %p4712_p3 = scmp.lt.s32.totalorder %s3056_s24, %s3056_s24 }
 0x32f   :  { %3701 = vmatpush3.bf16.msra.mxu0 %v3700_v26  ;;  %3734 = vmatprep.subr.bf16.mxu1 %v4820_v59  ;;  %p4708_p2 = scmp.ne.s32.totalorder %s3056_s24, %s4707_s29  ;;  %p4713_p4 = scmp.lt.s32.totalorder %s4707_s29, %s4707_s29 }
 0x330   :  { %3703 = vmatprep.subr.bf16.mxu0 %v3702_v27  ;;  %v1644_v27 = vld [vmem:[#allocation17] sm:$0xff] }
 0x331   :  { %v3735_v30 = vpack.c.bf16 %v1645_v28, %v1644_v27  ;;  %v1853_v28 = vld [vmem:[#allocation23 + $0x98] sm:$0xff]  ;;  %p4714_p5 = por %p4713_p4, %p4712_p3 }
 0x333   :  { %3705 = vmatpush3.bf16.msra.mxu0 %v3704_v32  ;;  %v3738_v32 = vpack.c.bf16 %v1647_v31, %v1646_v29  ;;  %v1857_v29 = vld [vmem:[#allocation23 + $0xb8] sm:$0xff]  ;;  %v1852_v31 = vld [vmem:[#allocation23 + $0x90] sm:$0xff]  ;;  %p4715_p6 = pnand %p4714_p5, %p4708_p2 }
 0x334   :  { %3707 = vmatprep.subr.bf16.mxu0 %v3706_v33  ;;  %v3093_v33 = vld [vmem:[#allocation15] ss:$0 sm:$0xff] }
 0x337   :  { %3709 = vmatpush3.bf16.msra.mxu0 %v3708_v38 }
 0x338   :  { %3711 = vmatprep.subr.bf16.mxu0 %v3710_v40 }
 0x33b   :  { %3713 = vmatpush3.bf16.msra.mxu0 %v3712_v45 }
 0x33c   :  { %3715 = vmatprep.subr.bf16.mxu0 %v3714_v46 }
 0x33f   :  { %3717 = vmatpush3.bf16.msra.mxu0 %v3716_v49  ;;  %v1732_v49 = vld [vmem:[#allocation20 + $0x10] sm:$0xff] }
 0x340   :  { %3719 = vmatprep.subr.bf16.mxu0 %v3718_v52  ;;  %v3742_v54 = vpack.c.bf16 %v1732_v49, %v1730_v48  ;;  %v1881_v48 = vld [vmem:[#allocation23 + $0x178] sm:$0xff] }
 0x343   :  { %3721 = vmatpush3.bf16.msra.mxu0 %v3720_v55 }
 0x344   :  { %3821 = vmatprep.subr.bf16.mxu0 %v3820_v15  ;;  %v1917_v15 = vld [vmem:[#allocation23 + $0x298] sm:$0xff] }
 0x39e   :  { %v1627_v44 = vpop.permute.xlu0 %1626 }
 0x3f9   :  { %v1412_v1 = vpop.f32.mrb[2].mxu0 }
 0x3fa   :  { %v4272_v2 = vadd.f32 %v1412_v1, %v1268_v0  ;;  %v1414_v7 = vpop.f32.mrb[3].mxu0  ;;  %v1740_v0 = vld [vmem:[#allocation20 + $0x50] sm:$0xff]  ;;  %v1743_v1 = vld [vmem:[#allocation20 + $0x68] sm:$0xff] }
 0x3fb   :  { %v4273_v3 = vadd.f32 %v1414_v7, %v1272_v22  ;;  %v3750_v22 = vpack.c.bf16 %v1740_v0, %v1738_v63  ;;  %v1896_v63 = vld [vmem:[#allocation23 + $0x1f0] sm:$0xff] }
 0x3fc   :  { %v1417_v5 = vmax.f32 %v4272_v2, 0.0  ;;  %v1745_v2 = vld [vmem:[#allocation20 + $0x78] sm:$0xff] }
 0x3fd   :  { %v1418_v4 = vmax.f32 %v4273_v3, 0.0  ;;  %v3752_v7 = vpack.c.bf16 %v1745_v2, %v1743_v1  ;;  %v1742_v3 = vld [vmem:[#allocation20 + $0x60] sm:$0xff] }
 0x3fe   :  { %v1905_v1 = vld [vmem:[#allocation23 + $0x238] sm:$0xff] }
 0x3ff   :  { %1522 = vmatprep.mubr.f32.mxu0 %v1418_v4  ;;  %v1744_v4 = vld [vmem:[#allocation20 + $0x70] sm:$0xff] }
 0x400   :  { %1523 = vmatmul.mubr.f32.vlgmr.msra.gmra.mrb[4].mxu0 %v1417_v5  ;;  %v3754_v5 = vpack.c.bf16 %v1744_v4, %v1742_v3  ;;  %v1904_v3 = vld [vmem:[#allocation23 + $0x230] sm:$0xff] }
 0x4d3   :  { %v3131_v19 = vpop.f32.mrb[4].mxu0 }
 0x4d4   :  { %v3132_v21 = vpop.f32.mrb[5].mxu0 }
 0x4d5   :  { %v3133_v23 = vadd.f32 %v3132_v21, %v3131_v19  ;;  %v1849_v21 = vld [vmem:[#allocation23 + $0x78] sm:$0xff] }
 0x4d7   :  { %v1525_v24 = vadd.f32 %v3133_v23, %v3092_v20  ;;  %v1845_v20 = vld [vmem:[#allocation23 + $0x58] sm:$0xff] }
 0x4d8   :  { %v3824_v23 = vpack.c.bf16 %v1849_v21, %v1845_v20  ;;  %v1920_v20 = vld [vmem:[#allocation23 + $0x2b0] sm:$0xff] }
 0x4d9   :  { %v1528_v26 = vmax.f32 %v1525_v24, 0.0  ;;  %v1844_v24 = vld [vmem:[#allocation23 + $0x50] sm:$0xff] }
 0x4db   :  { %3165 = vmatmul.mubr.msk.f32.vlgmr.msra.gmra.mrb[2].mxu1 %vm1544_vm1, %v1528_v26  ;;  %v1848_v26 = vld [vmem:[#allocation23 + $0x70] sm:$0xff] }
 0x4dc   :  { %3175 = vmatprep.mubr.msk.f32.mxu1 %vm4821_vm0, %v4822_v17  ;;  %3736 = vmatpush3.bf16.msra.mxu1 %v3735_v30  ;;  %v3826_v27 = vpack.c.bf16 %v1848_v26, %v1844_v24  ;;  %v3828_v30 = vpack.c.bf16 %v1857_v29, %v1853_v28  ;;  %v1929_v24 = vld [vmem:[#allocation23 + $0x2f8] sm:$0xff]  ;;  %v1928_v28 = vld [vmem:[#allocation23 + $0x2f0] sm:$0xff] }
 0x4dd   :  { %3737 = vmatprep.subr.bf16.mxu1 %v4820_v59  ;;  %v1739_v59 = vld [vmem:[#allocation20 + $0x48] sm:$0xff] }
 0x4de   :  { %v3748_v62 = vpack.c.bf16 %v1741_v39, %v1739_v59  ;;  %v1893_v59 = vld [vmem:[#allocation23 + $0x1d8] sm:$0xff] }
 0x4df   :  { %v1897_v39 = vld [vmem:[#allocation23 + $0x1f8] sm:$0xff] }
 0x4e0   :  { %3739 = vmatpush3.bf16.msra.mxu1 %v3738_v32  ;;  %v1856_v32 = vld [vmem:[#allocation23 + $0xb0] sm:$0xff] }
 0x4e1   :  { %3741 = vmatprep.subr.bf16.mxu1 %v3740_v43  ;;  %v3836_v43 = vpack.c.bf16 %v1873_v42, %v1869_v41  ;;  %v1944_v41 = vld [vmem:[#allocation23 + $0x370] sm:$0xff] }
 0x5ae   :  { %v1614_v34 = vpop.f32.mrb[2].mxu1 }
 0x5af   :  { %v1615_v35 = vadd.f32 %v3093_v33, %v1614_v34  ;;  %v3166_v36 = vpop.f32.mrb[3].mxu1  ;;  %v3830_v33 = vpack.c.bf16 %v1856_v32, %v1852_v31  ;;  %v1861_v34 = vld [vmem:[#allocation23 + $0xd8] sm:$0xff] }
 0x5b0   :  { %v1937_v31 = vld [vmem:[#allocation23 + $0x338] sm:$0xff] }
 0x5b1   :  { %1619 = vst.msk [vmem:[#allocation2] sm:$0x3] %vm1618_vm2, %v1615_v35  ;;  %v1865_v35 = vld [vmem:[#allocation23 + $0xf8] sm:$0xff] }
 0x5b2   :  { %v3832_v36 = vpack.c.bf16 %v1865_v35, %v1861_v34  ;;  %v1936_v34 = vld [vmem:[#allocation23 + $0x330] sm:$0xff] }
 0x5b8   :  { %v1620_v37 = vld [vmem:[#allocation2] sm:$0x3] }
 0x5b9   :  { %v1621_v38 = vmul.f32 0.5, %v1620_v37  ;;  %1636 = vst.msk [vmem:[#allocation30] sm:$0x3] %vm1635_vm3, %v1620_v37 }
 0x5bb   :  { %v1622_v40 = vmul.f32 1.442695, %v1621_v38  ;;  %v1864_v38 = vld [vmem:[#allocation23 + $0xf0] sm:$0xff] }
 0x5bd   :  { %4329 = vpow2.f32 %v1622_v40 }
 0x5c7   :  { %v4330_v45 = vpop.eup %4329 }
 0x5c8   :  { %v1629_v46 = vmul.f32 %v4330_v45, %v1627_v44  ;;  %v1637_v47 = vmul.f32 %v4330_v45, %v4330_v45  ;;  %v1868_v44 = vld [vmem:[#allocation23 + $0x110] sm:$0xff] }
 0x5c9   :  { %v1872_v45 = vld [vmem:[#allocation23 + $0x130] sm:$0xff] }
 0x5ca   :  { %1639 = vrot.lane.b32.xlu1 %v1637_v47, %s4823_s6  ;;  %1631 = vrot.lane.b32.xlu0 %v1629_v46, %s4823_s6  ;;  %v3838_v46 = vpack.c.bf16 %v1872_v45, %v1868_v44  ;;  %v1877_v47 = vld [vmem:[#allocation23 + $0x158] sm:$0xff] }
 0x5cb   :  { %v3840_v49 = vpack.c.bf16 %v1881_v48, %v1877_v47  ;;  %v1953_v44 = vld [vmem:[#allocation23 + $0x3b8] sm:$0xff]  ;;  %v1834_v47 = vld [vmem:[#allocation23] sm:$0xff] }
 0x5cc   :  { %v1838_v48 = vld [vmem:[#allocation23 + $0x20] sm:$0xff] }
 0x63c   :  { %v1640_v52 = vpop.permute.xlu1 %1639  ;;  %v1632_v25 = vpop.permute.xlu0 %1631 }
 0x63d   :  { %1642 = vst.msk [vmem:[#allocation32] sm:$0x3] %vm1635_vm3, %v1640_v52  ;;  %v1634_v55 = vadd.f32 %v1632_v25, %v1620_v37  ;;  %v1860_v37 = vld [vmem:[#allocation23 + $0xd0] sm:$0xff]  ;;  %v3842_v52 = vpack.c.bf16 %v1880_v51, %v1876_v50  ;;  %v1885_v25 = vld [vmem:[#allocation23 + $0x198] sm:$0xff]  ;;  %v1843_v50 = vld [vmem:[#allocation23 + $0x48] sm:$0xff] }
 0x63e   :  { %v3834_v40 = vpack.c.bf16 %v1864_v38, %v1860_v37  ;;  %v1945_v37 = vld [vmem:[#allocation23 + $0x378] sm:$0xff]  ;;  %v1847_v51 = vld [vmem:[#allocation23 + $0x68] sm:$0xff] }
 0x63f   :  { %1643 = vst.msk [vmem:[#allocation29] sm:$0x3] %vm1635_vm3, %v1634_v55  ;;  %3176 = vmatmul.mubr.msk.f32.vlgmr.msra.gmra.mrb[4].mxu1 %vm1655_vm4, %v1634_v55 }
 0x640   :  { %3743 = vmatpush1.bf16.msra.mxu1 %v3742_v54  ;;  %1825 = vmatprep.mubr.f32.mxu1 %v4822_v17  ;;  %v1836_v17 = vld [vmem:[#allocation23 + $0x10] sm:$0xff]  ;;  %v1889_v54 = vld [vmem:[#allocation23 + $0x1b8] sm:$0xff] }
 0x641   :  { %3745 = vmatprep.subr.bf16.mxu1 %v3744_v56  ;;  %v3822_v19 = vpack.c.bf16 %v1840_v18, %v1836_v17  ;;  %v3844_v55 = vpack.c.bf16 %v1889_v54, %v1885_v25  ;;  %v1884_v56 = vld [vmem:[#allocation23 + $0x190] sm:$0xff]  ;;  %v1921_v17 = vld [vmem:[#allocation23 + $0x2b8] sm:$0xff]  ;;  %v3758_v54 = vpack.c.bf16 %v1838_v48, %v1834_v47  ;;  %v1906_v47 = vld [vmem:[#allocation23 + $0x240] sm:$0xff] }
 0x642   :  { %v3846_v58 = vpack.c.bf16 %v1888_v57, %v1884_v56  ;;  %v3860_v18 = vpack.c.bf16 %v1921_v17, %v1917_v15  ;;  %v3760_v56 = vpack.c.bf16 %v1847_v51, %v1843_v50  ;;  %v1842_v57 = vld [vmem:[#allocation23 + $0x40] sm:$0xff]  ;;  %v1875_v15 = vld [vmem:[#allocation23 + $0x148] sm:$0xff] }
 0x643   :  { %3823 = vmatpush1.bf16.msra.mxu0 %v3822_v19  ;;  %v1916_v19 = vld [vmem:[#allocation23 + $0x290] sm:$0xff]  ;;  %v1879_v17 = vld [vmem:[#allocation23 + $0x168] sm:$0xff]  ;;  %v1910_v48 = vld [vmem:[#allocation23 + $0x260] sm:$0xff] }
 0x644   :  { %3747 = vmatpush1.bf16.msra.mxu1 %v3746_v60  ;;  %3825 = vmatprep.subr.bf16.mxu0 %v3824_v23  ;;  %v3848_v60 = vpack.c.bf16 %v1897_v39, %v1893_v59  ;;  %v3862_v21 = vpack.c.bf16 %v1920_v20, %v1916_v19  ;;  %v1925_v23 = vld [vmem:[#allocation23 + $0x2d8] sm:$0xff]  ;;  %v1851_v59 = vld [vmem:[#allocation23 + $0x88] sm:$0xff]  ;;  %v3776_v19 = vpack.c.bf16 %v1879_v17, %v1875_v15  ;;  %v1874_v20 = vld [vmem:[#allocation23 + $0x140] sm:$0xff] }
 0x645   :  { %3749 = vmatprep.subr.bf16.mxu1 %v3748_v62  ;;  %v1892_v62 = vld [vmem:[#allocation23 + $0x1d0] sm:$0xff]  ;;  %v3864_v26 = vpack.c.bf16 %v1929_v24, %v1925_v23  ;;  %v1855_v39 = vld [vmem:[#allocation23 + $0xa8] sm:$0xff]  ;;  %v3794_v51 = vpack.c.bf16 %v1910_v48, %v1906_v47  ;;  %v1946_v15 = vld [vmem:[#allocation23 + $0x380] sm:$0xff] }
 0x646   :  { %v3850_v0 = vpack.c.bf16 %v1896_v63, %v1892_v62  ;;  %v3764_v62 = vpack.c.bf16 %v1855_v39, %v1851_v59  ;;  %v1850_v63 = vld [vmem:[#allocation23 + $0x80] sm:$0xff]  ;;  %v1883_v23 = vld [vmem:[#allocation23 + $0x188] sm:$0xff]  ;;  %v2136_v48 = vld [vmem:[#allocation26 + $0x30] sm:$0xff] }
 0x647   :  { %3827 = vmatpush1.bf16.msra.mxu0 %v3826_v27  ;;  %v1924_v27 = vld [vmem:[#allocation23 + $0x2d0] sm:$0xff]  ;;  %v1887_v24 = vld [vmem:[#allocation23 + $0x1a8] sm:$0xff]  ;;  %v1922_v59 = vld [vmem:[#allocation23 + $0x2c0] sm:$0xff] }
 0x648   :  { %3751 = vmatpush1.bf16.msra.mxu1 %v3750_v22  ;;  %3829 = vmatprep.subr.bf16.mxu0 %v3828_v30  ;;  %v1901_v22 = vld [vmem:[#allocation23 + $0x218] sm:$0xff]  ;;  %v3866_v29 = vpack.c.bf16 %v1928_v28, %v1924_v27  ;;  %v3780_v27 = vpack.c.bf16 %v1887_v24, %v1883_v23  ;;  %v1882_v28 = vld [vmem:[#allocation23 + $0x180] sm:$0xff]  ;;  %v1919_v50 = vld [vmem:[#allocation23 + $0x2a8] sm:$0xff] }
 0x649   :  { %3753 = vmatprep.subr.bf16.mxu1 %v3752_v7  ;;  %v3852_v2 = vpack.c.bf16 %v1905_v1, %v1901_v22  ;;  %v1900_v7 = vld [vmem:[#allocation23 + $0x210] sm:$0xff]  ;;  %v1933_v30 = vld [vmem:[#allocation23 + $0x318] sm:$0xff]  ;;  %v1859_v22 = vld [vmem:[#allocation23 + $0xc8] sm:$0xff] }
 0x64a   :  { %v3854_v4 = vpack.c.bf16 %v1904_v3, %v1900_v7  ;;  %v3868_v32 = vpack.c.bf16 %v1937_v31, %v1933_v30  ;;  %v1863_v1 = vld [vmem:[#allocation23 + $0xe8] sm:$0xff]  ;;  %v1858_v3 = vld [vmem:[#allocation23 + $0xc0] sm:$0xff] }
 0x64b   :  { %3831 = vmatpush1.bf16.msra.mxu0 %v3830_v33  ;;  %v1932_v33 = vld [vmem:[#allocation23 + $0x310] sm:$0xff]  ;;  %v3768_v7 = vpack.c.bf16 %v1863_v1, %v1859_v22  ;;  %v1891_v30 = vld [vmem:[#allocation23 + $0x1c8] sm:$0xff]  ;;  %v1926_v39 = vld [vmem:[#allocation23 + $0x2e0] sm:$0xff] }
 0x64c   :  { %3755 = vmatpush1.bf16.msra.mxu1 %v3754_v5  ;;  %3833 = vmatprep.subr.bf16.mxu0 %v3832_v36  ;;  %v1909_v5 = vld [vmem:[#allocation23 + $0x258] sm:$0xff]  ;;  %v3870_v35 = vpack.c.bf16 %v1936_v34, %v1932_v33  ;;  %v1895_v31 = vld [vmem:[#allocation23 + $0x1e8] sm:$0xff]  ;;  %v1890_v34 = vld [vmem:[#allocation23 + $0x1c0] sm:$0xff] }
 0x64d   :  { %3757 = vmatprep.subr.bf16.mxu1 %v3756_v13  ;;  %v3856_v10 = vpack.c.bf16 %v1913_v16, %v1909_v5  ;;  %v1912_v13 = vld [vmem:[#allocation23 + $0x270] sm:$0xff]  ;;  %v1941_v36 = vld [vmem:[#allocation23 + $0x358] sm:$0xff]  ;;  %v1867_v5 = vld [vmem:[#allocation23 + $0x108] sm:$0xff]  ;;  %v3784_v33 = vpack.c.bf16 %v1895_v31, %v1891_v30 }
 0x64e   :  { %v3858_v14 = vpack.c.bf16 %v1912_v13, %v1908_v12  ;;  %v3872_v38 = vpack.c.bf16 %v1945_v37, %v1941_v36  ;;  %v1871_v16 = vld [vmem:[#allocation23 + $0x128] sm:$0xff]  ;;  %v1866_v13 = vld [vmem:[#allocation23 + $0x100] sm:$0xff] }
 0x64f   :  { %3835 = vmatpush1.bf16.msra.mxu0 %v3834_v40  ;;  %v1940_v40 = vld [vmem:[#allocation23 + $0x350] sm:$0xff]  ;;  %v3772_v12 = vpack.c.bf16 %v1871_v16, %v1867_v5  ;;  %v1899_v36 = vld [vmem:[#allocation23 + $0x208] sm:$0xff]  ;;  %v1930_v22 = vld [vmem:[#allocation23 + $0x300] sm:$0xff] }
 0x650   :  { %3837 = vmatprep.subr.bf16.mxu0 %v3836_v43  ;;  %v3874_v42 = vpack.c.bf16 %v1944_v41, %v1940_v40  ;;  %v1949_v43 = vld [vmem:[#allocation23 + $0x398] sm:$0xff]  ;;  %v1903_v37 = vld [vmem:[#allocation23 + $0x228] sm:$0xff]  ;;  %v1898_v41 = vld [vmem:[#allocation23 + $0x200] sm:$0xff] }
 0x651   :  { %v3876_v45 = vpack.c.bf16 %v1953_v44, %v1949_v43  ;;  %v3788_v40 = vpack.c.bf16 %v1903_v37, %v1899_v36  ;;  %v1907_v43 = vld [vmem:[#allocation23 + $0x248] sm:$0xff]  ;;  %v1934_v1 = vld [vmem:[#allocation23 + $0x320] sm:$0xff] }
 0x652   :  { %v1911_v44 = vld [vmem:[#allocation23 + $0x268] sm:$0xff]  ;;  %v1938_v5 = vld [vmem:[#allocation23 + $0x340] sm:$0xff] }
 0x653   :  { %3839 = vmatpush1.bf16.msra.mxu0 %v3838_v46  ;;  %v3095_v46 = vld [vmem:[#allocation18] ss:$0 sm:$0xff]  ;;  %v1942_v16 = vld [vmem:[#allocation23 + $0x360] sm:$0xff]  ;;  %v1955_v23 = vld [vmem:[#allocation23 + $0x3c8] sm:$0xff] }
 0x654   :  { %3841 = vmatprep.subr.bf16.mxu0 %v3840_v49  ;;  %v1950_v17 = vld [vmem:[#allocation23 + $0x3a0] sm:$0xff]  ;;  %v1959_v24 = vld [vmem:[#allocation23 + $0x3e8] sm:$0xff] }
 0x655   :  { %v1958_v30 = vld [vmem:[#allocation23 + $0x3e0] sm:$0xff]  ;;  %v2131_v36 = vld [vmem:[#allocation26 + $0x8] sm:$0xff] }
 0x656   :  { %v2137_v37 = vld [vmem:[#allocation26 + $0x38] sm:$0xff]  ;;  %v2130_v47 = vld [vmem:[#allocation26] sm:$0xff] }
 0x657   :  { %3843 = vmatpush1.bf16.msra.mxu0 %v3842_v52 }
 0x658   :  { %3845 = vmatprep.subr.bf16.mxu0 %v3844_v55 }
 0x65b   :  { %3847 = vmatpush1.bf16.msra.mxu0 %v3846_v58  ;;  %v1846_v58 = vld [vmem:[#allocation23 + $0x60] sm:$0xff] }
 0x65c   :  { %3849 = vmatprep.subr.bf16.mxu0 %v3848_v60  ;;  %v3762_v60 = vpack.c.bf16 %v1846_v58, %v1842_v57 }
 0x65f   :  { %3851 = vmatpush1.bf16.msra.mxu0 %v3850_v0  ;;  %v1854_v0 = vld [vmem:[#allocation23 + $0xa0] sm:$0xff] }
 0x660   :  { %3853 = vmatprep.subr.bf16.mxu0 %v3852_v2  ;;  %v3766_v2 = vpack.c.bf16 %v1854_v0, %v1850_v63  ;;  %v3802_v63 = vpack.c.bf16 %v1926_v39, %v1922_v59  ;;  %v3886_v59 = vpack.c.bf16 %v2136_v48, %v2130_v47  ;;  %v2197_v47 = vld [vmem:[#allocation26 + $0x218] sm:$0xff] }
 0x661   :  { %v2193_v48 = vld [vmem:[#allocation26 + $0x1f8] sm:$0xff] }
 0x663   :  { %3855 = vmatpush1.bf16.msra.mxu0 %v3854_v4  ;;  %v1862_v4 = vld [vmem:[#allocation23 + $0xe0] sm:$0xff] }
 0x664   :  { %3857 = vmatprep.subr.bf16.mxu0 %v3856_v10  ;;  %v3770_v10 = vpack.c.bf16 %v1862_v4, %v1858_v3  ;;  %v3806_v3 = vpack.c.bf16 %v1934_v1, %v1930_v22  ;;  %v2144_v1 = vld [vmem:[#allocation26 + $0x70] sm:$0xff] }
 0x667   :  { %3859 = vmatpush1.bf16.msra.mxu0 %v3858_v14  ;;  %v1870_v14 = vld [vmem:[#allocation23 + $0x120] sm:$0xff] }
 0x668   :  { %3861 = vmatprep.subr.bf16.mxu0 %v3860_v18  ;;  %v3774_v18 = vpack.c.bf16 %v1870_v14, %v1866_v13  ;;  %v3810_v13 = vpack.c.bf16 %v1942_v16, %v1938_v5  ;;  %v2163_v5 = vld [vmem:[#allocation26 + $0x108] sm:$0xff] }
 0x66b   :  { %3863 = vmatpush1.bf16.msra.mxu0 %v3862_v21  ;;  %v1878_v21 = vld [vmem:[#allocation23 + $0x160] sm:$0xff] }
 0x66c   :  { %3865 = vmatprep.subr.bf16.mxu0 %v3864_v26  ;;  %v3778_v26 = vpack.c.bf16 %v1878_v21, %v1874_v20  ;;  %v1952_v20 = vld [vmem:[#allocation23 + $0x3b0] sm:$0xff] }
 0x66f   :  { %3867 = vmatpush1.bf16.msra.mxu0 %v3866_v29  ;;  %v1886_v29 = vld [vmem:[#allocation23 + $0x1a0] sm:$0xff] }
 0x670   :  { %3869 = vmatprep.subr.bf16.mxu0 %v3868_v32  ;;  %v3782_v32 = vpack.c.bf16 %v1886_v29, %v1882_v28  ;;  %v1961_v28 = vld [vmem:[#allocation23 + $0x3f8] sm:$0xff]  ;;  %v1954_v29 = vld [vmem:[#allocation23 + $0x3c0] sm:$0xff] }
 0x673   :  { %3871 = vmatpush1.bf16.msra.mxu0 %v3870_v35  ;;  %v1894_v35 = vld [vmem:[#allocation23 + $0x1e0] sm:$0xff] }
 0x674   :  { %3873 = vmatprep.subr.bf16.mxu0 %v3872_v38  ;;  %v3786_v38 = vpack.c.bf16 %v1894_v35, %v1890_v34  ;;  %v1960_v34 = vld [vmem:[#allocation23 + $0x3f0] sm:$0xff] }
 0x677   :  { %3875 = vmatpush1.bf16.msra.mxu0 %v3874_v42  ;;  %v1902_v42 = vld [vmem:[#allocation23 + $0x220] sm:$0xff] }
 0x678   :  { %3877 = vmatprep.subr.bf16.mxu0 %v3876_v45  ;;  %v3790_v45 = vpack.c.bf16 %v1902_v42, %v1898_v41  ;;  %v2139_v41 = vld [vmem:[#allocation26 + $0x48] sm:$0xff] }
 0x712   :  { %v1725_v49 = vpop.f32.mrb[4].mxu1 }
 0x713   :  { %v1726_v52 = vadd.f32 %v3095_v46, %v1725_v49  ;;  %v3177_v25 = vpop.f32.mrb[5].mxu1  ;;  %v3792_v46 = vpack.c.bf16 %v1911_v44, %v1907_v43  ;;  %v1915_v49 = vld [vmem:[#allocation23 + $0x288] sm:$0xff]  ;;  %v1746_v43 = vld [vmem:[#allocation21] sm:$0x3] }
 0x714   :  { %v1914_v25 = vld [vmem:[#allocation23 + $0x280] sm:$0xff]  ;;  %v1751_v44 = vrot.slane %v1746_v43, %v5178_v6 }
 0x715   :  { %v1729_v55 = vmax.f32 %v1726_v52, 0.0  ;;  %v3796_v52 = vpack.c.bf16 %v1919_v50, %v1915_v49 }
 0x717   :  { %3097 = vmatmul.mubr.msk.f32.vlgmr.msra.gmra.mrb[6].mxu1 %vm1544_vm1, %v1729_v55  ;;  %v1923_v55 = vld [vmem:[#allocation23 + $0x2c8] sm:$0xff] }
 0x718   :  { %3759 = vmatpush1.bf16.msra.mxu1 %v3758_v54  ;;  %v1918_v54 = vld [vmem:[#allocation23 + $0x2a0] sm:$0xff] }
 0x719   :  { %3761 = vmatprep.subr.bf16.mxu1 %v3760_v56  ;;  %v1927_v56 = vld [vmem:[#allocation23 + $0x2e8] sm:$0xff]  ;;  %v3798_v57 = vpack.c.bf16 %v1918_v54, %v1914_v25 }
 0x71a   :  { %v3800_v58 = vpack.c.bf16 %v1927_v56, %v1923_v55  ;;  %v2143_v25 = vld [vmem:[#allocation26 + $0x68] sm:$0xff]  ;;  %v2149_v55 = vld [vmem:[#allocation26 + $0x98] sm:$0xff] }
 0x71b   :  { %v2145_v56 = vld [vmem:[#allocation26 + $0x78] sm:$0xff] }
 0x71c   :  { %3763 = vmatpush1.bf16.msra.mxu1 %v3762_v60  ;;  %v1931_v60 = vld [vmem:[#allocation23 + $0x308] sm:$0xff] }
 0x71d   :  { %3765 = vmatprep.subr.bf16.mxu1 %v3764_v62  ;;  %v1935_v62 = vld [vmem:[#allocation23 + $0x328] sm:$0xff] }
 0x71e   :  { %v3804_v0 = vpack.c.bf16 %v1935_v62, %v1931_v60  ;;  %v2142_v60 = vld [vmem:[#allocation26 + $0x60] sm:$0xff]  ;;  %v2148_v62 = vld [vmem:[#allocation26 + $0x90] sm:$0xff] }
 0x71f   :  { %v3890_v16 = vpack.c.bf16 %v2148_v62, %v2142_v60  ;;  %v2211_v60 = vld [vmem:[#allocation26 + $0x288] sm:$0xff] }
 0x720   :  { %3767 = vmatpush1.bf16.msra.mxu1 %v3766_v2  ;;  %v1939_v2 = vld [vmem:[#allocation23 + $0x348] sm:$0xff] }
 0x721   :  { %3769 = vmatprep.subr.bf16.mxu1 %v3768_v7  ;;  %v1943_v7 = vld [vmem:[#allocation23 + $0x368] sm:$0xff] }
 0x722   :  { %v3808_v4 = vpack.c.bf16 %v1943_v7, %v1939_v2  ;;  %v2150_v2 = vld [vmem:[#allocation26 + $0xa0] sm:$0xff]  ;;  %v2155_v7 = vld [vmem:[#allocation26 + $0xc8] sm:$0xff] }
 0x724   :  { %3771 = vmatpush1.bf16.msra.mxu1 %v3770_v10  ;;  %v1947_v10 = vld [vmem:[#allocation23 + $0x388] sm:$0xff] }
 0x725   :  { %3773 = vmatprep.subr.bf16.mxu1 %v3772_v12  ;;  %v1951_v12 = vld [vmem:[#allocation23 + $0x3a8] sm:$0xff] }
 0x726   :  { %v3812_v14 = vpack.c.bf16 %v1951_v12, %v1947_v10  ;;  %v4018_v10 = vpack.c.bf16 %v2150_v2, %v2144_v1  ;;  %v2154_v12 = vld [vmem:[#allocation26 + $0xc0] sm:$0xff] }
 0x728   :  { %3775 = vmatpush1.bf16.msra.mxu1 %v3774_v18  ;;  %v1948_v18 = vld [vmem:[#allocation23 + $0x390] sm:$0xff] }
 0x729   :  { %3777 = vmatprep.subr.bf16.mxu1 %v3776_v19  ;;  %v3814_v19 = vpack.c.bf16 %v1950_v17, %v1946_v15  ;;  %v3878_v21 = vpack.c.bf16 %v1952_v20, %v1948_v18  ;;  %v2156_v17 = vld [vmem:[#allocation26 + $0xd0] sm:$0xff]  ;;  %v2162_v18 = vld [vmem:[#allocation26 + $0x100] sm:$0xff]  ;;  %v2173_v20 = vld [vmem:[#allocation26 + $0x158] sm:$0xff] }
 0x72b   :  { %3879 = vmatpush1.bf16.msra.mxu0 %v3878_v21  ;;  %v2169_v21 = vld [vmem:[#allocation26 + $0x138] sm:$0xff] }
 0x72c   :  { %3779 = vmatpush1.bf16.msra.mxu1 %v3778_v26  ;;  %v1957_v26 = vld [vmem:[#allocation23 + $0x3d8] sm:$0xff] }
 0x72d   :  { %3781 = vmatprep.subr.bf16.mxu1 %v3780_v27  ;;  %v3816_v27 = vpack.c.bf16 %v1959_v24, %v1955_v23  ;;  %v3880_v31 = vpack.c.bf16 %v1961_v28, %v1957_v26  ;;  %v2175_v23 = vld [vmem:[#allocation26 + $0x168] sm:$0xff]  ;;  %v4022_v26 = vpack.c.bf16 %v2162_v18, %v2156_v17  ;;  %v2172_v28 = vld [vmem:[#allocation26 + $0x150] sm:$0xff] }
 0x72f   :  { %3881 = vmatprep.subr.bf16.mxu0 %v3880_v31  ;;  %v2168_v31 = vld [vmem:[#allocation26 + $0x130] sm:$0xff] }
 0x730   :  { %3783 = vmatpush1.bf16.msra.mxu1 %v3782_v32  ;;  %v3818_v32 = vpack.c.bf16 %v1958_v30, %v1954_v29  ;;  %v4024_v30 = vpack.c.bf16 %v2175_v23, %v2169_v21  ;;  %v2227_v21 = vld [vmem:[#allocation26 + $0x308] sm:$0xff]  ;;  %v2233_v23 = vld [vmem:[#allocation26 + $0x338] sm:$0xff] }
 0x731   :  { %3785 = vmatprep.subr.bf16.mxu1 %v3784_v33  ;;  %v1956_v33 = vld [vmem:[#allocation23 + $0x3d0] sm:$0xff] }
 0x732   :  { %v3882_v35 = vpack.c.bf16 %v1960_v34, %v1956_v33  ;;  %v2179_v33 = vld [vmem:[#allocation26 + $0x188] sm:$0xff]  ;;  %v2185_v34 = vld [vmem:[#allocation26 + $0x1b8] sm:$0xff] }
 0x734   :  { %3787 = vmatpush1.bf16.msra.mxu1 %v3786_v38  ;;  %3883 = vmatpush1.bf16.msra.mxu0 %v3882_v35  ;;  %v2133_v38 = vld [vmem:[#allocation26 + $0x18] sm:$0xff] }
 0x735   :  { %3789 = vmatprep.subr.bf16.mxu1 %v3788_v40  ;;  %v3884_v40 = vpack.c.bf16 %v2137_v37, %v2131_v36  ;;  %v4012_v42 = vpack.c.bf16 %v2139_v41, %v2133_v38  ;;  %v2181_v35 = vld [vmem:[#allocation26 + $0x198] sm:$0xff]  ;;  %v2187_v36 = vld [vmem:[#allocation26 + $0x1c8] sm:$0xff]  ;;  %v2184_v41 = vld [vmem:[#allocation26 + $0x1b0] sm:$0xff] }
 0x737   :  { %4013 = vmatprep.subr.bf16.mxu0 %v4012_v42  ;;  %v3900_v42 = vpack.c.bf16 %v2185_v34, %v2179_v33  ;;  %v2228_v33 = vld [vmem:[#allocation26 + $0x310] sm:$0xff]  ;;  %v2234_v34 = vld [vmem:[#allocation26 + $0x340] sm:$0xff] }
 0x738   :  { %3791 = vmatpush1.bf16.msra.mxu1 %v3790_v45  ;;  %v1755_v45 = vrot.slane %v1746_v43, %v5183_v8  ;;  %v4028_v43 = vpack.c.bf16 %v2187_v36, %v2181_v35  ;;  %v2239_v35 = vld [vmem:[#allocation26 + $0x368] sm:$0xff]  ;;  %v2245_v36 = vld [vmem:[#allocation26 + $0x398] sm:$0xff] }
 0x739   :  { %3793 = vmatprep.subr.bf16.mxu1 %v3792_v46 }
 0x73c   :  { %3795 = vmatpush1.bf16.msra.mxu1 %v3794_v51  ;;  %v2132_v51 = vld [vmem:[#allocation26 + $0x10] sm:$0xff] }
 0x73d   :  { %3797 = vmatprep.subr.bf16.mxu1 %v3796_v52  ;;  %v2138_v52 = vld [vmem:[#allocation26 + $0x40] sm:$0xff] }
 0x73e   :  { %v4014_v39 = vpack.c.bf16 %v2138_v52, %v2132_v51  ;;  %v2190_v52 = vld [vmem:[#allocation26 + $0x1e0] sm:$0xff] }
 0x740   :  { %3799 = vmatpush1.bf16.msra.mxu1 %v3798_v57  ;;  %v2151_v57 = vld [vmem:[#allocation26 + $0xa8] sm:$0xff] }
 0x741   :  { %3801 = vmatprep.subr.bf16.mxu1 %v3800_v58  ;;  %v4016_v22 = vpack.c.bf16 %v2151_v57, %v2145_v56  ;;  %v2192_v56 = vld [vmem:[#allocation26 + $0x1f0] sm:$0xff]  ;;  %v2198_v57 = vld [vmem:[#allocation26 + $0x220] sm:$0xff] }
 0x744   :  { %3803 = vmatpush1.bf16.msra.mxu1 %v3802_v63 }
 0x745   :  { %3805 = vmatprep.subr.bf16.mxu1 %v3804_v0  ;;  %v3888_v0 = vpack.c.bf16 %v2149_v55, %v2143_v25  ;;  %v2196_v25 = vld [vmem:[#allocation26 + $0x210] sm:$0xff] }
 0x746   :  { %v3906_v62 = vpack.c.bf16 %v2196_v25, %v2190_v52 }
 0x748   :  { %3807 = vmatpush1.bf16.msra.mxu1 %v3806_v3  ;;  %v2161_v3 = vld [vmem:[#allocation26 + $0xf8] sm:$0xff] }
 0x749   :  { %3809 = vmatprep.subr.bf16.mxu1 %v3808_v4  ;;  %v2157_v4 = vld [vmem:[#allocation26 + $0xd8] sm:$0xff] }
 0x74a   :  { %v4020_v15 = vpack.c.bf16 %v2163_v5, %v2157_v4  ;;  %v2215_v4 = vld [vmem:[#allocation26 + $0x2a8] sm:$0xff]  ;;  %v2221_v5 = vld [vmem:[#allocation26 + $0x2d8] sm:$0xff] }
 0x74b   :  { %v3912_v17 = vpack.c.bf16 %v2221_v5, %v2215_v4  ;;  %v2264_v4 = vld [vmem:[#allocation26 + $0x430] sm:$0xff]  ;;  %v2270_v5 = vld [vmem:[#allocation26 + $0x460] sm:$0xff] }
 0x74c   :  { %3811 = vmatpush1.bf16.msra.mxu1 %v3810_v13  ;;  %v2160_v13 = vld [vmem:[#allocation26 + $0xf0] sm:$0xff] }
 0x74d   :  { %3813 = vmatprep.subr.bf16.mxu1 %v3812_v14  ;;  %v3892_v14 = vpack.c.bf16 %v2161_v3, %v2155_v7  ;;  %v3894_v24 = vpack.c.bf16 %v2160_v13, %v2154_v12  ;;  %v2204_v7 = vld [vmem:[#allocation26 + $0x250] sm:$0xff]  ;;  %v2210_v3 = vld [vmem:[#allocation26 + $0x280] sm:$0xff] }
 0x74e   :  { %v4038_v13 = vpack.c.bf16 %v2210_v3, %v2204_v7 }
 0x750   :  { %3815 = vmatpush1.bf16.msra.mxu1 %v3814_v19  ;;  %v2167_v19 = vld [vmem:[#allocation26 + $0x128] sm:$0xff] }
 0x751   :  { %3817 = vmatprep.subr.bf16.mxu1 %v3816_v27  ;;  %v2166_v27 = vld [vmem:[#allocation26 + $0x120] sm:$0xff]  ;;  %v3896_v29 = vpack.c.bf16 %v2173_v20, %v2167_v19  ;;  %v2216_v19 = vld [vmem:[#allocation26 + $0x2b0] sm:$0xff] }
 0x752   :  { %v3898_v37 = vpack.c.bf16 %v2172_v28, %v2166_v27  ;;  %v2222_v20 = vld [vmem:[#allocation26 + $0x2e0] sm:$0xff] }
 0x753   :  { %v4042_v28 = vpack.c.bf16 %v2222_v20, %v2216_v19 }
 0x754   :  { %3819 = vmatpush1.bf16.msra.mxu1 %v3818_v32  ;;  %v2174_v32 = vld [vmem:[#allocation26 + $0x160] sm:$0xff] }
 0x755   :  { %3885 = vmatprep.subr.bf16.mxu1 %v3884_v40  ;;  %v4026_v38 = vpack.c.bf16 %v2174_v32, %v2168_v31  ;;  %v2178_v40 = vld [vmem:[#allocation26 + $0x180] sm:$0xff]  ;;  %v3916_v31 = vpack.c.bf16 %v2233_v23, %v2227_v21  ;;  %v2276_v21 = vld [vmem:[#allocation26 + $0x490] sm:$0xff] }
 0x756   :  { %v2282_v23 = vld [vmem:[#allocation26 + $0x4c0] sm:$0xff] }
 0x7ea   :  { %v1827_v46 = vpop.f32.mrb[6].mxu1 }
 0x7eb   :  { %v1828_v49 = vadd.f32 %v1827_v46, %v1751_v44  ;;  %v1829_v50 = vpop.f32.mrb[7].mxu1  ;;  %v2180_v44 = vld [vmem:[#allocation26 + $0x190] sm:$0xff]  ;;  %v2191_v46 = vld [vmem:[#allocation26 + $0x1e8] sm:$0xff] }
 0x7ec   :  { %v1830_v54 = vadd.f32 %v1829_v50, %v1755_v45  ;;  %v2186_v45 = vld [vmem:[#allocation26 + $0x1c0] sm:$0xff]  ;;  %v3902_v50 = vpack.c.bf16 %v2184_v41, %v2178_v40  ;;  %v4046_v41 = vpack.c.bf16 %v2234_v34, %v2228_v33 }
 0x7ed   :  { %v1832_v63 = vmax.f32 %v1828_v49, 0.0  ;;  %v2199_v49 = vld [vmem:[#allocation26 + $0x228] sm:$0xff]  ;;  %v4030_v51 = vpack.c.bf16 %v2186_v45, %v2180_v44  ;;  %v3920_v44 = vpack.c.bf16 %v2245_v36, %v2239_v35  ;;  %v2288_v35 = vld [vmem:[#allocation26 + $0x4f0] sm:$0xff]  ;;  %v2294_v36 = vld [vmem:[#allocation26 + $0x520] sm:$0xff] }
 0x7ee   :  { %v1833_v58 = vmax.f32 %v1830_v54, 0.0  ;;  %v3904_v54 = vpack.c.bf16 %v2197_v47, %v2191_v46  ;;  %v4032_v55 = vpack.c.bf16 %v2199_v49, %v2193_v48  ;;  %v2240_v46 = vld [vmem:[#allocation26 + $0x370] sm:$0xff]  ;;  %v2246_v47 = vld [vmem:[#allocation26 + $0x3a0] sm:$0xff]  ;;  %v2251_v48 = vld [vmem:[#allocation26 + $0x3c8] sm:$0xff] }
 0x7ef   :  { %v2257_v49 = vld [vmem:[#allocation26 + $0x3f8] sm:$0xff]  ;;  %v4050_v25 = vpack.c.bf16 %v2246_v47, %v2240_v46  ;;  %v2304_v47 = vld [vmem:[#allocation26 + $0x570] sm:$0xff] }
 0x7f0   :  { %2048 = vmatprep.mubr.f32.mxu1 %v1833_v58  ;;  %2119 = vmatprep.mubr.f32.mxu0 %v1833_v58  ;;  %v2203_v58 = vld [vmem:[#allocation26 + $0x248] sm:$0xff] }
 0x7f1   :  { %2049 = vmatmul.mubr.f32.vlgmr.msra.gmra.mrb[8].mxu1 %v1832_v63  ;;  %2120 = vmatmul.mubr.f32.vlgmr.msra.gmra.mrb[6].mxu0 %v1832_v63  ;;  %v4034_v63 = vpack.c.bf16 %v2198_v57, %v2192_v56  ;;  %v3924_v56 = vpack.c.bf16 %v2257_v49, %v2251_v48  ;;  %v2300_v48 = vld [vmem:[#allocation26 + $0x550] sm:$0xff]  ;;  %v2306_v49 = vld [vmem:[#allocation26 + $0x580] sm:$0xff] }
 0x7f2   :  { %3887 = vmatpush1.bf16.msra.mxu1 %v3886_v59  ;;  %4015 = vmatpush1.bf16.msra.mxu0 %v4014_v39  ;;  %v2209_v59 = vld [vmem:[#allocation26 + $0x278] sm:$0xff] }
 0x7f3   :  { %3889 = vmatprep.subr.bf16.mxu1 %v3888_v0  ;;  %4017 = vmatprep.subr.bf16.mxu0 %v4016_v22  ;;  %v2205_v39 = vld [vmem:[#allocation26 + $0x258] sm:$0xff]  ;;  %v2202_v0 = vld [vmem:[#allocation26 + $0x240] sm:$0xff]  ;;  %v2208_v22 = vld [vmem:[#allocation26 + $0x270] sm:$0xff]  ;;  %v3908_v1 = vpack.c.bf16 %v2209_v59, %v2203_v58 }
 0x7f4   :  { %v4036_v2 = vpack.c.bf16 %v2211_v60, %v2205_v39  ;;  %v3910_v12 = vpack.c.bf16 %v2208_v22, %v2202_v0  ;;  %v2252_v58 = vld [vmem:[#allocation26 + $0x3d0] sm:$0xff]  ;;  %v2258_v59 = vld [vmem:[#allocation26 + $0x400] sm:$0xff]  ;;  %v2263_v39 = vld [vmem:[#allocation26 + $0x428] sm:$0xff] }
 0x7f5   :  { %v2269_v60 = vld [vmem:[#allocation26 + $0x458] sm:$0xff]  ;;  %v4054_v22 = vpack.c.bf16 %v2258_v59, %v2252_v58  ;;  %v2316_v58 = vld [vmem:[#allocation26 + $0x5d0] sm:$0xff] }
 0x7f6   :  { %3891 = vmatpush1.bf16.msra.mxu1 %v3890_v16  ;;  %4019 = vmatpush1.bf16.msra.mxu0 %v4018_v10  ;;  %v2217_v16 = vld [vmem:[#allocation26 + $0x2b8] sm:$0xff]  ;;  %v2223_v10 = vld [vmem:[#allocation26 + $0x2e8] sm:$0xff]  ;;  %v3928_v7 = vpack.c.bf16 %v2269_v60, %v2263_v39  ;;  %v2312_v60 = vld [vmem:[#allocation26 + $0x5b0] sm:$0xff] }
 0x7f7   :  { %3893 = vmatprep.subr.bf16.mxu1 %v3892_v14  ;;  %4021 = vmatprep.subr.bf16.mxu0 %v4020_v15  ;;  %v2214_v14 = vld [vmem:[#allocation26 + $0x2a0] sm:$0xff]  ;;  %v2220_v15 = vld [vmem:[#allocation26 + $0x2d0] sm:$0xff]  ;;  %v4040_v18 = vpack.c.bf16 %v2223_v10, %v2217_v16  ;;  %v2275_v16 = vld [vmem:[#allocation26 + $0x488] sm:$0xff] }
 0x7f8   :  { %v3914_v27 = vpack.c.bf16 %v2220_v15, %v2214_v14  ;;  %v2281_v10 = vld [vmem:[#allocation26 + $0x4b8] sm:$0xff]  ;;  %v4058_v15 = vpack.c.bf16 %v2270_v5, %v2264_v4 }
 0x7f9   :  { %v3932_v19 = vpack.c.bf16 %v2281_v10, %v2275_v16  ;;  %v5311_v4 = vld [vmem:[#allocation24] sm:$0xf] }
 0x7fa   :  { %3895 = vmatpush1.bf16.msra.mxu1 %v3894_v24  ;;  %4023 = vmatpush1.bf16.msra.mxu0 %v4022_v26  ;;  %v2229_v24 = vld [vmem:[#allocation26 + $0x318] sm:$0xff]  ;;  %v2235_v26 = vld [vmem:[#allocation26 + $0x348] sm:$0xff]  ;;  %v1967_v5 = vrot.slane %v5311_v4, %v5178_v6  ;;  %v1971_v16 = vrot.slane %v5311_v4, %v5183_v8  ;;  %v1979_v10 = vrot.slane %v5311_v4, %v5186_v9 }
 0x7fb   :  { %3897 = vmatprep.subr.bf16.mxu1 %v3896_v29  ;;  %4025 = vmatprep.subr.bf16.mxu0 %v4024_v30  ;;  %v2226_v29 = vld [vmem:[#allocation26 + $0x300] sm:$0xff]  ;;  %v2232_v30 = vld [vmem:[#allocation26 + $0x330] sm:$0xff]  ;;  %v4044_v32 = vpack.c.bf16 %v2235_v26, %v2229_v24  ;;  %v2287_v24 = vld [vmem:[#allocation26 + $0x4e8] sm:$0xff] }
 0x7fc   :  { %v3918_v40 = vpack.c.bf16 %v2232_v30, %v2226_v29  ;;  %v2293_v26 = vld [vmem:[#allocation26 + $0x518] sm:$0xff]  ;;  %v4062_v30 = vpack.c.bf16 %v2282_v23, %v2276_v21  ;;  %v2330_v21 = vld [vmem:[#allocation26 + $0x640] sm:$0xff] }
 0x7fd   :  { %v3936_v33 = vpack.c.bf16 %v2293_v26, %v2287_v24  ;;  %v2335_v24 = vld [vmem:[#allocation26 + $0x668] sm:$0xff] }
 0x7fe   :  { %3899 = vmatpush1.bf16.msra.mxu1 %v3898_v37  ;;  %4027 = vmatpush1.bf16.msra.mxu0 %v4026_v38  ;;  %v2241_v37 = vld [vmem:[#allocation26 + $0x378] sm:$0xff]  ;;  %v2247_v38 = vld [vmem:[#allocation26 + $0x3a8] sm:$0xff] }
 0x7ff   :  { %3901 = vmatprep.subr.bf16.mxu1 %v3900_v42  ;;  %4029 = vmatprep.subr.bf16.mxu0 %v4028_v43  ;;  %v2238_v42 = vld [vmem:[#allocation26 + $0x360] sm:$0xff]  ;;  %v2244_v43 = vld [vmem:[#allocation26 + $0x390] sm:$0xff]  ;;  %v4048_v45 = vpack.c.bf16 %v2247_v38, %v2241_v37  ;;  %v2299_v37 = vld [vmem:[#allocation26 + $0x548] sm:$0xff] }
 0x800   :  { %v3922_v52 = vpack.c.bf16 %v2244_v43, %v2238_v42  ;;  %v2305_v38 = vld [vmem:[#allocation26 + $0x578] sm:$0xff]  ;;  %v4066_v43 = vpack.c.bf16 %v2294_v36, %v2288_v35  ;;  %v2336_v36 = vld [vmem:[#allocation26 + $0x670] sm:$0xff] }
 0x802   :  { %3903 = vmatpush1.bf16.msra.mxu1 %v3902_v50  ;;  %4031 = vmatpush1.bf16.msra.mxu0 %v4030_v51  ;;  %v2253_v50 = vld [vmem:[#allocation26 + $0x3d8] sm:$0xff]  ;;  %v2259_v51 = vld [vmem:[#allocation26 + $0x408] sm:$0xff] }
 0x803   :  { %3905 = vmatprep.subr.bf16.mxu1 %v3904_v54  ;;  %4033 = vmatprep.subr.bf16.mxu0 %v4032_v55  ;;  %v2250_v54 = vld [vmem:[#allocation26 + $0x3c0] sm:$0xff]  ;;  %v2256_v55 = vld [vmem:[#allocation26 + $0x3f0] sm:$0xff]  ;;  %v4052_v57 = vpack.c.bf16 %v2259_v51, %v2253_v50  ;;  %v4070_v51 = vpack.c.bf16 %v2306_v49, %v2300_v48 }
 0x804   :  { %v3926_v0 = vpack.c.bf16 %v2256_v55, %v2250_v54  ;;  %v2313_v54 = vld [vmem:[#allocation26 + $0x5b8] sm:$0xff]  ;;  %v2346_v48 = vld [vmem:[#allocation26 + $0x6c0] sm:$0xff]  ;;  %v2352_v49 = vld [vmem:[#allocation26 + $0x6f0] sm:$0xff] }
 0x806   :  { %3907 = vmatpush1.bf16.msra.mxu1 %v3906_v62  ;;  %4035 = vmatpush1.bf16.msra.mxu0 %v4034_v63  ;;  %v2265_v62 = vld [vmem:[#allocation26 + $0x438] sm:$0xff]  ;;  %v2271_v63 = vld [vmem:[#allocation26 + $0x468] sm:$0xff] }
 0x807   :  { %3909 = vmatprep.subr.bf16.mxu1 %v3908_v1  ;;  %4037 = vmatprep.subr.bf16.mxu0 %v4036_v2  ;;  %v2262_v1 = vld [vmem:[#allocation26 + $0x420] sm:$0xff]  ;;  %v2268_v2 = vld [vmem:[#allocation26 + $0x450] sm:$0xff]  ;;  %v4056_v3 = vpack.c.bf16 %v2271_v63, %v2265_v62 }
 0x808   :  { %v3930_v14 = vpack.c.bf16 %v2268_v2, %v2262_v1  ;;  %v2318_v62 = vld [vmem:[#allocation26 + $0x5e0] sm:$0xff]  ;;  %v2325_v1 = vld [vmem:[#allocation26 + $0x618] sm:$0xff] }
 0x809   :  { %v4074_v63 = vpack.c.bf16 %v2318_v62, %v2312_v60  ;;  %v2364_v60 = vld [vmem:[#allocation26 + $0x750] sm:$0xff] }
 0x80a   :  { %3911 = vmatpush1.bf16.msra.mxu1 %v3910_v12  ;;  %4039 = vmatpush1.bf16.msra.mxu0 %v4038_v13  ;;  %v2277_v12 = vld [vmem:[#allocation26 + $0x498] sm:$0xff]  ;;  %v2283_v13 = vld [vmem:[#allocation26 + $0x4c8] sm:$0xff] }
 0x80b   :  { %3913 = vmatprep.subr.bf16.mxu1 %v3912_v17  ;;  %4041 = vmatprep.subr.bf16.mxu0 %v4040_v18  ;;  %v2274_v17 = vld [vmem:[#allocation26 + $0x480] sm:$0xff]  ;;  %v2280_v18 = vld [vmem:[#allocation26 + $0x4b0] sm:$0xff]  ;;  %v4060_v20 = vpack.c.bf16 %v2283_v13, %v2277_v12 }
 0x80c   :  { %v3934_v29 = vpack.c.bf16 %v2280_v18, %v2274_v17 }
 0x80e   :  { %3915 = vmatpush1.bf16.msra.mxu1 %v3914_v27  ;;  %4043 = vmatpush1.bf16.msra.mxu0 %v4042_v28  ;;  %v2289_v27 = vld [vmem:[#allocation26 + $0x4f8] sm:$0xff]  ;;  %v2295_v28 = vld [vmem:[#allocation26 + $0x528] sm:$0xff] }
 0x80f   :  { %3917 = vmatprep.subr.bf16.mxu1 %v3916_v31  ;;  %4045 = vmatprep.subr.bf16.mxu0 %v4044_v32  ;;  %v2286_v31 = vld [vmem:[#allocation26 + $0x4e0] sm:$0xff]  ;;  %v2292_v32 = vld [vmem:[#allocation26 + $0x510] sm:$0xff]  ;;  %v4064_v34 = vpack.c.bf16 %v2295_v28, %v2289_v27  ;;  %v2341_v27 = vld [vmem:[#allocation26 + $0x698] sm:$0xff] }
 0x810   :  { %v3938_v42 = vpack.c.bf16 %v2292_v32, %v2286_v31  ;;  %v2337_v28 = vld [vmem:[#allocation26 + $0x678] sm:$0xff] }
 0x812   :  { %3919 = vmatpush1.bf16.msra.mxu1 %v3918_v40  ;;  %4047 = vmatpush1.bf16.msra.mxu0 %v4046_v41  ;;  %v2301_v40 = vld [vmem:[#allocation26 + $0x558] sm:$0xff]  ;;  %v2307_v41 = vld [vmem:[#allocation26 + $0x588] sm:$0xff] }
 0x813   :  { %3921 = vmatprep.subr.bf16.mxu1 %v3920_v44  ;;  %4049 = vmatprep.subr.bf16.mxu0 %v4048_v45  ;;  %v2298_v44 = vld [vmem:[#allocation26 + $0x540] sm:$0xff]  ;;  %v3940_v45 = vpack.c.bf16 %v2305_v38, %v2299_v37  ;;  %v4068_v46 = vpack.c.bf16 %v2307_v41, %v2301_v40  ;;  %v2347_v38 = vld [vmem:[#allocation26 + $0x6c8] sm:$0xff]  ;;  %v3952_v40 = vpack.c.bf16 %v2341_v27, %v2335_v24 }
 0x814   :  { %v3942_v50 = vpack.c.bf16 %v2304_v47, %v2298_v44  ;;  %v2342_v37 = vld [vmem:[#allocation26 + $0x6a0] sm:$0xff]  ;;  %v2355_v44 = vld [vmem:[#allocation26 + $0x708] sm:$0xff] }
 0x815   :  { %v4082_v47 = vpack.c.bf16 %v2342_v37, %v2336_v36  ;;  %v2382_v27 = vld [vmem:[#allocation26 + $0x7e0] sm:$0xff]  ;;  %v2401_v36 = vld [vmem:[#allocation26 + $0x878] sm:$0xff] }
 0x816   :  { %3923 = vmatpush1.bf16.msra.mxu1 %v3922_v52  ;;  %4051 = vmatpush1.bf16.msra.mxu0 %v4050_v25  ;;  %v2311_v52 = vld [vmem:[#allocation26 + $0x5a8] sm:$0xff]  ;;  %v2317_v25 = vld [vmem:[#allocation26 + $0x5d8] sm:$0xff] }
 0x817   :  { %3925 = vmatprep.subr.bf16.mxu1 %v3924_v56  ;;  %4053 = vmatprep.subr.bf16.mxu0 %v4052_v57  ;;  %v3944_v55 = vpack.c.bf16 %v2317_v25, %v2311_v52  ;;  %v2319_v56 = vld [vmem:[#allocation26 + $0x5e8] sm:$0xff]  ;;  %v2310_v57 = vld [vmem:[#allocation26 + $0x5a0] sm:$0xff]  ;;  %v2348_v52 = vld [vmem:[#allocation26 + $0x6d0] sm:$0xff] }
 0x818   :  { %v4072_v59 = vpack.c.bf16 %v2319_v56, %v2313_v54  ;;  %v3946_v39 = vpack.c.bf16 %v2316_v58, %v2310_v57  ;;  %v2354_v25 = vld [vmem:[#allocation26 + $0x700] sm:$0xff]  ;;  %v2359_v54 = vld [vmem:[#allocation26 + $0x728] sm:$0xff]  ;;  %v2361_v56 = vld [vmem:[#allocation26 + $0x738] sm:$0xff]  ;;  %v3958_v58 = vpack.c.bf16 %v2352_v49, %v2346_v48 }
 0x819   :  { %v2367_v57 = vld [vmem:[#allocation26 + $0x768] sm:$0xff]  ;;  %v2397_v37 = vld [vmem:[#allocation26 + $0x858] sm:$0xff]  ;;  %v2402_v48 = vld [vmem:[#allocation26 + $0x880] sm:$0xff] }
 0x81a   :  { %3927 = vmatpush1.bf16.msra.mxu1 %v3926_v0  ;;  %4055 = vmatpush1.bf16.msra.mxu0 %v4054_v22  ;;  %v2323_v0 = vld [vmem:[#allocation26 + $0x608] sm:$0xff]  ;;  %v2329_v22 = vld [vmem:[#allocation26 + $0x638] sm:$0xff] }
 0x81b   :  { %3929 = vmatprep.subr.bf16.mxu1 %v3928_v7  ;;  %4057 = vmatprep.subr.bf16.mxu0 %v4056_v3  ;;  %v3948_v2 = vpack.c.bf16 %v2329_v22, %v2323_v0  ;;  %v2331_v7 = vld [vmem:[#allocation26 + $0x648] sm:$0xff]  ;;  %v2360_v0 = vld [vmem:[#allocation26 + $0x730] sm:$0xff]  ;;  %v2366_v22 = vld [vmem:[#allocation26 + $0x760] sm:$0xff] }
 0x81c   :  { %v4076_v3 = vpack.c.bf16 %v2331_v7, %v2325_v1  ;;  %v2371_v1 = vld [vmem:[#allocation26 + $0x788] sm:$0xff]  ;;  %v2373_v7 = vld [vmem:[#allocation26 + $0x798] sm:$0xff] }
 0x81d   :  { %v2407_v49 = vld [vmem:[#allocation26 + $0x8a8] sm:$0xff] }
 0x81e   :  { %3931 = vmatpush1.bf16.msra.mxu1 %v3930_v14  ;;  %4059 = vmatpush1.bf16.msra.mxu0 %v4058_v15  ;;  %v2322_v14 = vld [vmem:[#allocation26 + $0x600] sm:$0xff] }
 0x81f   :  { %3933 = vmatprep.subr.bf16.mxu1 %v3932_v19  ;;  %4061 = vmatprep.subr.bf16.mxu0 %v4060_v20  ;;  %v2328_v19 = vld [vmem:[#allocation26 + $0x630] sm:$0xff] }
 0x820   :  { %v2324_v20 = vld [vmem:[#allocation26 + $0x610] sm:$0xff]  ;;  %v3950_v31 = vpack.c.bf16 %v2328_v19, %v2322_v14  ;;  %v2383_v19 = vld [vmem:[#allocation26 + $0x7e8] sm:$0xff] }
 0x821   :  { %v4078_v32 = vpack.c.bf16 %v2330_v21, %v2324_v20  ;;  %v2389_v20 = vld [vmem:[#allocation26 + $0x818] sm:$0xff] }
 0x822   :  { %3935 = vmatpush1.bf16.msra.mxu1 %v3934_v29  ;;  %4063 = vmatpush1.bf16.msra.mxu0 %v4062_v30  ;;  %v2343_v29 = vld [vmem:[#allocation26 + $0x6a8] sm:$0xff]  ;;  %v2385_v21 = vld [vmem:[#allocation26 + $0x7f8] sm:$0xff] }
 0x823   :  { %3937 = vmatprep.subr.bf16.mxu1 %v3936_v33  ;;  %4065 = vmatprep.subr.bf16.mxu0 %v4064_v34  ;;  %v2334_v33 = vld [vmem:[#allocation26 + $0x660] sm:$0xff]  ;;  %v2340_v34 = vld [vmem:[#allocation26 + $0x690] sm:$0xff]  ;;  %v4080_v41 = vpack.c.bf16 %v2343_v29, %v2337_v28  ;;  %v3968_v29 = vpack.c.bf16 %v2389_v20, %v2383_v19 }
 0x824   :  { %v2388_v28 = vld [vmem:[#allocation26 + $0x810] sm:$0xff]  ;;  %v2430_v20 = vld [vmem:[#allocation26 + $0x960] sm:$0xff] }
 0x826   :  { %3939 = vmatpush1.bf16.msra.mxu1 %v3938_v42  ;;  %4067 = vmatpush1.bf16.msra.mxu0 %v4066_v43  ;;  %v2353_v42 = vld [vmem:[#allocation26 + $0x6f8] sm:$0xff] }
 0x827   :  { %3941 = vmatprep.subr.bf16.mxu1 %v3940_v45  ;;  %4069 = vmatprep.subr.bf16.mxu0 %v4068_v46  ;;  %v2349_v43 = vld [vmem:[#allocation26 + $0x6d8] sm:$0xff]  ;;  %v3954_v46 = vpack.c.bf16 %v2340_v34, %v2334_v33  ;;  %v2390_v33 = vld [vmem:[#allocation26 + $0x820] sm:$0xff]  ;;  %v2395_v34 = vld [vmem:[#allocation26 + $0x848] sm:$0xff] }
 0x82a   :  { %3943 = vmatpush1.bf16.msra.mxu1 %v3942_v50  ;;  %4071 = vmatpush1.bf16.msra.mxu0 %v4070_v51  ;;  %v3956_v50 = vpack.c.bf16 %v2353_v42, %v2347_v38  ;;  %v4084_v51 = vpack.c.bf16 %v2355_v44, %v2349_v43  ;;  %v2403_v38 = vld [vmem:[#allocation26 + $0x888] sm:$0xff]  ;;  %v2394_v42 = vld [vmem:[#allocation26 + $0x840] sm:$0xff]  ;;  %v2400_v43 = vld [vmem:[#allocation26 + $0x870] sm:$0xff]  ;;  %v3972_v44 = vpack.c.bf16 %v2401_v36, %v2395_v34 }
 0x82b   :  { %3945 = vmatprep.subr.bf16.mxu1 %v3944_v55  ;;  %4073 = vmatprep.subr.bf16.mxu0 %v4072_v59  ;;  %v2365_v55 = vld [vmem:[#allocation26 + $0x758] sm:$0xff]  ;;  %v4086_v59 = vpack.c.bf16 %v2354_v25, %v2348_v52  ;;  %v2415_v52 = vld [vmem:[#allocation26 + $0x8e8] sm:$0xff]  ;;  %v3974_v25 = vpack.c.bf16 %v2400_v43, %v2394_v42  ;;  %v2442_v36 = vld [vmem:[#allocation26 + $0x9c0] sm:$0xff] }
 0x82c   :  { %v3960_v62 = vpack.c.bf16 %v2365_v55, %v2359_v54  ;;  %v2406_v55 = vld [vmem:[#allocation26 + $0x8a0] sm:$0xff]  ;;  %v2455_v43 = vld [vmem:[#allocation26 + $0xa28] sm:$0xff] }
 0x82d   :  { %v2450_v42 = vld [vmem:[#allocation26 + $0xa00] sm:$0xff] }
 0x82e   :  { %3947 = vmatpush1.bf16.msra.mxu1 %v3946_v39  ;;  %4075 = vmatpush1.bf16.msra.mxu0 %v4074_v63  ;;  %v2358_v39 = vld [vmem:[#allocation26 + $0x720] sm:$0xff]  ;;  %v4088_v63 = vpack.c.bf16 %v2367_v57, %v2361_v56  ;;  %v2412_v56 = vld [vmem:[#allocation26 + $0x8d0] sm:$0xff] }
 0x82f   :  { %3949 = vmatprep.subr.bf16.mxu1 %v3948_v2  ;;  %4077 = vmatprep.subr.bf16.mxu0 %v4076_v3  ;;  %v2377_v2 = vld [vmem:[#allocation26 + $0x7b8] sm:$0xff]  ;;  %v2379_v3 = vld [vmem:[#allocation26 + $0x7c8] sm:$0xff] }
 0x830   :  { %v3964_v14 = vpack.c.bf16 %v2377_v2, %v2371_v1  ;;  %v2418_v2 = vld [vmem:[#allocation26 + $0x900] sm:$0xff] }
 0x8c4   :  { %v2050_v12 = vpop.f32.mrb[8].mxu1  ;;  %v5319_v13 = vpop.f32.mrb[6].mxu0 }
 0x8c5   :  { %v2051_v15 = vadd.f32 %v2050_v12, %v1967_v5  ;;  %v2052_v17 = vpop.f32.mrb[9].mxu1  ;;  %v2123_v18 = vpop.f32.mrb[7].mxu0  ;;  %v3962_v5 = vpack.c.bf16 %v2364_v60, %v2358_v39  ;;  %v2376_v12 = vld [vmem:[#allocation26 + $0x7b0] sm:$0xff]  ;;  %v2414_v39 = vld [vmem:[#allocation26 + $0x8e0] sm:$0xff]  ;;  %v2419_v60 = vld [vmem:[#allocation26 + $0x908] sm:$0xff] }
 0x8c6   :  { %v2053_v23 = vadd.f32 %v2052_v17, %v1971_v16  ;;  %v2124_v26 = vadd.f32 %v2123_v18, %v1979_v10  ;;  %v4090_v16 = vpack.c.bf16 %v2366_v22, %v2360_v0  ;;  %v2370_v10 = vld [vmem:[#allocation26 + $0x780] sm:$0xff]  ;;  %v2372_v17 = vld [vmem:[#allocation26 + $0x790] sm:$0xff]  ;;  %v2427_v0 = vld [vmem:[#allocation26 + $0x948] sm:$0xff]  ;;  %v3978_v22 = vpack.c.bf16 %v2412_v56, %v2406_v55 }
 0x8c7   :  { %v5323_v35 = vmax.f32 %v2051_v15, 0.0  ;;  %v4092_v15 = vpack.c.bf16 %v2379_v3, %v2373_v7  ;;  %v2378_v18 = vld [vmem:[#allocation26 + $0x7c0] sm:$0xff]  ;;  %v3966_v24 = vpack.c.bf16 %v2376_v12, %v2370_v10  ;;  %v2424_v7 = vld [vmem:[#allocation26 + $0x930] sm:$0xff]  ;;  %v2431_v12 = vld [vmem:[#allocation26 + $0x968] sm:$0xff] }
 0x8c8   :  { %v5321_v30 = vmax.f32 %v2053_v23, 0.0  ;;  %v5327_v45 = vmax.f32 %v2124_v26, 0.0  ;;  %v2391_v23 = vld [vmem:[#allocation26 + $0x828] sm:$0xff]  ;;  %v4094_v26 = vpack.c.bf16 %v2378_v18, %v2372_v17  ;;  %v2426_v10 = vld [vmem:[#allocation26 + $0x940] sm:$0xff]  ;;  %v3982_v18 = vpack.c.bf16 %v2424_v7, %v2418_v2 }
 0x8c9   :  { %v2439_v17 = vld [vmem:[#allocation26 + $0x9a8] sm:$0xff]  ;;  %v2462_v55 = vld [vmem:[#allocation26 + $0xa60] sm:$0xff] }
 0x8ca   :  { %2610 = vmatprep.mubr.f32.mxu1 %v5321_v30  ;;  %2752 = vmatprep.mubr.f32.mxu0 %v5321_v30  ;;  %v2467_v56 = vld [vmem:[#allocation26 + $0xa88] sm:$0xff]  ;;  %v2474_v2 = vld [vmem:[#allocation26 + $0xac0] sm:$0xff] }
 0x8cb   :  { %2611 = vmatmul.mubr.f32.vlgmr.msra.gmra.mrb[10].mxu1 %v5323_v35  ;;  %2753 = vmatmul.mubr.f32.vlgmr.msra.gmra.mrb[8].mxu0 %v5323_v35  ;;  %v2479_v7 = vld [vmem:[#allocation26 + $0xae8] sm:$0xff] }
 0x8cc   :  { %3951 = vmatpush1.bf16.msra.mxu1 %v3950_v31  ;;  %4079 = vmatpush1.bf16.msra.mxu0 %v4078_v32  ;;  %v4096_v31 = vpack.c.bf16 %v2391_v23, %v2385_v21  ;;  %v2384_v32 = vld [vmem:[#allocation26 + $0x7f0] sm:$0xff] }
 0x8cd   :  { %2681 = vmatprep.mubr.f32.mxu1 %v5327_v45  ;;  %2823 = vmatprep.mubr.f32.mxu0 %v5327_v45  ;;  %v2436_v21 = vld [vmem:[#allocation26 + $0x990] sm:$0xff] }
 0x8ce   :  { %3953 = vmatprep.subr.bf16.mxu1 %v3952_v40  ;;  %4081 = vmatprep.subr.bf16.mxu0 %v4080_v41  ;;  %v3970_v40 = vpack.c.bf16 %v2388_v28, %v2382_v27  ;;  %v4098_v41 = vpack.c.bf16 %v2390_v33, %v2384_v32  ;;  %v2438_v27 = vld [vmem:[#allocation26 + $0x9a0] sm:$0xff]  ;;  %v2443_v28 = vld [vmem:[#allocation26 + $0x9c8] sm:$0xff]  ;;  %v3986_v33 = vpack.c.bf16 %v2436_v21, %v2430_v20 }
 0x8cf   :  { %v2451_v32 = vld [vmem:[#allocation26 + $0xa08] sm:$0xff]  ;;  %v2486_v20 = vld [vmem:[#allocation26 + $0xb20] sm:$0xff] }
 0x8d0   :  { %3955 = vmatpush1.bf16.msra.mxu1 %v3954_v46  ;;  %4083 = vmatpush1.bf16.msra.mxu0 %v4082_v47  ;;  %v4100_v46 = vpack.c.bf16 %v2403_v38, %v2397_v37  ;;  %v2396_v47 = vld [vmem:[#allocation26 + $0x850] sm:$0xff]  ;;  %v2491_v21 = vld [vmem:[#allocation26 + $0xb48] sm:$0xff] }
 0x8d1   :  { %3957 = vmatprep.subr.bf16.mxu1 %v3956_v50  ;;  %4085 = vmatprep.subr.bf16.mxu0 %v4084_v51  ;;  %v2413_v50 = vld [vmem:[#allocation26 + $0x8d8] sm:$0xff]  ;;  %v4102_v54 = vpack.c.bf16 %v2402_v48, %v2396_v47  ;;  %v2448_v37 = vld [vmem:[#allocation26 + $0x9f0] sm:$0xff]  ;;  %v2463_v47 = vld [vmem:[#allocation26 + $0xa68] sm:$0xff] }
 0x8d2   :  { %v2409_v51 = vld [vmem:[#allocation26 + $0x8b8] sm:$0xff]  ;;  %v3976_v57 = vpack.c.bf16 %v2413_v50, %v2407_v49  ;;  %v3990_v48 = vpack.c.bf16 %v2448_v37, %v2442_v36  ;;  %v2454_v50 = vld [vmem:[#allocation26 + $0xa20] sm:$0xff]  ;;  %v2503_v37 = vld [vmem:[#allocation26 + $0xba8] sm:$0xff] }
 0x8d3   :  { %v2498_v36 = vld [vmem:[#allocation26 + $0xb80] sm:$0xff] }
 0x8d4   :  { %3959 = vmatpush1.bf16.msra.mxu1 %v3958_v58  ;;  %4087 = vmatpush1.bf16.msra.mxu0 %v4086_v59  ;;  %v4104_v58 = vpack.c.bf16 %v2415_v52, %v2409_v51  ;;  %v2408_v59 = vld [vmem:[#allocation26 + $0x8b0] sm:$0xff] }
 0x8d5   :  { %3961 = vmatprep.subr.bf16.mxu1 %v3960_v62  ;;  %4089 = vmatprep.subr.bf16.mxu0 %v4088_v63  ;;  %v2425_v62 = vld [vmem:[#allocation26 + $0x938] sm:$0xff]  ;;  %v4106_v1 = vpack.c.bf16 %v2414_v39, %v2408_v59  ;;  %v2460_v51 = vld [vmem:[#allocation26 + $0xa50] sm:$0xff]  ;;  %v2475_v59 = vld [vmem:[#allocation26 + $0xac8] sm:$0xff] }
 0x8d6   :  { %v2421_v63 = vld [vmem:[#allocation26 + $0x918] sm:$0xff]  ;;  %v3980_v3 = vpack.c.bf16 %v2425_v62, %v2419_v60  ;;  %v3994_v39 = vpack.c.bf16 %v2460_v51, %v2454_v50  ;;  %v2466_v62 = vld [vmem:[#allocation26 + $0xa80] sm:$0xff]  ;;  %v2504_v50 = vld [vmem:[#allocation26 + $0xbb0] sm:$0xff] }
 0x8d7   :  { %v2510_v51 = vld [vmem:[#allocation26 + $0xbe0] sm:$0xff] }
 0x8d8   :  { %3963 = vmatpush1.bf16.msra.mxu1 %v3962_v5  ;;  %4091 = vmatpush1.bf16.msra.mxu0 %v4090_v16  ;;  %v4108_v5 = vpack.c.bf16 %v2427_v0, %v2421_v63  ;;  %v2420_v16 = vld [vmem:[#allocation26 + $0x910] sm:$0xff] }
 0x8d9   :  { %3965 = vmatprep.subr.bf16.mxu1 %v3964_v14  ;;  %4093 = vmatprep.subr.bf16.mxu0 %v4092_v15  ;;  %v2437_v14 = vld [vmem:[#allocation26 + $0x998] sm:$0xff]  ;;  %v4110_v19 = vpack.c.bf16 %v2426_v10, %v2420_v16  ;;  %v2472_v63 = vld [vmem:[#allocation26 + $0xab0] sm:$0xff]  ;;  %v2487_v16 = vld [vmem:[#allocation26 + $0xb28] sm:$0xff] }
 0x8da   :  { %v2433_v15 = vld [vmem:[#allocation26 + $0x978] sm:$0xff]  ;;  %v3984_v23 = vpack.c.bf16 %v2437_v14, %v2431_v12  ;;  %v3998_v10 = vpack.c.bf16 %v2472_v63, %v2466_v62  ;;  %v2478_v14 = vld [vmem:[#allocation26 + $0xae0] sm:$0xff] }
 0x8dc   :  { %3967 = vmatpush1.bf16.msra.mxu1 %v3966_v24  ;;  %4095 = vmatpush1.bf16.msra.mxu0 %v4094_v26  ;;  %v4112_v24 = vpack.c.bf16 %v2439_v17, %v2433_v15  ;;  %v2432_v26 = vld [vmem:[#allocation26 + $0x970] sm:$0xff] }
 0x8dd   :  { %3969 = vmatprep.subr.bf16.mxu1 %v3968_v29  ;;  %4097 = vmatprep.subr.bf16.mxu0 %v4096_v31  ;;  %v2449_v29 = vld [vmem:[#allocation26 + $0x9f8] sm:$0xff]  ;;  %v4114_v34 = vpack.c.bf16 %v2438_v27, %v2432_v26  ;;  %v2484_v15 = vld [vmem:[#allocation26 + $0xb10] sm:$0xff]  ;;  %v2499_v26 = vld [vmem:[#allocation26 + $0xb88] sm:$0xff] }
 0x8de   :  { %v2445_v31 = vld [vmem:[#allocation26 + $0x9d8] sm:$0xff]  ;;  %v3988_v38 = vpack.c.bf16 %v2449_v29, %v2443_v28  ;;  %v4002_v27 = vpack.c.bf16 %v2484_v15, %v2478_v14  ;;  %v2490_v29 = vld [vmem:[#allocation26 + $0xb40] sm:$0xff] }
 0x8df   :  { %v2170_v15 = vld [vmem:[#allocation26 + $0x140] sm:$0xff] }
 0x8e0   :  { %3971 = vmatpush1.bf16.msra.mxu1 %v3970_v40  ;;  %4099 = vmatpush1.bf16.msra.mxu0 %v4098_v41  ;;  %v4116_v40 = vpack.c.bf16 %v2451_v32, %v2445_v31  ;;  %v2444_v41 = vld [vmem:[#allocation26 + $0x9d0] sm:$0xff] }
 0x8e1   :  { %3973 = vmatprep.subr.bf16.mxu1 %v3972_v44  ;;  %4101 = vmatprep.subr.bf16.mxu0 %v4100_v46  ;;  %v2461_v44 = vld [vmem:[#allocation26 + $0xa58] sm:$0xff]  ;;  %v4118_v49 = vpack.c.bf16 %v2450_v42, %v2444_v41  ;;  %v2496_v31 = vld [vmem:[#allocation26 + $0xb70] sm:$0xff]  ;;  %v2511_v41 = vld [vmem:[#allocation26 + $0xbe8] sm:$0xff] }
 0x8e2   :  { %v2457_v46 = vld [vmem:[#allocation26 + $0xa38] sm:$0xff]  ;;  %v3992_v52 = vpack.c.bf16 %v2461_v44, %v2455_v43  ;;  %v4006_v42 = vpack.c.bf16 %v2496_v31, %v2490_v29  ;;  %v2502_v44 = vld [vmem:[#allocation26 + $0xba0] sm:$0xff]  ;;  %v2200_v31 = vld [vmem:[#allocation26 + $0x230] sm:$0xff] }
 0x8e3   :  { %v2194_v29 = vld [vmem:[#allocation26 + $0x200] sm:$0xff] }
 0x8e4   :  { %3975 = vmatpush1.bf16.msra.mxu1 %v3974_v25  ;;  %4103 = vmatpush1.bf16.msra.mxu0 %v4102_v54  ;;  %v4120_v25 = vpack.c.bf16 %v2463_v47, %v2457_v46  ;;  %v2456_v54 = vld [vmem:[#allocation26 + $0xa30] sm:$0xff]  ;;  %v1975_v46 = vrot.slane %v5311_v4, %v5197_v53 }
 0x8e5   :  { %3977 = vmatprep.subr.bf16.mxu1 %v3976_v57  ;;  %4105 = vmatprep.subr.bf16.mxu0 %v4104_v58  ;;  %v2473_v57 = vld [vmem:[#allocation26 + $0xab8] sm:$0xff]  ;;  %v4122_v60 = vpack.c.bf16 %v2462_v55, %v2456_v54  ;;  %v4138_v55 = vpack.c.bf16 %v2510_v51, %v2504_v50  ;;  %v2140_v4 = vld [vmem:[#allocation26 + $0x50] sm:$0xff]  ;;  %v2230_v51 = vld [vmem:[#allocation26 + $0x320] sm:$0xff] }
 0x8e6   :  { %v2469_v58 = vld [vmem:[#allocation26 + $0xa98] sm:$0xff]  ;;  %v3996_v0 = vpack.c.bf16 %v2473_v57, %v2467_v56  ;;  %v2122_v56 = vadd.f32 %v5319_v13, %v1975_v46  ;;  %v2224_v46 = vld [vmem:[#allocation26 + $0x2f0] sm:$0xff] }
 0x8e8   :  { %3979 = vmatpush1.bf16.msra.mxu1 %v3978_v22  ;;  %4107 = vmatpush1.bf16.msra.mxu0 %v4106_v1  ;;  %v4124_v22 = vpack.c.bf16 %v2475_v59, %v2469_v58  ;;  %v2468_v1 = vld [vmem:[#allocation26 + $0xa90] sm:$0xff]  ;;  %v2134_v58 = vld [vmem:[#allocation26 + $0x20] sm:$0xff]  ;;  %v2147_v59 = vld [vmem:[#allocation26 + $0x88] sm:$0xff]  ;;  %v5336_v62 = vmax.f32 %v2122_v56, 0.0 }
 0x8e9   :  { %3981 = vmatprep.subr.bf16.mxu1 %v3980_v3  ;;  %4109 = vmatprep.subr.bf16.mxu0 %v4108_v5  ;;  %v2485_v3 = vld [vmem:[#allocation26 + $0xb18] sm:$0xff]  ;;  %v4126_v12 = vpack.c.bf16 %v2474_v2, %v2468_v1  ;;  %v2159_v1 = vld [vmem:[#allocation26 + $0xe8] sm:$0xff] }
 0x8ea   :  { %v2481_v5 = vld [vmem:[#allocation26 + $0xaf8] sm:$0xff]  ;;  %v4000_v17 = vpack.c.bf16 %v2485_v3, %v2479_v7  ;;  %v2158_v3 = vld [vmem:[#allocation26 + $0xe0] sm:$0xff] }
 0x8eb   :  { %v2165_v2 = vld [vmem:[#allocation26 + $0x118] sm:$0xff] }
 0x8ec   :  { %3983 = vmatpush1.bf16.msra.mxu1 %v3982_v18  ;;  %4111 = vmatpush1.bf16.msra.mxu0 %v4110_v19  ;;  %v4128_v18 = vpack.c.bf16 %v2487_v16, %v2481_v5  ;;  %v2480_v19 = vld [vmem:[#allocation26 + $0xaf0] sm:$0xff]  ;;  %v4148_v7 = vpack.c.bf16 %v2165_v2, %v2159_v1  ;;  %v2171_v16 = vld [vmem:[#allocation26 + $0x148] sm:$0xff]  ;;  %v2273_v1 = vld [vmem:[#allocation26 + $0x478] sm:$0xff] }
 0x8ed   :  { %3985 = vmatprep.subr.bf16.mxu1 %v3984_v23  ;;  %4113 = vmatprep.subr.bf16.mxu0 %v4112_v24  ;;  %v2497_v23 = vld [vmem:[#allocation26 + $0xb78] sm:$0xff]  ;;  %v4130_v28 = vpack.c.bf16 %v2486_v20, %v2480_v19  ;;  %v2164_v5 = vld [vmem:[#allocation26 + $0x110] sm:$0xff] }
 0x8ee   :  { %v2493_v24 = vld [vmem:[#allocation26 + $0xb58] sm:$0xff]  ;;  %v4004_v32 = vpack.c.bf16 %v2497_v23, %v2491_v21  ;;  %v2188_v23 = vld [vmem:[#allocation26 + $0x1d0] sm:$0xff] }
 0x8ef   :  { %v2189_v19 = vld [vmem:[#allocation26 + $0x1d8] sm:$0xff] }
 0x8f0   :  { %3987 = vmatpush1.bf16.msra.mxu1 %v3986_v33  ;;  %4115 = vmatpush1.bf16.msra.mxu0 %v4114_v34  ;;  %v4132_v33 = vpack.c.bf16 %v2499_v26, %v2493_v24  ;;  %v2492_v34 = vld [vmem:[#allocation26 + $0xb50] sm:$0xff]  ;;  %v2195_v24 = vld [vmem:[#allocation26 + $0x208] sm:$0xff]  ;;  %v2201_v26 = vld [vmem:[#allocation26 + $0x238] sm:$0xff] }
 0x8f1   :  { %3989 = vmatprep.subr.bf16.mxu1 %v3988_v38  ;;  %4117 = vmatprep.subr.bf16.mxu0 %v4116_v40  ;;  %v2509_v38 = vld [vmem:[#allocation26 + $0xbd8] sm:$0xff]  ;;  %v4134_v43 = vpack.c.bf16 %v2498_v36, %v2492_v34  ;;  %v4162_v34 = vpack.c.bf16 %v2200_v31, %v2194_v29  ;;  %v2308_v29 = vld [vmem:[#allocation26 + $0x590] sm:$0xff]  ;;  %v2315_v31 = vld [vmem:[#allocation26 + $0x5c8] sm:$0xff] }
 0x8f2   :  { %v2505_v40 = vld [vmem:[#allocation26 + $0xbb8] sm:$0xff]  ;;  %v4008_v47 = vpack.c.bf16 %v2509_v38, %v2503_v37  ;;  %v2206_v37 = vld [vmem:[#allocation26 + $0x260] sm:$0xff]  ;;  %v2212_v38 = vld [vmem:[#allocation26 + $0x290] sm:$0xff] }
 0x8f4   :  { %3991 = vmatpush1.bf16.msra.mxu1 %v3990_v48  ;;  %4119 = vmatpush1.bf16.msra.mxu0 %v4118_v49  ;;  %v4136_v48 = vpack.c.bf16 %v2511_v41, %v2505_v40  ;;  %v2508_v49 = vld [vmem:[#allocation26 + $0xbd0] sm:$0xff]  ;;  %v2219_v40 = vld [vmem:[#allocation26 + $0x2c8] sm:$0xff]  ;;  %v2225_v41 = vld [vmem:[#allocation26 + $0x2f8] sm:$0xff] }
 0x8f5   :  { %3993 = vmatprep.subr.bf16.mxu1 %v3992_v52  ;;  %4121 = vmatprep.subr.bf16.mxu0 %v4120_v25  ;;  %v2135_v52 = vld [vmem:[#allocation26 + $0x28] sm:$0xff]  ;;  %v2141_v25 = vld [vmem:[#allocation26 + $0x58] sm:$0xff]  ;;  %v4010_v54 = vpack.c.bf16 %v2508_v49, %v2502_v44  ;;  %v2218_v44 = vld [vmem:[#allocation26 + $0x2c0] sm:$0xff] }
 0x8f6   :  { %v4140_v57 = vpack.c.bf16 %v2141_v25, %v2135_v52  ;;  %v4170_v49 = vpack.c.bf16 %v2224_v46, %v2218_v44  ;;  %v2236_v52 = vld [vmem:[#allocation26 + $0x350] sm:$0xff]  ;;  %v2243_v25 = vld [vmem:[#allocation26 + $0x388] sm:$0xff] }
 0x8f7   :  { %v2332_v44 = vld [vmem:[#allocation26 + $0x650] sm:$0xff]  ;;  %v2339_v46 = vld [vmem:[#allocation26 + $0x688] sm:$0xff] }
 0x8f8   :  { %3995 = vmatpush1.bf16.msra.mxu1 %v3994_v39  ;;  %4123 = vmatpush1.bf16.msra.mxu0 %v4122_v60  ;;  %v2153_v39 = vld [vmem:[#allocation26 + $0xb8] sm:$0xff]  ;;  %v4142_v60 = vpack.c.bf16 %v2140_v4, %v2134_v58  ;;  %v2248_v58 = vld [vmem:[#allocation26 + $0x3b0] sm:$0xff]  ;;  %v2255_v4 = vld [vmem:[#allocation26 + $0x3e8] sm:$0xff] }
 0x8f9   :  { %3997 = vmatprep.subr.bf16.mxu1 %v3996_v0  ;;  %4125 = vmatprep.subr.bf16.mxu0 %v4124_v22  ;;  %v4144_v63 = vpack.c.bf16 %v2153_v39, %v2147_v59  ;;  %v2146_v0 = vld [vmem:[#allocation26 + $0x80] sm:$0xff]  ;;  %v2152_v22 = vld [vmem:[#allocation26 + $0xb0] sm:$0xff]  ;;  %v2261_v59 = vld [vmem:[#allocation26 + $0x418] sm:$0xff] }
 0x8fa   :  { %v4146_v13 = vpack.c.bf16 %v2152_v22, %v2146_v0  ;;  %v2260_v0 = vld [vmem:[#allocation26 + $0x410] sm:$0xff]  ;;  %v2267_v22 = vld [vmem:[#allocation26 + $0x448] sm:$0xff] }
 0x8fc   :  { %3999 = vmatpush1.bf16.msra.mxu1 %v3998_v10  ;;  %4127 = vmatpush1.bf16.msra.mxu0 %v4126_v12  ;;  %v2177_v10 = vld [vmem:[#allocation26 + $0x178] sm:$0xff]  ;;  %v4150_v12 = vpack.c.bf16 %v2164_v5, %v2158_v3  ;;  %v2272_v3 = vld [vmem:[#allocation26 + $0x470] sm:$0xff]  ;;  %v2279_v5 = vld [vmem:[#allocation26 + $0x4a8] sm:$0xff] }
 0x8fd   :  { %4001 = vmatprep.subr.bf16.mxu1 %v4000_v17  ;;  %4129 = vmatprep.subr.bf16.mxu0 %v4128_v18  ;;  %v4152_v14 = vpack.c.bf16 %v2177_v10, %v2171_v16  ;;  %v2176_v17 = vld [vmem:[#allocation26 + $0x170] sm:$0xff]  ;;  %v2183_v18 = vld [vmem:[#allocation26 + $0x1a8] sm:$0xff]  ;;  %v2285_v16 = vld [vmem:[#allocation26 + $0x4d8] sm:$0xff] }
 0x8fe   :  { %v4154_v20 = vpack.c.bf16 %v2176_v17, %v2170_v15  ;;  %v4156_v21 = vpack.c.bf16 %v2189_v19, %v2183_v18  ;;  %v2284_v15 = vld [vmem:[#allocation26 + $0x4d0] sm:$0xff]  ;;  %v2291_v17 = vld [vmem:[#allocation26 + $0x508] sm:$0xff]  ;;  %v2297_v18 = vld [vmem:[#allocation26 + $0x538] sm:$0xff] }
 0x900   :  { %4003 = vmatpush1.bf16.msra.mxu1 %v4002_v27  ;;  %4131 = vmatpush1.bf16.msra.mxu0 %v4130_v28  ;;  %v4160_v28 = vpack.c.bf16 %v2201_v26, %v2195_v24  ;;  %v2309_v24 = vld [vmem:[#allocation26 + $0x598] sm:$0xff] }
 0x901   :  { %4005 = vmatprep.subr.bf16.mxu1 %v4004_v32  ;;  %4133 = vmatprep.subr.bf16.mxu0 %v4132_v33  ;;  %v2207_v32 = vld [vmem:[#allocation26 + $0x268] sm:$0xff]  ;;  %v2213_v33 = vld [vmem:[#allocation26 + $0x298] sm:$0xff] }
 0x902   :  { %v4164_v36 = vpack.c.bf16 %v2213_v33, %v2207_v32  ;;  %v2321_v32 = vld [vmem:[#allocation26 + $0x5f8] sm:$0xff] }
 0x904   :  { %4007 = vmatpush1.bf16.msra.mxu1 %v4006_v42  ;;  %4135 = vmatpush1.bf16.msra.mxu0 %v4134_v43  ;;  %v4166_v42 = vpack.c.bf16 %v2212_v38, %v2206_v37  ;;  %v4168_v43 = vpack.c.bf16 %v2225_v41, %v2219_v40  ;;  %v2320_v37 = vld [vmem:[#allocation26 + $0x5f0] sm:$0xff]  ;;  %v2327_v38 = vld [vmem:[#allocation26 + $0x628] sm:$0xff]  ;;  %v2333_v40 = vld [vmem:[#allocation26 + $0x658] sm:$0xff] }
 0x905   :  { %4009 = vmatprep.subr.bf16.mxu1 %v4008_v47  ;;  %4137 = vmatprep.subr.bf16.mxu0 %v4136_v48  ;;  %v2231_v47 = vld [vmem:[#allocation26 + $0x328] sm:$0xff]  ;;  %v2237_v48 = vld [vmem:[#allocation26 + $0x358] sm:$0xff] }
 0x906   :  { %v4172_v50 = vpack.c.bf16 %v2237_v48, %v2231_v47  ;;  %v2345_v47 = vld [vmem:[#allocation26 + $0x6b8] sm:$0xff] }
 0x908   :  { %4011 = vmatpush1.bf16.msra.mxu1 %v4010_v54  ;;  %4139 = vmatpush1.bf16.msra.mxu0 %v4138_v55  ;;  %v2249_v54 = vld [vmem:[#allocation26 + $0x3b8] sm:$0xff]  ;;  %v4174_v55 = vpack.c.bf16 %v2236_v52, %v2230_v51  ;;  %v2344_v51 = vld [vmem:[#allocation26 + $0x6b0] sm:$0xff]  ;;  %v2351_v52 = vld [vmem:[#allocation26 + $0x6e8] sm:$0xff] }
 0x909   :  { %4141 = vmatprep.subr.bf16.mxu1 %v4140_v57  ;;  %v4176_v56 = vpack.c.bf16 %v2249_v54, %v2243_v25  ;;  %v2242_v57 = vld [vmem:[#allocation26 + $0x380] sm:$0xff]  ;;  %v2357_v25 = vld [vmem:[#allocation26 + $0x718] sm:$0xff] }
 0x90a   :  { %v4178_v39 = vpack.c.bf16 %v2248_v58, %v2242_v57  ;;  %v2356_v57 = vld [vmem:[#allocation26 + $0x710] sm:$0xff]  ;;  %v2363_v58 = vld [vmem:[#allocation26 + $0x748] sm:$0xff] }
 0x90b   :  { %2682 = vmatmul.mubr.f32.vlgmr.msra.gmra.mrb[10].mxu1 %v5336_v62  ;;  %2824 = vmatmul.mubr.f32.vlgmr.msra.gmra.mrb[8].mxu0 %v5336_v62 }
 0x90c   :  { %4143 = vmatpush1.bf16.msra.mxu1 %v4142_v60  ;;  %2894 = vmatprep.mubr.f32.mxu1 %v5321_v30  ;;  %v2182_v30 = vld [vmem:[#allocation26 + $0x1a0] sm:$0xff]  ;;  %v4180_v60 = vpack.c.bf16 %v2261_v59, %v2255_v4  ;;  %v2369_v4 = vld [vmem:[#allocation26 + $0x778] sm:$0xff] }
 0x90d   :  { %4145 = vmatprep.subr.bf16.mxu1 %v4144_v63  ;;  %v4158_v27 = vpack.c.bf16 %v2188_v23, %v2182_v30  ;;  %v2254_v63 = vld [vmem:[#allocation26 + $0x3e0] sm:$0xff]  ;;  %v2296_v30 = vld [vmem:[#allocation26 + $0x530] sm:$0xff]  ;;  %v2303_v23 = vld [vmem:[#allocation26 + $0x568] sm:$0xff] }
 0x90e   :  { %v4182_v2 = vpack.c.bf16 %v2260_v0, %v2254_v63  ;;  %v2368_v63 = vld [vmem:[#allocation26 + $0x770] sm:$0xff]  ;;  %v2375_v0 = vld [vmem:[#allocation26 + $0x7a8] sm:$0xff] }
 0x910   :  { %4147 = vmatpush1.bf16.msra.mxu1 %v4146_v13  ;;  %v4184_v13 = vpack.c.bf16 %v2273_v1, %v2267_v22  ;;  %v2381_v22 = vld [vmem:[#allocation26 + $0x7d8] sm:$0xff] }
 0x911   :  { %4149 = vmatprep.subr.bf16.mxu1 %v4148_v7  ;;  %v2266_v7 = vld [vmem:[#allocation26 + $0x440] sm:$0xff]  ;;  %v4220_v1 = vpack.c.bf16 %v2381_v22, %v2375_v0 }
 0x912   :  { %v4186_v10 = vpack.c.bf16 %v2272_v3, %v2266_v7  ;;  %v2393_v7 = vld [vmem:[#allocation26 + $0x838] sm:$0xff]  ;;  %v2482_v22 = vld [vmem:[#allocation26 + $0xb00] sm:$0xff] }
 0x914   :  { %4151 = vmatpush1.bf16.msra.mxu1 %v4150_v12  ;;  %v4188_v12 = vpack.c.bf16 %v2285_v16, %v2279_v5  ;;  %v2386_v16 = vld [vmem:[#allocation26 + $0x800] sm:$0xff] }
 0x915   :  { %4153 = vmatprep.subr.bf16.mxu1 %v4152_v14  ;;  %v2278_v14 = vld [vmem:[#allocation26 + $0x4a0] sm:$0xff] }
 0x916   :  { %v4190_v19 = vpack.c.bf16 %v2284_v15, %v2278_v14  ;;  %v2405_v14 = vld [vmem:[#allocation26 + $0x898] sm:$0xff] }
 0x918   :  { %4155 = vmatpush1.bf16.msra.mxu1 %v4154_v20  ;;  %v4192_v20 = vpack.c.bf16 %v2297_v18, %v2291_v17  ;;  %v2398_v18 = vld [vmem:[#allocation26 + $0x860] sm:$0xff] }
 0x919   :  { %4157 = vmatprep.subr.bf16.mxu1 %v4156_v21  ;;  %v2290_v21 = vld [vmem:[#allocation26 + $0x500] sm:$0xff] }
 0x91a   :  { %v4194_v26 = vpack.c.bf16 %v2296_v30, %v2290_v21  ;;  %v2417_v21 = vld [vmem:[#allocation26 + $0x8f8] sm:$0xff] }
 0x91c   :  { %4159 = vmatpush1.bf16.msra.mxu1 %v4158_v27  ;;  %v4196_v27 = vpack.c.bf16 %v2309_v24, %v2303_v23  ;;  %v2410_v24 = vld [vmem:[#allocation26 + $0x8c0] sm:$0xff] }
 0x91d   :  { %4161 = vmatprep.subr.bf16.mxu1 %v4160_v28  ;;  %v2302_v28 = vld [vmem:[#allocation26 + $0x560] sm:$0xff] }
 0x91e   :  { %v4198_v33 = vpack.c.bf16 %v2308_v29, %v2302_v28  ;;  %v2429_v28 = vld [vmem:[#allocation26 + $0x958] sm:$0xff] }
 0x920   :  { %4163 = vmatpush1.bf16.msra.mxu1 %v4162_v34  ;;  %v4200_v34 = vpack.c.bf16 %v2321_v32, %v2315_v31  ;;  %v2422_v32 = vld [vmem:[#allocation26 + $0x920] sm:$0xff] }
 0x921   :  { %4165 = vmatprep.subr.bf16.mxu1 %v4164_v36  ;;  %v2314_v36 = vld [vmem:[#allocation26 + $0x5c0] sm:$0xff] }
 0x922   :  { %v4202_v41 = vpack.c.bf16 %v2320_v37, %v2314_v36  ;;  %v2441_v36 = vld [vmem:[#allocation26 + $0x9b8] sm:$0xff] }
 0x924   :  { %4167 = vmatpush1.bf16.msra.mxu1 %v4166_v42  ;;  %v4204_v42 = vpack.c.bf16 %v2333_v40, %v2327_v38  ;;  %v2434_v40 = vld [vmem:[#allocation26 + $0x980] sm:$0xff] }
 0x925   :  { %4169 = vmatprep.subr.bf16.mxu1 %v4168_v43  ;;  %v2326_v43 = vld [vmem:[#allocation26 + $0x620] sm:$0xff] }
 0x926   :  { %v4206_v48 = vpack.c.bf16 %v2332_v44, %v2326_v43  ;;  %v2453_v43 = vld [vmem:[#allocation26 + $0xa18] sm:$0xff] }
 0x928   :  { %4171 = vmatpush1.bf16.msra.mxu1 %v4170_v49  ;;  %v4208_v49 = vpack.c.bf16 %v2345_v47, %v2339_v46  ;;  %v2446_v47 = vld [vmem:[#allocation26 + $0x9e0] sm:$0xff] }
 0x929   :  { %4173 = vmatprep.subr.bf16.mxu1 %v4172_v50  ;;  %v2338_v50 = vld [vmem:[#allocation26 + $0x680] sm:$0xff] }
 0x92a   :  { %v4210_v54 = vpack.c.bf16 %v2344_v51, %v2338_v50  ;;  %v2465_v50 = vld [vmem:[#allocation26 + $0xa78] sm:$0xff] }
 0x92c   :  { %4175 = vmatpush1.bf16.msra.mxu1 %v4174_v55  ;;  %v4212_v55 = vpack.c.bf16 %v2357_v25, %v2351_v52  ;;  %v2458_v25 = vld [vmem:[#allocation26 + $0xa40] sm:$0xff] }
 0x92d   :  { %4177 = vmatprep.subr.bf16.mxu1 %v4176_v56  ;;  %v2350_v56 = vld [vmem:[#allocation26 + $0x6e0] sm:$0xff] }
 0x92e   :  { %v4214_v59 = vpack.c.bf16 %v2356_v57, %v2350_v56  ;;  %v2477_v56 = vld [vmem:[#allocation26 + $0xad8] sm:$0xff] }
 0x930   :  { %4179 = vmatpush1.bf16.msra.mxu1 %v4178_v39  ;;  %v4216_v39 = vpack.c.bf16 %v2369_v4, %v2363_v58  ;;  %v2470_v4 = vld [vmem:[#allocation26 + $0xaa0] sm:$0xff] }
 0x931   :  { %4181 = vmatprep.subr.bf16.mxu1 %v4180_v60  ;;  %v2362_v60 = vld [vmem:[#allocation26 + $0x740] sm:$0xff] }
 0x934   :  { %4183 = vmatpush1.bf16.msra.mxu1 %v4182_v2  ;;  %v2380_v2 = vld [vmem:[#allocation26 + $0x7d0] sm:$0xff] }
 0x935   :  { %4185 = vmatprep.subr.bf16.mxu1 %v4184_v13  ;;  %v2387_v13 = vld [vmem:[#allocation26 + $0x808] sm:$0xff] }
 0x936   :  { %v4224_v5 = vpack.c.bf16 %v2393_v7, %v2387_v13  ;;  %v2494_v7 = vld [vmem:[#allocation26 + $0xb60] sm:$0xff] }
 0x938   :  { %4187 = vmatpush1.bf16.msra.mxu1 %v4186_v10  ;;  %v2392_v10 = vld [vmem:[#allocation26 + $0x830] sm:$0xff] }
 0x939   :  { %4189 = vmatprep.subr.bf16.mxu1 %v4188_v12  ;;  %v2399_v12 = vld [vmem:[#allocation26 + $0x868] sm:$0xff]  ;;  %v4226_v15 = vpack.c.bf16 %v2392_v10, %v2386_v16  ;;  %v2513_v16 = vld [vmem:[#allocation26 + $0xbf8] sm:$0xff] }
 0x93a   :  { %v4228_v17 = vpack.c.bf16 %v2405_v14, %v2399_v12  ;;  %v2506_v14 = vld [vmem:[#allocation26 + $0xbc0] sm:$0xff] }
 0x93c   :  { %4191 = vmatpush1.bf16.msra.mxu1 %v4190_v19  ;;  %v2404_v19 = vld [vmem:[#allocation26 + $0x890] sm:$0xff] }
 0x93d   :  { %4193 = vmatprep.subr.bf16.mxu1 %v4192_v20  ;;  %v2411_v20 = vld [vmem:[#allocation26 + $0x8c8] sm:$0xff]  ;;  %v4230_v30 = vpack.c.bf16 %v2404_v19, %v2398_v18  ;;  %v5344_v18 = vld [vmem:[#allocation27] sm:$0x3f] }
 0x93e   :  { %v4232_v23 = vpack.c.bf16 %v2417_v21, %v2411_v20  ;;  %v2519_v19 = vrot.slane %v5344_v18, %v5178_v6  ;;  %v2527_v20 = vrot.slane %v5344_v18, %v5197_v53  ;;  %v2523_v21 = vrot.slane %v5344_v18, %v5183_v8 }
 0x940   :  { %4195 = vmatpush1.bf16.msra.mxu1 %v4194_v26  ;;  %v2416_v26 = vld [vmem:[#allocation26 + $0x8f0] sm:$0xff] }
 0x941   :  { %4197 = vmatprep.subr.bf16.mxu1 %v4196_v27  ;;  %v2423_v27 = vld [vmem:[#allocation26 + $0x928] sm:$0xff]  ;;  %v4234_v29 = vpack.c.bf16 %v2416_v26, %v2410_v24 }
 0x942   :  { %v4236_v31 = vpack.c.bf16 %v2429_v28, %v2423_v27 }
 0x944   :  { %4199 = vmatpush1.bf16.msra.mxu1 %v4198_v33  ;;  %v2428_v33 = vld [vmem:[#allocation26 + $0x950] sm:$0xff] }
 0x945   :  { %4201 = vmatprep.subr.bf16.mxu1 %v4200_v34  ;;  %v2435_v34 = vld [vmem:[#allocation26 + $0x988] sm:$0xff]  ;;  %v4238_v37 = vpack.c.bf16 %v2428_v33, %v2422_v32 }
 0x946   :  { %v4240_v38 = vpack.c.bf16 %v2441_v36, %v2435_v34 }
 0x948   :  { %4203 = vmatpush1.bf16.msra.mxu1 %v4202_v41  ;;  %v2440_v41 = vld [vmem:[#allocation26 + $0x9b0] sm:$0xff] }
 0x949   :  { %4205 = vmatprep.subr.bf16.mxu1 %v4204_v42  ;;  %v2447_v42 = vld [vmem:[#allocation26 + $0x9e8] sm:$0xff]  ;;  %v4242_v44 = vpack.c.bf16 %v2440_v41, %v2434_v40 }
 0x94a   :  { %v4244_v46 = vpack.c.bf16 %v2453_v43, %v2447_v42 }
 0x94b   :  { %2895 = vmatmul.mubr.f32.vlgmr.msra.gmra.mrb[12].mxu1 %v5323_v35  ;;  %v4218_v35 = vpack.c.bf16 %v2368_v63, %v2362_v60  ;;  %v2489_v60 = vld [vmem:[#allocation26 + $0xb38] sm:$0xff] }
 0x94c   :  { %4207 = vmatpush1.bf16.msra.mxu1 %v4206_v48  ;;  %2965 = vmatprep.mubr.f32.mxu1 %v5327_v45  ;;  %v2374_v45 = vld [vmem:[#allocation26 + $0x7a0] sm:$0xff]  ;;  %v2452_v48 = vld [vmem:[#allocation26 + $0xa10] sm:$0xff] }
 0x94d   :  { %4209 = vmatprep.subr.bf16.mxu1 %v4208_v49  ;;  %v4222_v3 = vpack.c.bf16 %v2380_v2, %v2374_v45  ;;  %v2459_v49 = vld [vmem:[#allocation26 + $0xa48] sm:$0xff]  ;;  %v4246_v51 = vpack.c.bf16 %v2452_v48, %v2446_v47  ;;  %v2501_v45 = vld [vmem:[#allocation26 + $0xb98] sm:$0xff] }
 0x94e   :  { %v4248_v52 = vpack.c.bf16 %v2465_v50, %v2459_v49 }
 0x950   :  { %4211 = vmatpush1.bf16.msra.mxu1 %v4210_v54  ;;  %v2464_v54 = vld [vmem:[#allocation26 + $0xa70] sm:$0xff] }
 0x951   :  { %4213 = vmatprep.subr.bf16.mxu1 %v4212_v55  ;;  %v2471_v55 = vld [vmem:[#allocation26 + $0xaa8] sm:$0xff]  ;;  %v4250_v57 = vpack.c.bf16 %v2464_v54, %v2458_v25 }
 0x952   :  { %v4252_v58 = vpack.c.bf16 %v2477_v56, %v2471_v55 }
 0x954   :  { %4215 = vmatpush1.bf16.msra.mxu1 %v4214_v59  ;;  %v2476_v59 = vld [vmem:[#allocation26 + $0xad0] sm:$0xff] }
 0x955   :  { %4217 = vmatprep.subr.bf16.mxu1 %v4216_v39  ;;  %v2483_v39 = vld [vmem:[#allocation26 + $0xb08] sm:$0xff]  ;;  %v4254_v63 = vpack.c.bf16 %v2476_v59, %v2470_v4 }
 0x956   :  { %v4256_v0 = vpack.c.bf16 %v2489_v60, %v2483_v39 }
 0x958   :  { %4219 = vmatpush1.bf16.msra.mxu1 %v4218_v35  ;;  %v2488_v35 = vld [vmem:[#allocation26 + $0xb30] sm:$0xff] }
 0x959   :  { %4221 = vmatprep.subr.bf16.mxu1 %v4220_v1  ;;  %v2495_v1 = vld [vmem:[#allocation26 + $0xb68] sm:$0xff]  ;;  %v4258_v2 = vpack.c.bf16 %v2488_v35, %v2482_v22 }
 0x95a   :  { %v4260_v13 = vpack.c.bf16 %v2501_v45, %v2495_v1 }
 0x95c   :  { %4223 = vmatpush1.bf16.msra.mxu1 %v4222_v3  ;;  %v2500_v3 = vld [vmem:[#allocation26 + $0xb90] sm:$0xff] }
 0x95d   :  { %4225 = vmatprep.subr.bf16.mxu1 %v4224_v5  ;;  %v2507_v5 = vld [vmem:[#allocation26 + $0xbc8] sm:$0xff]  ;;  %v4262_v10 = vpack.c.bf16 %v2500_v3, %v2494_v7 }
 0x95e   :  { %v4264_v12 = vpack.c.bf16 %v2513_v16, %v2507_v5 }
 0x960   :  { %4227 = vmatpush1.bf16.msra.mxu1 %v4226_v15  ;;  %v2512_v15 = vld [vmem:[#allocation26 + $0xbf0] sm:$0xff] }
 0x961   :  { %4229 = vmatprep.subr.bf16.mxu1 %v4228_v17  ;;  %v4266_v17 = vpack.c.bf16 %v2512_v15, %v2506_v14 }
 0x964   :  { %4231 = vmatpush1.bf16.msra.mxu1 %v4230_v30  ;;  %v2531_v30 = vrot.slane %v5344_v18, %v5186_v9 }
 0x965   :  { %4233 = vmatprep.subr.bf16.mxu1 %v4232_v23 }
 0x968   :  { %4235 = vmatpush1.bf16.msra.mxu1 %v4234_v29 }
 0x969   :  { %4237 = vmatprep.subr.bf16.mxu1 %v4236_v31 }
 0x96c   :  { %4239 = vmatpush1.bf16.msra.mxu1 %v4238_v37 }
 0x96d   :  { %4241 = vmatprep.subr.bf16.mxu1 %v4240_v38 }
 0x970   :  { %4243 = vmatpush1.bf16.msra.mxu1 %v4242_v44 }
 0x971   :  { %4245 = vmatprep.subr.bf16.mxu1 %v4244_v46 }
 0x974   :  { %4247 = vmatpush1.bf16.msra.mxu1 %v4246_v51 }
 0x975   :  { %4249 = vmatprep.subr.bf16.mxu1 %v4248_v52 }
 0x978   :  { %4251 = vmatpush1.bf16.msra.mxu1 %v4250_v57 }
 0x979   :  { %4253 = vmatprep.subr.bf16.mxu1 %v4252_v58 }
 0x97c   :  { %4255 = vmatpush1.bf16.msra.mxu1 %v4254_v63 }
 0x97d   :  { %4257 = vmatprep.subr.bf16.mxu1 %v4256_v0 }
 0x980   :  { %4259 = vmatpush1.bf16.msra.mxu1 %v4258_v2 }
 0x981   :  { %4261 = vmatprep.subr.bf16.mxu1 %v4260_v13 }
 0x984   :  { %4263 = vmatpush1.bf16.msra.mxu1 %v4262_v10 }
 0x985   :  { %4265 = vmatprep.subr.bf16.mxu1 %v4264_v12 }
 0x988   :  { %4267 = vmatpush1.bf16.msra.mxu1 %v4266_v17 }
 0x98b   :  { %2966 = vmatmul.mubr.f32.vlgmr.msra.gmra.mrb[12].mxu1 %v5336_v62 }
 0x9de   :  { %v2683_v23 = vpop.f32.mrb[10].mxu1  ;;  %v2825_v24 = vpop.f32.mrb[8].mxu0 }
 0x9df   :  { %v4274_v26 = vadd.f32 %v2683_v23, %v2519_v19  ;;  %v4276_v27 = vadd.f32 %v2825_v24, %v2527_v20  ;;  %v2685_v28 = vpop.f32.mrb[11].mxu1  ;;  %v2827_v62 = vpop.f32.mrb[9].mxu0 }
 0x9e0   :  { %v4275_v29 = vadd.f32 %v2685_v28, %v2523_v21  ;;  %v4277_v31 = vadd.f32 %v2827_v62, %v2531_v30 }
 0x9e1   :  { %v2972_v32 = vsub.f32 0.0, %v4274_v26  ;;  %v2974_v33 = vsub.f32 0.0, %v4276_v27 }
 0x9e2   :  { %v2973_v6 = vsub.f32 0.0, %v4275_v29  ;;  %v2975_v34 = vsub.f32 0.0, %v4277_v31 }
 0x9e3   :  { %v2978_v36 = vmul.f32 1.442695, %v2972_v32  ;;  %v2982_v53 = vmul.f32 1.442695, %v2974_v33 }
 0x9e4   :  { %v2980_v37 = vmul.f32 1.442695, %v2973_v6  ;;  %v2984_v38 = vmul.f32 1.442695, %v2975_v34 }
 0x9e5   :  { %4331 = vpow2.f32 %v2978_v36 }
 0x9e6   :  { %4333 = vpow2.f32 %v2982_v53 }
 0x9e7   :  { %4335 = vpow2.f32 %v2980_v37 }
 0x9e8   :  { %4337 = vpow2.f32 %v2984_v38 }
 0x9ef   :  { %v4332_v8 = vpop.eup %4331 }
 0x9f0   :  { %v4334_v9 = vpop.eup %4333  ;;  %v2990_v40 = vadd.f32 1.0, %v4332_v8 }
 0x9f1   :  { %v4336_v41 = vpop.eup %4335  ;;  %v2992_v42 = vadd.f32 1.0, %v4334_v9 }
 0x9f2   :  { %v4338_v43 = vpop.eup %4337  ;;  %4339 = vrcp.f32 %v2990_v40  ;;  %v2991_v44 = vadd.f32 1.0, %v4336_v41 }
 0x9f3   :  { %4341 = vrcp.f32 %v2992_v42  ;;  %v2993_v46 = vadd.f32 1.0, %v4338_v43 }
 0x9f4   :  { %4343 = vrcp.f32 %v2991_v44 }
 0x9f5   :  { %4345 = vrcp.f32 %v2993_v46 }
 0x9fc   :  { %v4340_v47 = vpop.eup %4339 }
 0x9fd   :  { %v4342_v48 = vpop.eup %4341 }
 0x9fe   :  { %v4344_v49 = vpop.eup %4343 }
 0x9ff   :  { %v4346_v50 = vpop.eup %4345  ;;  %v3008_v51 = vcombine.low %v4340_v47, %v4344_v49 }
 0xa00   :  { %v3009_v52 = vcombine.low %v4342_v48, %v4346_v50 }
 0xa01   :  { %v3016_v25 = vrot.slane %v3008_v51, %v5144_v11 }
 0xa02   :  { %4718 = shalt.err (!%p4715_p6)
}
 0xa03   :  { %s4719_s27 = scalar_lea.hbm %s5422_s20, 32 }
 0xa04   :  { %p4720_p7 = scmp.ne.s32.totalorder %s5422_s20, %s4719_s27  ;;  %p4723_p8 = scmp.lt.u32.totalorder %s4719_s27, %s5422_s20 }
 0xa06   :  { %p4725_p9 = pnand %p4723_p8, %p4720_p7 }
 0xa08   :  { %4728 = shalt.err (!%p4725_p9)
}
 0xa09   :  { %3058 = dma.vmem_to_hbm [thread:$0]  %s3056_s24, 32, %s5422_s20, [#allocation31]   ;;  %v3023_v54 = vrot.slane %v3009_v52, %v5144_v11 }
 0xa0a   :  { %s4729_s13 = scalar_lea.vmem %s3046_s11, 32  ;;  %p4734_p11 = scmp.lt.s32.totalorder %s3046_s11, %s3046_s11 }
 0xa0b   :  { %p4730_p10 = scmp.ne.s32.totalorder %s3046_s11, %s4729_s13  ;;  %p4735_p12 = scmp.lt.s32.totalorder %s4729_s13, %s4729_s13 }
 0xa0d   :  { %p4736_p13 = por %p4735_p12, %p4734_p11 }
 0xa0f   :  { %p4737_p0 = pnand %p4736_p13, %p4730_p10 }
 0xa11   :  { %4740 = shalt.err (!%p4737_p0)
}
 0xa12   :  { %s4741_s28 = scalar_lea.hbm %s5421_s19, 32 }
 0xa13   :  { %p4742_p1 = scmp.ne.s32.totalorder %s5421_s19, %s4741_s28  ;;  %p4745_p2 = scmp.lt.u32.totalorder %s4741_s28, %s5421_s19 }
 0xa15   :  { %p4747_p3 = pnand %p4745_p2, %p4742_p1 }
 0xa17   :  { %4750 = shalt.err (!%p4747_p3)
}
 0xa18   :  { %3048 = dma.vmem_to_hbm [thread:$0]  %s3046_s11, 32, %s5421_s19, [#allocation5]   ;;  %v3024_v11 = vcombine.low %v3016_v25, %v3023_v54 }
 0xa19   :  { %s4826_s10 = smov [#allocation32]   ;;  %s5451_s2 = sld [smem:[#allocation50_spill]] }
 0xa1a   :  { %s3065_s14 = sshll.u32 %s4826_s10, 4  ;;  %s3066_s14 = int_to_ptr.vmem [resolvable:$true] %s3065_s14 }
 0xa1b   :  { %s4751_s6 = scalar_lea.vmem %s3066_s14, 32  ;;  %p4756_p5 = scmp.lt.s32.totalorder %s3066_s14, %s3066_s14 }
 0xa1c   :  { %p4752_p4 = scmp.ne.s32.totalorder %s3066_s14, %s4751_s6  ;;  %p4757_p6 = scmp.lt.s32.totalorder %s4751_s6, %s4751_s6 }
 0xa1e   :  { %p4758_p7 = por %p4757_p6, %p4756_p5 }
 0xa1f   :  { %3035 = vst [vmem:[%s5451_s2] sm:$0xff] %v3024_v11 }
 0xa20   :  { %p4759_p8 = pnand %p4758_p7, %p4752_p4 }
 0xa22   :  { %4762 = shalt.err (!%p4759_p8)
}
 0xa23   :  { %s5452_s0 = sld [smem:[#allocation51_spill]] }
 0xa29   :  { %s4763_s29 = scalar_lea.hbm %s5452_s0, 32 }
 0xa2a   :  { %p4764_p9 = scmp.ne.s32.totalorder %s5452_s0, %s4763_s29  ;;  %p4767_p10 = scmp.lt.u32.totalorder %s4763_s29, %s5452_s0 }
 0xa2c   :  { %p4769_p11 = pnand %p4767_p10, %p4764_p9 }
 0xa2e   :  { %4772 = shalt.err (!%p4769_p11)
}
 0xa2f   :  { %3068 = dma.vmem_to_hbm [thread:$0]  %s3066_s14, 32, %s5452_s0, [#allocation31]   ;;  %v2534_v55 = vsub.s32 4, %v5141_v61  ;;  %v2538_v56 = vsub.s32 5, %v5141_v61 }
 0xa31   :  { %v2535_v57 = vrot.slane %v5344_v18, %v2534_v55  ;;  %v2539_v58 = vrot.slane %v5344_v18, %v2538_v56 }
 0xa5e   :  { %v2967_v4 = vpop.f32.mrb[12].mxu1 }
 0xa5f   :  { %v4278_v59 = vadd.f32 %v2967_v4, %v2535_v57  ;;  %v2969_v39 = vpop.f32.mrb[13].mxu1 }
 0xa60   :  { %v4279_v60 = vadd.f32 %v2969_v39, %v2539_v58 }
 0xa61   :  { %v2976_v63 = vsub.f32 0.0, %v4278_v59 }
 0xa62   :  { %v2977_v0 = vsub.f32 0.0, %v4279_v60 }
 0xa63   :  { %v2986_v22 = vmul.f32 1.442695, %v2976_v63 }
 0xa64   :  { %v2988_v35 = vmul.f32 1.442695, %v2977_v0 }
 0xa65   :  { %4347 = vpow2.f32 %v2986_v22 }
 0xa66   :  { %4349 = vpow2.f32 %v2988_v35 }
 0xa6f   :  { %v4348_v1 = vpop.eup %4347 }
 0xa70   :  { %v4350_v45 = vpop.eup %4349  ;;  %v2994_v2 = vadd.f32 1.0, %v4348_v1 }
 0xa71   :  { %v2995_v13 = vadd.f32 1.0, %v4350_v45 }
 0xa72   :  { %4351 = vrcp.f32 %v2994_v2 }
 0xa73   :  { %4353 = vrcp.f32 %v2995_v13 }
 0xa7c   :  { %v4352_v61 = vpop.eup %4351 }
 0xa7d   :  { %v4354_v7 = vpop.eup %4353 }
 0xa7e   :  { %v3025_v3 = vcombine.low %v4352_v61, %v4354_v7 }
 0xa80   :  { %3098 = vst.sshfl [vmem:[%s5451_s2 + $0x8] sm:$0x33 pattern:$0x76325410] %v3025_v3 }
 0xa81   :  { %4791 = dma.done.wait [#allocation5], 32  }
 0xa82   :  { %4792 = vsyncadd [#allocation5], 4294967264 }
 0xa83   :  { %4793 = dma.done.wait [#allocation31], 64  }
 0xa84   :  { %4794 = vsyncadd [#allocation31], 4294967232 }
 0xa85   :  { %3080 = vsyncpa [#allocation4], 1 }
 0xa86   :  { %3081 = vsyncpa [#allocation7], 1 }
 0xa87   :  { %3082 = vsyncpa [#allocation10], 1 }
 0xa88   :  { %3083 = vsyncpa [#allocation13], 1 }
 0xa89   :  { %3084 = vsyncpa [#allocation16], 1 }
 0xa8a   :  { %3085 = vsyncpa [#allocation19], 1 }
 0xa8b   :  { %3086 = vsyncpa [#allocation22], 1 }
 0xa8c   :  { %3087 = vsyncpa [#allocation25], 1 }
 0xa8d   :  { %3088 = vsyncpa [#allocation28], 1 }
 0xa8e   :  { %3089 = vsyncpa [#allocation5], 1 }
 0xa8f   :  { %3090 = vsyncpa [#allocation31], 1 }

</bundles_post_ra>
